<compile_context>
chip_gen: v6e
topology: v6e:2x2x1
jax: 0.10.0
libtpu: 0.0.40
codegen_flags: <defaults>
</compile_context>

<pallas_src>
from functools import partial

import jax
import jax.numpy as jnp
from jax.experimental import pallas as pl
from jax.experimental.pallas import tpu as pltpu


# ----------------------------------------------------------------------------
# Fused Pallas kernel: whole forward pass for Nb batch elements per grid step
# ----------------------------------------------------------------------------
def _vgg_fused_kernel(p1_ref, w1_ref, b1_ref, w2_ref, b2_ref, w3_ref, b3_ref,
                      w4_ref, b4_ref, o_ref, pad_ref, patch_ref, *,
                      Nb, H2, W2, C1, K2):
    PAD = (K2 - 1) // 2
    Hp, Wp = H2 + 2 * PAD, W2 + 2 * PAD
    M1 = Nb * 4 * H2 * W2            # rows of the conv3x3 matmul
    M2 = Nb * H2 * W2                # rows of the classifier matmuls
    HID = w2_ref.shape[-1]
    KTAP = K2 * K2 * C1

    # --- features: Conv3x3 'same' + ReLU as one im2col matmul (bf16 in, f32 acc)
    p = p1_ref[...].reshape(M1, p1_ref.shape[-1])              # [M1, K1P] bf16
    y1 = jnp.dot(p, w1_ref[...], preferred_element_type=jnp.float32)
    y1 = jnp.maximum(y1 + b1_ref[...], 0.0)                    # [M1, C1] f32

    # --- features: MaxPool2d(2) -----------------------------------------------
    # Wrapper ordered im2col rows as (q = pool-window position, h2, w2), so the
    # pool is a max over a LEADING axis: pure VPU maxes, no relayout.
    pooled = jnp.max(y1.reshape(Nb, 4, H2 * W2, C1), axis=1)   # [Nb, H2*W2, C1]
    pooled = pooled.reshape(Nb, H2, W2, C1)

    # --- classifier[0]: Conv5x5 'same' (pad=2) + ReLU as ONE im2col matmul -----
    # Zero only the halo strips (the interior is fully overwritten every step).
    pad_ref[:, 0:PAD, :, :] = jnp.zeros((Nb, PAD, Wp, C1), jnp.float32)
    pad_ref[:, PAD + H2:Hp, :, :] = jnp.zeros((Nb, PAD, Wp, C1), jnp.float32)
    pad_ref[:, PAD:PAD + H2, 0:PAD, :] = jnp.zeros((Nb, H2, PAD, C1), jnp.float32)
    pad_ref[:, PAD:PAD + H2, PAD + W2:Wp, :] = jnp.zeros((Nb, H2, PAD, C1),
                                                         jnp.float32)
    pad_ref[:, PAD:PAD + H2, PAD:PAD + W2, :] = pooled

    # im2col into a VMEM patch scratch: 25 pure block copies with static
    # offsets and no carried state, so a static unroll keeps live ranges to a
    # single [Nb, H2, W2, C1] block each (no accumulator spill pressure).
    for kh in range(K2):
        for kw in range(K2):
            t = kh * K2 + kw
            patch_ref[:, :, :, t * C1:(t + 1) * C1] = \
                pad_ref[:, kh:kh + H2, kw:kw + W2, :]

    pm = patch_ref[...].reshape(M2, KTAP).astype(jnp.bfloat16)  # [M2, 200]
    y2 = jnp.dot(pm, w2_ref[...], preferred_element_type=jnp.float32)
    y2 = jnp.maximum(y2 + b2_ref[...], 0.0)                     # [M2, HID] f32
    # TODO(synk): nn.Dropout treated as identity (inference / eval semantics).

    # --- classifier[3]: Conv1x1 + ReLU ----------------------------------------
    y3 = jnp.dot(y2.astype(jnp.bfloat16), w3_ref[...],
                 preferred_element_type=jnp.float32)
    y3 = jnp.maximum(y3 + b3_ref[...], 0.0)                     # [M2, HID] f32
    # TODO(synk): nn.Dropout treated as identity (inference / eval semantics).

    # --- classifier[6] fused with x.mean(dim=[2,3]) ----------------------------
    # Mean and 1x1 conv are both linear -> take the mean first (H2*W2x less MXU
    # work, no [M2, num_classes] intermediate).
    xm = jnp.sum(y3.reshape(Nb, H2 * W2, HID), axis=1) * (1.0 / float(H2 * W2))
    out = jnp.dot(xm.astype(jnp.bfloat16), w4_ref[...],
                  preferred_element_type=jnp.float32) + b4_ref[...]
    o_ref[0] = out.astype(o_ref.dtype)                          # [Nb, NCP]


# ----------------------------------------------------------------------------
# Wrapper: layout plumbing (NCHW->NHWC, conv1 im2col, weight flattening) + call
# ----------------------------------------------------------------------------
@partial(jax.jit, static_argnames=("nb",))
def vgg_forward(x_nchw, params, nb=2):
    x = jnp.transpose(x_nchw, (0, 2, 3, 1)).astype(jnp.float32)  # NCHW -> NHWC
    N, H, W, Cin = x.shape
    assert H % 2 == 0 and W % 2 == 0, "maxpool2 expects even H, W"
    assert N % nb == 0, "batch must be divisible by the per-step block"

    C1 = params["f_w"].shape[-1]
    HID = params["c1_w"].shape[-1]
    NC = params["c3_w"].shape[-1]
    K2 = params["c1_w"].shape[0]                                 # 5
    H2, W2 = H // 2, W // 2
    KTAP = K2 * K2 * C1                                          # 200
    NCP = ((NC + 127) // 128) * 128                              # lane-dense out

    # im2col for the 3x3 'same' conv; rows ordered (n, q=pool-window pos, h2, w2)
    # so the in-kernel maxpool is a leading-axis max (no relayout).
    K1 = 9 * Cin
    K1P = ((K1 + 7) // 8) * 8
    xp = jnp.pad(x, ((0, 0), (1, 1), (1, 1), (0, 0)))
    cols = [xp[:, kh:kh + H, kw:kw + W, :] for kh in range(3) for kw in range(3)]
    pat = jnp.concatenate(cols, axis=-1)                         # [N, H, W, K1]
    pat = jnp.pad(pat, ((0, 0), (0, 0), (0, 0), (0, K1P - K1)))
    pat = pat.reshape(N, H2, 2, W2, 2, K1P).transpose(0, 2, 4, 1, 3, 5)
    patches = pat.reshape(N, 4, H2 * W2, K1P).astype(jnp.bfloat16)

    w1 = jnp.pad(params["f_w"].reshape(K1, C1),
                 ((0, K1P - K1), (0, 0))).astype(jnp.bfloat16)
    b1 = params["f_b"].reshape(1, C1).astype(jnp.float32)
    w2 = params["c1_w"].reshape(KTAP, HID).astype(jnp.bfloat16)  # (kh,kw,c) major
    b2 = params["c1_b"].reshape(1, HID).astype(jnp.float32)
    w3 = params["c2_w"].reshape(HID, HID).astype(jnp.bfloat16)
    b3 = params["c2_b"].reshape(1, HID).astype(jnp.float32)
    w4 = jnp.pad(params["c3_w"].reshape(HID, NC),
                 ((0, 0), (0, NCP - NC))).astype(jnp.bfloat16)
    b4 = jnp.pad(params["c3_b"].reshape(1, NC),
                 ((0, 0), (0, NCP - NC))).astype(jnp.float32)

    grid_n = N // nb
    flops = 2 * N * (4 * H2 * W2 * K1P * C1
                     + H2 * W2 * KTAP * HID
                     + H2 * W2 * HID * HID
                     + HID * NCP)
    bytes_accessed = (2 * (patches.size + w1.size + w2.size + w3.size + w4.size)
                      + 4 * (b1.size + b2.size + b3.size + b4.size + N * NCP))

    kernel = partial(_vgg_fused_kernel, Nb=nb, H2=H2, W2=W2, C1=C1, K2=K2)
    out = pl.pallas_call(
        kernel,
        out_shape=jax.ShapeDtypeStruct((grid_n, nb, NCP), jnp.float32),
        grid=(grid_n,),
        in_specs=[
            pl.BlockSpec((nb, 4, H2 * W2, K1P), lambda n: (n, 0, 0, 0)),  # patches
            pl.BlockSpec((K1P, C1), lambda n: (0, 0)),     # w1 (resident)
            pl.BlockSpec((1, C1), lambda n: (0, 0)),       # b1
            pl.BlockSpec((KTAP, HID), lambda n: (0, 0)),   # w2 (im2col-flattened)
            pl.BlockSpec((1, HID), lambda n: (0, 0)),      # b2
            pl.BlockSpec((HID, HID), lambda n: (0, 0)),    # w3
            pl.BlockSpec((1, HID), lambda n: (0, 0)),      # b3
            pl.BlockSpec((HID, NCP), lambda n: (0, 0)),    # w4 (lane-padded)
            pl.BlockSpec((1, NCP), lambda n: (0, 0)),      # b4
        ],
        out_specs=pl.BlockSpec((1, nb, NCP), lambda n: (n, 0, 0)),
        scratch_shapes=[
            pltpu.VMEM((nb, H2 + K2 - 1, W2 + K2 - 1, C1), jnp.float32),  # padded map
            pltpu.VMEM((nb, H2, W2, KTAP), jnp.float32),                  # im2col patch
        ],
        compiler_params=pltpu.CompilerParams(
            dimension_semantics=("parallel",)),   # batch blocks independent (v7x 2 TCs)
        cost_estimate=pl.CostEstimate(flops=flops, transcendentals=0,
                                      bytes_accessed=bytes_accessed),
    )(patches, w1, b1, w2, b2, w3, b3, w4, b4)
    return out.reshape(N, NCP)[:, :NC]


# ----------------------------------------------------------------------------
# Parameter init (kaiming_normal_, mode='fan_out', relu; bias = 0), HWIO layout
# ----------------------------------------------------------------------------
def kaiming_conv(key, kh, kw, cin, cout):
    fan_out = cout * kh * kw
    std = (2.0 / fan_out) ** 0.5
    w = jax.random.normal(key, (kh, kw, cin, cout), jnp.float32) * std
    b = jnp.zeros((cout,), jnp.float32)
    return w, b


def init_params(key, in_chan, fout_chan, hidden, num_classes):
    k0, k1, k2, k3 = jax.random.split(key, 4)
    p = {}
    p["f_w"], p["f_b"] = kaiming_conv(k0, 3, 3, in_chan, fout_chan)     # features conv
    p["c1_w"], p["c1_b"] = kaiming_conv(k1, 5, 5, fout_chan, hidden)    # classifier[0]
    p["c2_w"], p["c2_b"] = kaiming_conv(k2, 1, 1, hidden, hidden)       # classifier[3]
    p["c3_w"], p["c3_b"] = kaiming_conv(k3, 1, 1, hidden, num_classes)  # classifier[6]
    return p


if __name__ == "__main__":
    key = jax.random.PRNGKey(0)
    k_param, k_x = jax.random.split(key)

    N, C_IN, H, W = 4, 3, 16, 16   # N=4, Nb=2 -> grid length 2 (both v7x TCs busy)
    FOUT_CHAN = 8                  # output channels of the features stack
    HIDDEN = 128                   # scaled-down stand-in for 4096
    NUM_CLASSES = 16               # scaled-down stand-in for 1000

    params = init_params(k_param, C_IN, FOUT_CHAN, HIDDEN, NUM_CLASSES)
    x = jax.random.normal(k_x, (N, C_IN, H, W), jnp.float32)

    out = vgg_forward(x, params, nb=2)
    out = jax.block_until_ready(out)
    assert out.shape == (N, NUM_CLASSES), out.shape
    assert out.dtype == jnp.float32
    assert bool(jnp.all(jnp.isfinite(out)))
    print("KERNEL_OK")
</pallas_src>

<mosaic_0001>
module attributes {stable_mosaic.version = 11 : i64} {
  func.func @_vgg_fused_kernel(%arg0: i32, %arg1: memref<2x4x64x32xbf16, #tpu.memory_space<vmem>>, %arg2: memref<32x8xbf16, #tpu.memory_space<vmem>>, %arg3: memref<1x8xf32, #tpu.memory_space<vmem>>, %arg4: memref<200x128xbf16, #tpu.memory_space<vmem>>, %arg5: memref<1x128xf32, #tpu.memory_space<vmem>>, %arg6: memref<128x128xbf16, #tpu.memory_space<vmem>>, %arg7: memref<1x128xf32, #tpu.memory_space<vmem>>, %arg8: memref<128x128xbf16, #tpu.memory_space<vmem>>, %arg9: memref<1x128xf32, #tpu.memory_space<vmem>>, %arg10: memref<1x2x128xf32, #tpu.memory_space<vmem>>, %arg11: memref<2x12x12x8xf32, #tpu.memory_space<vmem>>, %arg12: memref<2x8x8x200xf32, #tpu.memory_space<vmem>>) attributes {dimension_semantics = [#tpu.dimension_semantics<parallel>], iteration_bounds = array<i64: 2>, scalar_prefetch = 0 : i64, scratch_operands = 2 : i64, tpu.core_type = #tpu.core_type<tc>, window_params = [{transform_indices = @transform_0, window_bounds = array<i64: 2, 4, 64, 32>}, {pipeline_mode = #tpu.pipeline_mode<synchronous>, transform_indices = @transform_1, window_bounds = array<i64: 32, 8>}, {pipeline_mode = #tpu.pipeline_mode<synchronous>, transform_indices = @transform_2, window_bounds = array<i64: 1, 8>}, {pipeline_mode = #tpu.pipeline_mode<synchronous>, transform_indices = @transform_3, window_bounds = array<i64: 200, 128>}, {pipeline_mode = #tpu.pipeline_mode<synchronous>, transform_indices = @transform_4, window_bounds = array<i64: 1, 128>}, {pipeline_mode = #tpu.pipeline_mode<synchronous>, transform_indices = @transform_5, window_bounds = array<i64: 128, 128>}, {pipeline_mode = #tpu.pipeline_mode<synchronous>, transform_indices = @transform_6, window_bounds = array<i64: 1, 128>}, {pipeline_mode = #tpu.pipeline_mode<synchronous>, transform_indices = @transform_7, window_bounds = array<i64: 128, 128>}, {pipeline_mode = #tpu.pipeline_mode<synchronous>, transform_indices = @transform_8, window_bounds = array<i64: 1, 128>}, {transform_indices = @transform_9, window_bounds = array<i64: 1, 2, 128>}]} {
    %c0 = arith.constant 0 : index
    %c0_0 = arith.constant 0 : index
    %c0_1 = arith.constant 0 : index
    %c0_2 = arith.constant 0 : index
    %0 = vector.load %arg1[%c0, %c0_0, %c0_1, %c0_2] : memref<2x4x64x32xbf16, #tpu.memory_space<vmem>>, vector<2x4x64x32xbf16>
    %1 = vector.shape_cast %0 : vector<2x4x64x32xbf16> to vector<512x32xbf16>
    %c0_3 = arith.constant 0 : index
    %c0_4 = arith.constant 0 : index
    %2 = vector.load %arg2[%c0_3, %c0_4] : memref<32x8xbf16, #tpu.memory_space<vmem>>, vector<32x8xbf16>
    %cst = arith.constant dense<0.000000e+00> : vector<512x8xf32>
    %3 = tpu.matmul %1, %2, %cst {dimension_numbers = #tpu.dot_dimension_numbers<[1], [0], [0], [1], [0, 0, 1, 1], [], []>} : vector<512x32xbf16>, vector<32x8xbf16>, vector<512x8xf32> -> vector<512x8xf32>
    %c0_5 = arith.constant 0 : index
    %c0_6 = arith.constant 0 : index
    %4 = vector.load %arg3[%c0_5, %c0_6] : memref<1x8xf32, #tpu.memory_space<vmem>>, vector<1x8xf32>
    %5 = vector.broadcast %4 : vector<1x8xf32> to vector<512x8xf32>
    %6 = arith.addf %3, %5 : vector<512x8xf32>
    %cst_7 = arith.constant 0.000000e+00 : f32
    %7 = vector.broadcast %cst_7 : f32 to vector<512x8xf32>
    %8 = arith.maximumf %6, %7 : vector<512x8xf32>
    %9 = vector.shape_cast %8 : vector<512x8xf32> to vector<2x4x64x8xf32>
    %cst_8 = arith.constant dense<0xFF800000> : vector<2x64x8xf32>
    %10 = vector.multi_reduction <maximumf>, %9, %cst_8 [1] : vector<2x4x64x8xf32> to vector<2x64x8xf32>
    %11 = vector.shape_cast %10 : vector<2x64x8xf32> to vector<2x8x8x8xf32>
    %cst_9 = arith.constant 0.000000e+00 : f32
    %12 = vector.broadcast %cst_9 : f32 to vector<2x2x12x8xf32>
    %c0_10 = arith.constant 0 : index
    %c0_11 = arith.constant 0 : index
    %c0_12 = arith.constant 0 : index
    %c0_13 = arith.constant 0 : index
    %13 = vector.load %arg11[%c0_10, %c0_11, %c0_12, %c0_13] : memref<2x12x12x8xf32, #tpu.memory_space<vmem>>, vector<2x2x12x8xf32>
    tpu.vector_store %arg11[%c0_10, %c0_11, %c0_12, %c0_13], %12 {strides = array<i32>} : memref<2x12x12x8xf32, #tpu.memory_space<vmem>>, vector<2x2x12x8xf32>,
    %cst_14 = arith.constant 0.000000e+00 : f32
    %14 = vector.broadcast %cst_14 : f32 to vector<2x2x12x8xf32>
    %c0_15 = arith.constant 0 : index
    %c10 = arith.constant 10 : index
    %c0_16 = arith.constant 0 : index
    %c0_17 = arith.constant 0 : index
    %15 = vector.load %arg11[%c0_15, %c10, %c0_16, %c0_17] : memref<2x12x12x8xf32, #tpu.memory_space<vmem>>, vector<2x2x12x8xf32>
    tpu.vector_store %arg11[%c0_15, %c10, %c0_16, %c0_17], %14 {strides = array<i32>} : memref<2x12x12x8xf32, #tpu.memory_space<vmem>>, vector<2x2x12x8xf32>,
    %cst_18 = arith.constant 0.000000e+00 : f32
    %16 = vector.broadcast %cst_18 : f32 to vector<2x8x2x8xf32>
    %c0_19 = arith.constant 0 : index
    %c2 = arith.constant 2 : index
    %c0_20 = arith.constant 0 : index
    %c0_21 = arith.constant 0 : index
    %17 = vector.load %arg11[%c0_19, %c2, %c0_20, %c0_21] : memref<2x12x12x8xf32, #tpu.memory_space<vmem>>, vector<2x8x2x8xf32>
    tpu.vector_store %arg11[%c0_19, %c2, %c0_20, %c0_21], %16 {strides = array<i32>} : memref<2x12x12x8xf32, #tpu.memory_space<vmem>>, vector<2x8x2x8xf32>,
    %cst_22 = arith.constant 0.000000e+00 : f32
    %18 = vector.broadcast %cst_22 : f32 to vector<2x8x2x8xf32>
    %c0_23 = arith.constant 0 : index
    %c2_24 = arith.constant 2 : index
    %c10_25 = arith.constant 10 : index
    %c0_26 = arith.constant 0 : index
    %19 = vector.load %arg11[%c0_23, %c2_24, %c10_25, %c0_26] : memref<2x12x12x8xf32, #tpu.memory_space<vmem>>, vector<2x8x2x8xf32>
    tpu.vector_store %arg11[%c0_23, %c2_24, %c10_25, %c0_26], %18 {strides = array<i32>} : memref<2x12x12x8xf32, #tpu.memory_space<vmem>>, vector<2x8x2x8xf32>,
    %c0_27 = arith.constant 0 : index
    %c2_28 = arith.constant 2 : index
    %c2_29 = arith.constant 2 : index
    %c0_30 = arith.constant 0 : index
    %20 = vector.load %arg11[%c0_27, %c2_28, %c2_29, %c0_30] : memref<2x12x12x8xf32, #tpu.memory_space<vmem>>, vector<2x8x8x8xf32>
    tpu.vector_store %arg11[%c0_27, %c2_28, %c2_29, %c0_30], %11 {strides = array<i32>} : memref<2x12x12x8xf32, #tpu.memory_space<vmem>>, vector<2x8x8x8xf32>,
    %c0_31 = arith.constant 0 : index
    %c0_32 = arith.constant 0 : index
    %c0_33 = arith.constant 0 : index
    %c0_34 = arith.constant 0 : index
    %21 = vector.load %arg11[%c0_31, %c0_32, %c0_33, %c0_34] : memref<2x12x12x8xf32, #tpu.memory_space<vmem>>, vector<2x8x8x8xf32>
    %c0_35 = arith.constant 0 : index
    %c0_36 = arith.constant 0 : index
    %c0_37 = arith.constant 0 : index
    %c0_38 = arith.constant 0 : index
    %22 = vector.load %arg12[%c0_35, %c0_36, %c0_37, %c0_38] : memref<2x8x8x200xf32, #tpu.memory_space<vmem>>, vector<2x8x8x8xf32>
    tpu.vector_store %arg12[%c0_35, %c0_36, %c0_37, %c0_38], %21 {strides = array<i32>} : memref<2x8x8x200xf32, #tpu.memory_space<vmem>>, vector<2x8x8x8xf32>,
    %c0_39 = arith.constant 0 : index
    %c0_40 = arith.constant 0 : index
    %c1 = arith.constant 1 : index
    %c0_41 = arith.constant 0 : index
    %23 = vector.load %arg11[%c0_39, %c0_40, %c1, %c0_41] : memref<2x12x12x8xf32, #tpu.memory_space<vmem>>, vector<2x8x8x8xf32>
    %c0_42 = arith.constant 0 : index
    %c0_43 = arith.constant 0 : index
    %c0_44 = arith.constant 0 : index
    %c8 = arith.constant 8 : index
    %24 = vector.load %arg12[%c0_42, %c0_43, %c0_44, %c8] : memref<2x8x8x200xf32, #tpu.memory_space<vmem>>, vector<2x8x8x8xf32>
    tpu.vector_store %arg12[%c0_42, %c0_43, %c0_44, %c8], %23 {strides = array<i32>} : memref<2x8x8x200xf32, #tpu.memory_space<vmem>>, vector<2x8x8x8xf32>,
    %c0_45 = arith.constant 0 : index
    %c0_46 = arith.constant 0 : index
    %c2_47 = arith.constant 2 : index
    %c0_48 = arith.constant 0 : index
    %25 = vector.load %arg11[%c0_45, %c0_46, %c2_47, %c0_48] : memref<2x12x12x8xf32, #tpu.memory_space<vmem>>, vector<2x8x8x8xf32>
    %c0_49 = arith.constant 0 : index
    %c0_50 = arith.constant 0 : index
    %c0_51 = arith.constant 0 : index
    %c16 = arith.constant 16 : index
    %26 = vector.load %arg12[%c0_49, %c0_50, %c0_51, %c16] : memref<2x8x8x200xf32, #tpu.memory_space<vmem>>, vector<2x8x8x8xf32>
    tpu.vector_store %arg12[%c0_49, %c0_50, %c0_51, %c16], %25 {strides = array<i32>} : memref<2x8x8x200xf32, #tpu.memory_space<vmem>>, vector<2x8x8x8xf32>,
    %c0_52 = arith.constant 0 : index
    %c0_53 = arith.constant 0 : index
    %c3 = arith.constant 3 : index
    %c0_54 = arith.constant 0 : index
    %27 = vector.load %arg11[%c0_52, %c0_53, %c3, %c0_54] : memref<2x12x12x8xf32, #tpu.memory_space<vmem>>, vector<2x8x8x8xf32>
    %c0_55 = arith.constant 0 : index
    %c0_56 = arith.constant 0 : index
    %c0_57 = arith.constant 0 : index
    %c24 = arith.constant 24 : index
    %28 = vector.load %arg12[%c0_55, %c0_56, %c0_57, %c24] : memref<2x8x8x200xf32, #tpu.memory_space<vmem>>, vector<2x8x8x8xf32>
    tpu.vector_store %arg12[%c0_55, %c0_56, %c0_57, %c24], %27 {strides = array<i32>} : memref<2x8x8x200xf32, #tpu.memory_space<vmem>>, vector<2x8x8x8xf32>,
    %c0_58 = arith.constant 0 : index
    %c0_59 = arith.constant 0 : index
    %c4 = arith.constant 4 : index
    %c0_60 = arith.constant 0 : index
    %29 = vector.load %arg11[%c0_58, %c0_59, %c4, %c0_60] : memref<2x12x12x8xf32, #tpu.memory_space<vmem>>, vector<2x8x8x8xf32>
    %c0_61 = arith.constant 0 : index
    %c0_62 = arith.constant 0 : index
    %c0_63 = arith.constant 0 : index
    %c32 = arith.constant 32 : index
    %30 = vector.load %arg12[%c0_61, %c0_62, %c0_63, %c32] : memref<2x8x8x200xf32, #tpu.memory_space<vmem>>, vector<2x8x8x8xf32>
    tpu.vector_store %arg12[%c0_61, %c0_62, %c0_63, %c32], %29 {strides = array<i32>} : memref<2x8x8x200xf32, #tpu.memory_space<vmem>>, vector<2x8x8x8xf32>,
    %c0_64 = arith.constant 0 : index
    %c1_65 = arith.constant 1 : index
    %c0_66 = arith.constant 0 : index
    %c0_67 = arith.constant 0 : index
    %31 = vector.load %arg11[%c0_64, %c1_65, %c0_66, %c0_67] : memref<2x12x12x8xf32, #tpu.memory_space<vmem>>, vector<2x8x8x8xf32>
    %c0_68 = arith.constant 0 : index
    %c0_69 = arith.constant 0 : index
    %c0_70 = arith.constant 0 : index
    %c40 = arith.constant 40 : index
    %32 = vector.load %arg12[%c0_68, %c0_69, %c0_70, %c40] : memref<2x8x8x200xf32, #tpu.memory_space<vmem>>, vector<2x8x8x8xf32>
    tpu.vector_store %arg12[%c0_68, %c0_69, %c0_70, %c40], %31 {strides = array<i32>} : memref<2x8x8x200xf32, #tpu.memory_space<vmem>>, vector<2x8x8x8xf32>,
    %c0_71 = arith.constant 0 : index
    %c1_72 = arith.constant 1 : index
    %c1_73 = arith.constant 1 : index
    %c0_74 = arith.constant 0 : index
    %33 = vector.load %arg11[%c0_71, %c1_72, %c1_73, %c0_74] : memref<2x12x12x8xf32, #tpu.memory_space<vmem>>, vector<2x8x8x8xf32>
    %c0_75 = arith.constant 0 : index
    %c0_76 = arith.constant 0 : index
    %c0_77 = arith.constant 0 : index
    %c48 = arith.constant 48 : index
    %34 = vector.load %arg12[%c0_75, %c0_76, %c0_77, %c48] : memref<2x8x8x200xf32, #tpu.memory_space<vmem>>, vector<2x8x8x8xf32>
    tpu.vector_store %arg12[%c0_75, %c0_76, %c0_77, %c48], %33 {strides = array<i32>} : memref<2x8x8x200xf32, #tpu.memory_space<vmem>>, vector<2x8x8x8xf32>,
    %c0_78 = arith.constant 0 : index
    %c1_79 = arith.constant 1 : index
    %c2_80 = arith.constant 2 : index
    %c0_81 = arith.constant 0 : index
    %35 = vector.load %arg11[%c0_78, %c1_79, %c2_80, %c0_81] : memref<2x12x12x8xf32, #tpu.memory_space<vmem>>, vector<2x8x8x8xf32>
    %c0_82 = arith.constant 0 : index
    %c0_83 = arith.constant 0 : index
    %c0_84 = arith.constant 0 : index
    %c56 = arith.constant 56 : index
    %36 = vector.load %arg12[%c0_82, %c0_83, %c0_84, %c56] : memref<2x8x8x200xf32, #tpu.memory_space<vmem>>, vector<2x8x8x8xf32>
    tpu.vector_store %arg12[%c0_82, %c0_83, %c0_84, %c56], %35 {strides = array<i32>} : memref<2x8x8x200xf32, #tpu.memory_space<vmem>>, vector<2x8x8x8xf32>,
    %c0_85 = arith.constant 0 : index
    %c1_86 = arith.constant 1 : index
    %c3_87 = arith.constant 3 : index
    %c0_88 = arith.constant 0 : index
    %37 = vector.load %arg11[%c0_85, %c1_86, %c3_87, %c0_88] : memref<2x12x12x8xf32, #tpu.memory_space<vmem>>, vector<2x8x8x8xf32>
    %c0_89 = arith.constant 0 : index
    %c0_90 = arith.constant 0 : index
    %c0_91 = arith.constant 0 : index
    %c64 = arith.constant 64 : index
    %38 = vector.load %arg12[%c0_89, %c0_90, %c0_91, %c64] : memref<2x8x8x200xf32, #tpu.memory_space<vmem>>, vector<2x8x8x8xf32>
    tpu.vector_store %arg12[%c0_89, %c0_90, %c0_91, %c64], %37 {strides = array<i32>} : memref<2x8x8x200xf32, #tpu.memory_space<vmem>>, vector<2x8x8x8xf32>,
    %c0_92 = arith.constant 0 : index
    %c1_93 = arith.constant 1 : index
    %c4_94 = arith.constant 4 : index
    %c0_95 = arith.constant 0 : index
    %39 = vector.load %arg11[%c0_92, %c1_93, %c4_94, %c0_95] : memref<2x12x12x8xf32, #tpu.memory_space<vmem>>, vector<2x8x8x8xf32>
    %c0_96 = arith.constant 0 : index
    %c0_97 = arith.constant 0 : index
    %c0_98 = arith.constant 0 : index
    %c72 = arith.constant 72 : index
    %40 = vector.load %arg12[%c0_96, %c0_97, %c0_98, %c72] : memref<2x8x8x200xf32, #tpu.memory_space<vmem>>, vector<2x8x8x8xf32>
    tpu.vector_store %arg12[%c0_96, %c0_97, %c0_98, %c72], %39 {strides = array<i32>} : memref<2x8x8x200xf32, #tpu.memory_space<vmem>>, vector<2x8x8x8xf32>,
    %c0_99 = arith.constant 0 : index
    %c2_100 = arith.constant 2 : index
    %c0_101 = arith.constant 0 : index
    %c0_102 = arith.constant 0 : index
    %41 = vector.load %arg11[%c0_99, %c2_100, %c0_101, %c0_102] : memref<2x12x12x8xf32, #tpu.memory_space<vmem>>, vector<2x8x8x8xf32>
    %c0_103 = arith.constant 0 : index
    %c0_104 = arith.constant 0 : index
    %c0_105 = arith.constant 0 : index
    %c80 = arith.constant 80 : index
    %42 = vector.load %arg12[%c0_103, %c0_104, %c0_105, %c80] : memref<2x8x8x200xf32, #tpu.memory_space<vmem>>, vector<2x8x8x8xf32>
    tpu.vector_store %arg12[%c0_103, %c0_104, %c0_105, %c80], %41 {strides = array<i32>} : memref<2x8x8x200xf32, #tpu.memory_space<vmem>>, vector<2x8x8x8xf32>,
    %c0_106 = arith.constant 0 : index
    %c2_107 = arith.constant 2 : index
    %c1_108 = arith.constant 1 : index
    %c0_109 = arith.constant 0 : index
    %43 = vector.load %arg11[%c0_106, %c2_107, %c1_108, %c0_109] : memref<2x12x12x8xf32, #tpu.memory_space<vmem>>, vector<2x8x8x8xf32>
    %c0_110 = arith.constant 0 : index
    %c0_111 = arith.constant 0 : index
    %c0_112 = arith.constant 0 : index
    %c88 = arith.constant 88 : index
    %44 = vector.load %arg12[%c0_110, %c0_111, %c0_112, %c88] : memref<2x8x8x200xf32, #tpu.memory_space<vmem>>, vector<2x8x8x8xf32>
    tpu.vector_store %arg12[%c0_110, %c0_111, %c0_112, %c88], %43 {strides = array<i32>} : memref<2x8x8x200xf32, #tpu.memory_space<vmem>>, vector<2x8x8x8xf32>,
    %c0_113 = arith.constant 0 : index
    %c2_114 = arith.constant 2 : index
    %c2_115 = arith.constant 2 : index
    %c0_116 = arith.constant 0 : index
    %45 = vector.load %arg11[%c0_113, %c2_114, %c2_115, %c0_116] : memref<2x12x12x8xf32, #tpu.memory_space<vmem>>, vector<2x8x8x8xf32>
    %c0_117 = arith.constant 0 : index
    %c0_118 = arith.constant 0 : index
    %c0_119 = arith.constant 0 : index
    %c96 = arith.constant 96 : index
    %46 = vector.load %arg12[%c0_117, %c0_118, %c0_119, %c96] : memref<2x8x8x200xf32, #tpu.memory_space<vmem>>, vector<2x8x8x8xf32>
    tpu.vector_store %arg12[%c0_117, %c0_118, %c0_119, %c96], %45 {strides = array<i32>} : memref<2x8x8x200xf32, #tpu.memory_space<vmem>>, vector<2x8x8x8xf32>,
    %c0_120 = arith.constant 0 : index
    %c2_121 = arith.constant 2 : index
    %c3_122 = arith.constant 3 : index
    %c0_123 = arith.constant 0 : index
    %47 = vector.load %arg11[%c0_120, %c2_121, %c3_122, %c0_123] : memref<2x12x12x8xf32, #tpu.memory_space<vmem>>, vector<2x8x8x8xf32>
    %c0_124 = arith.constant 0 : index
    %c0_125 = arith.constant 0 : index
    %c0_126 = arith.constant 0 : index
    %c104 = arith.constant 104 : index
    %48 = vector.load %arg12[%c0_124, %c0_125, %c0_126, %c104] : memref<2x8x8x200xf32, #tpu.memory_space<vmem>>, vector<2x8x8x8xf32>
    tpu.vector_store %arg12[%c0_124, %c0_125, %c0_126, %c104], %47 {strides = array<i32>} : memref<2x8x8x200xf32, #tpu.memory_space<vmem>>, vector<2x8x8x8xf32>,
    %c0_127 = arith.constant 0 : index
    %c2_128 = arith.constant 2 : index
    %c4_129 = arith.constant 4 : index
    %c0_130 = arith.constant 0 : index
    %49 = vector.load %arg11[%c0_127, %c2_128, %c4_129, %c0_130] : memref<2x12x12x8xf32, #tpu.memory_space<vmem>>, vector<2x8x8x8xf32>
    %c0_131 = arith.constant 0 : index
    %c0_132 = arith.constant 0 : index
    %c0_133 = arith.constant 0 : index
    %c112 = arith.constant 112 : index
    %50 = vector.load %arg12[%c0_131, %c0_132, %c0_133, %c112] : memref<2x8x8x200xf32, #tpu.memory_space<vmem>>, vector<2x8x8x8xf32>
    tpu.vector_store %arg12[%c0_131, %c0_132, %c0_133, %c112], %49 {strides = array<i32>} : memref<2x8x8x200xf32, #tpu.memory_space<vmem>>, vector<2x8x8x8xf32>,
    %c0_134 = arith.constant 0 : index
    %c3_135 = arith.constant 3 : index
    %c0_136 = arith.constant 0 : index
    %c0_137 = arith.constant 0 : index
    %51 = vector.load %arg11[%c0_134, %c3_135, %c0_136, %c0_137] : memref<2x12x12x8xf32, #tpu.memory_space<vmem>>, vector<2x8x8x8xf32>
    %c0_138 = arith.constant 0 : index
    %c0_139 = arith.constant 0 : index
    %c0_140 = arith.constant 0 : index
    %c120 = arith.constant 120 : index
    %52 = vector.load %arg12[%c0_138, %c0_139, %c0_140, %c120] : memref<2x8x8x200xf32, #tpu.memory_space<vmem>>, vector<2x8x8x8xf32>
    tpu.vector_store %arg12[%c0_138, %c0_139, %c0_140, %c120], %51 {strides = array<i32>} : memref<2x8x8x200xf32, #tpu.memory_space<vmem>>, vector<2x8x8x8xf32>,
    %c0_141 = arith.constant 0 : index
    %c3_142 = arith.constant 3 : index
    %c1_143 = arith.constant 1 : index
    %c0_144 = arith.constant 0 : index
    %53 = vector.load %arg11[%c0_141, %c3_142, %c1_143, %c0_144] : memref<2x12x12x8xf32, #tpu.memory_space<vmem>>, vector<2x8x8x8xf32>
    %c0_145 = arith.constant 0 : index
    %c0_146 = arith.constant 0 : index
    %c0_147 = arith.constant 0 : index
    %c128 = arith.constant 128 : index
    %54 = vector.load %arg12[%c0_145, %c0_146, %c0_147, %c128] : memref<2x8x8x200xf32, #tpu.memory_space<vmem>>, vector<2x8x8x8xf32>
    tpu.vector_store %arg12[%c0_145, %c0_146, %c0_147, %c128], %53 {strides = array<i32>} : memref<2x8x8x200xf32, #tpu.memory_space<vmem>>, vector<2x8x8x8xf32>,
    %c0_148 = arith.constant 0 : index
    %c3_149 = arith.constant 3 : index
    %c2_150 = arith.constant 2 : index
    %c0_151 = arith.constant 0 : index
    %55 = vector.load %arg11[%c0_148, %c3_149, %c2_150, %c0_151] : memref<2x12x12x8xf32, #tpu.memory_space<vmem>>, vector<2x8x8x8xf32>
    %c0_152 = arith.constant 0 : index
    %c0_153 = arith.constant 0 : index
    %c0_154 = arith.constant 0 : index
    %c136 = arith.constant 136 : index
    %56 = vector.load %arg12[%c0_152, %c0_153, %c0_154, %c136] : memref<2x8x8x200xf32, #tpu.memory_space<vmem>>, vector<2x8x8x8xf32>
    tpu.vector_store %arg12[%c0_152, %c0_153, %c0_154, %c136], %55 {strides = array<i32>} : memref<2x8x8x200xf32, #tpu.memory_space<vmem>>, vector<2x8x8x8xf32>,
    %c0_155 = arith.constant 0 : index
    %c3_156 = arith.constant 3 : index
    %c3_157 = arith.constant 3 : index
    %c0_158 = arith.constant 0 : index
    %57 = vector.load %arg11[%c0_155, %c3_156, %c3_157, %c0_158] : memref<2x12x12x8xf32, #tpu.memory_space<vmem>>, vector<2x8x8x8xf32>
    %c0_159 = arith.constant 0 : index
    %c0_160 = arith.constant 0 : index
    %c0_161 = arith.constant 0 : index
    %c144 = arith.constant 144 : index
    %58 = vector.load %arg12[%c0_159, %c0_160, %c0_161, %c144] : memref<2x8x8x200xf32, #tpu.memory_space<vmem>>, vector<2x8x8x8xf32>
    tpu.vector_store %arg12[%c0_159, %c0_160, %c0_161, %c144], %57 {strides = array<i32>} : memref<2x8x8x200xf32, #tpu.memory_space<vmem>>, vector<2x8x8x8xf32>,
    %c0_162 = arith.constant 0 : index
    %c3_163 = arith.constant 3 : index
    %c4_164 = arith.constant 4 : index
    %c0_165 = arith.constant 0 : index
    %59 = vector.load %arg11[%c0_162, %c3_163, %c4_164, %c0_165] : memref<2x12x12x8xf32, #tpu.memory_space<vmem>>, vector<2x8x8x8xf32>
    %c0_166 = arith.constant 0 : index
    %c0_167 = arith.constant 0 : index
    %c0_168 = arith.constant 0 : index
    %c152 = arith.constant 152 : index
    %60 = vector.load %arg12[%c0_166, %c0_167, %c0_168, %c152] : memref<2x8x8x200xf32, #tpu.memory_space<vmem>>, vector<2x8x8x8xf32>
    tpu.vector_store %arg12[%c0_166, %c0_167, %c0_168, %c152], %59 {strides = array<i32>} : memref<2x8x8x200xf32, #tpu.memory_space<vmem>>, vector<2x8x8x8xf32>,
    %c0_169 = arith.constant 0 : index
    %c4_170 = arith.constant 4 : index
    %c0_171 = arith.constant 0 : index
    %c0_172 = arith.constant 0 : index
    %61 = vector.load %arg11[%c0_169, %c4_170, %c0_171, %c0_172] : memref<2x12x12x8xf32, #tpu.memory_space<vmem>>, vector<2x8x8x8xf32>
    %c0_173 = arith.constant 0 : index
    %c0_174 = arith.constant 0 : index
    %c0_175 = arith.constant 0 : index
    %c160 = arith.constant 160 : index
    %62 = vector.load %arg12[%c0_173, %c0_174, %c0_175, %c160] : memref<2x8x8x200xf32, #tpu.memory_space<vmem>>, vector<2x8x8x8xf32>
    tpu.vector_store %arg12[%c0_173, %c0_174, %c0_175, %c160], %61 {strides = array<i32>} : memref<2x8x8x200xf32, #tpu.memory_space<vmem>>, vector<2x8x8x8xf32>,
    %c0_176 = arith.constant 0 : index
    %c4_177 = arith.constant 4 : index
    %c1_178 = arith.constant 1 : index
    %c0_179 = arith.constant 0 : index
    %63 = vector.load %arg11[%c0_176, %c4_177, %c1_178, %c0_179] : memref<2x12x12x8xf32, #tpu.memory_space<vmem>>, vector<2x8x8x8xf32>
    %c0_180 = arith.constant 0 : index
    %c0_181 = arith.constant 0 : index
    %c0_182 = arith.constant 0 : index
    %c168 = arith.constant 168 : index
    %64 = vector.load %arg12[%c0_180, %c0_181, %c0_182, %c168] : memref<2x8x8x200xf32, #tpu.memory_space<vmem>>, vector<2x8x8x8xf32>
    tpu.vector_store %arg12[%c0_180, %c0_181, %c0_182, %c168], %63 {strides = array<i32>} : memref<2x8x8x200xf32, #tpu.memory_space<vmem>>, vector<2x8x8x8xf32>,
    %c0_183 = arith.constant 0 : index
    %c4_184 = arith.constant 4 : index
    %c2_185 = arith.constant 2 : index
    %c0_186 = arith.constant 0 : index
    %65 = vector.load %arg11[%c0_183, %c4_184, %c2_185, %c0_186] : memref<2x12x12x8xf32, #tpu.memory_space<vmem>>, vector<2x8x8x8xf32>
    %c0_187 = arith.constant 0 : index
    %c0_188 = arith.constant 0 : index
    %c0_189 = arith.constant 0 : index
    %c176 = arith.constant 176 : index
    %66 = vector.load %arg12[%c0_187, %c0_188, %c0_189, %c176] : memref<2x8x8x200xf32, #tpu.memory_space<vmem>>, vector<2x8x8x8xf32>
    tpu.vector_store %arg12[%c0_187, %c0_188, %c0_189, %c176], %65 {strides = array<i32>} : memref<2x8x8x200xf32, #tpu.memory_space<vmem>>, vector<2x8x8x8xf32>,
    %c0_190 = arith.constant 0 : index
    %c4_191 = arith.constant 4 : index
    %c3_192 = arith.constant 3 : index
    %c0_193 = arith.constant 0 : index
    %67 = vector.load %arg11[%c0_190, %c4_191, %c3_192, %c0_193] : memref<2x12x12x8xf32, #tpu.memory_space<vmem>>, vector<2x8x8x8xf32>
    %c0_194 = arith.constant 0 : index
    %c0_195 = arith.constant 0 : index
    %c0_196 = arith.constant 0 : index
    %c184 = arith.constant 184 : index
    %68 = vector.load %arg12[%c0_194, %c0_195, %c0_196, %c184] : memref<2x8x8x200xf32, #tpu.memory_space<vmem>>, vector<2x8x8x8xf32>
    tpu.vector_store %arg12[%c0_194, %c0_195, %c0_196, %c184], %67 {strides = array<i32>} : memref<2x8x8x200xf32, #tpu.memory_space<vmem>>, vector<2x8x8x8xf32>,
    %c0_197 = arith.constant 0 : index
    %c4_198 = arith.constant 4 : index
    %c4_199 = arith.constant 4 : index
    %c0_200 = arith.constant 0 : index
    %69 = vector.load %arg11[%c0_197, %c4_198, %c4_199, %c0_200] : memref<2x12x12x8xf32, #tpu.memory_space<vmem>>, vector<2x8x8x8xf32>
    %c0_201 = arith.constant 0 : index
    %c0_202 = arith.constant 0 : index
    %c0_203 = arith.constant 0 : index
    %c192 = arith.constant 192 : index
    %70 = vector.load %arg12[%c0_201, %c0_202, %c0_203, %c192] : memref<2x8x8x200xf32, #tpu.memory_space<vmem>>, vector<2x8x8x8xf32>
    tpu.vector_store %arg12[%c0_201, %c0_202, %c0_203, %c192], %69 {strides = array<i32>} : memref<2x8x8x200xf32, #tpu.memory_space<vmem>>, vector<2x8x8x8xf32>,
    %c0_204 = arith.constant 0 : index
    %c0_205 = arith.constant 0 : index
    %c0_206 = arith.constant 0 : index
    %c0_207 = arith.constant 0 : index
    %71 = vector.load %arg12[%c0_204, %c0_205, %c0_206, %c0_207] : memref<2x8x8x200xf32, #tpu.memory_space<vmem>>, vector<2x8x8x200xf32>
    %72 = vector.shape_cast %71 : vector<2x8x8x200xf32> to vector<128x200xf32>
    %73 = arith.truncf %72 : vector<128x200xf32> to vector<128x200xbf16>
    %c0_208 = arith.constant 0 : index
    %c0_209 = arith.constant 0 : index
    %74 = vector.load %arg4[%c0_208, %c0_209] : memref<200x128xbf16, #tpu.memory_space<vmem>>, vector<200x128xbf16>
    %cst_210 = arith.constant dense<0.000000e+00> : vector<128x128xf32>
    %75 = tpu.matmul %73, %74, %cst_210 {dimension_numbers = #tpu.dot_dimension_numbers<[1], [0], [0], [1], [0, 0, 1, 1], [], []>} : vector<128x200xbf16>, vector<200x128xbf16>, vector<128x128xf32> -> vector<128x128xf32>
    %c0_211 = arith.constant 0 : index
    %c0_212 = arith.constant 0 : index
    %76 = vector.load %arg5[%c0_211, %c0_212] : memref<1x128xf32, #tpu.memory_space<vmem>>, vector<1x128xf32>
    %77 = vector.broadcast %76 : vector<1x128xf32> to vector<128x128xf32>
    %78 = arith.addf %75, %77 : vector<128x128xf32>
    %cst_213 = arith.constant 0.000000e+00 : f32
    %79 = vector.broadcast %cst_213 : f32 to vector<128x128xf32>
    %80 = arith.maximumf %78, %79 : vector<128x128xf32>
    %81 = arith.truncf %80 : vector<128x128xf32> to vector<128x128xbf16>
    %c0_214 = arith.constant 0 : index
    %c0_215 = arith.constant 0 : index
    %82 = vector.load %arg6[%c0_214, %c0_215] : memref<128x128xbf16, #tpu.memory_space<vmem>>, vector<128x128xbf16>
    %cst_216 = arith.constant dense<0.000000e+00> : vector<128x128xf32>
    %83 = tpu.matmul %81, %82, %cst_216 {dimension_numbers = #tpu.dot_dimension_numbers<[1], [0], [0], [1], [0, 0, 1, 1], [], []>} : vector<128x128xbf16>, vector<128x128xbf16>, vector<128x128xf32> -> vector<128x128xf32>
    %c0_217 = arith.constant 0 : index
    %c0_218 = arith.constant 0 : index
    %84 = vector.load %arg7[%c0_217, %c0_218] : memref<1x128xf32, #tpu.memory_space<vmem>>, vector<1x128xf32>
    %85 = vector.broadcast %84 : vector<1x128xf32> to vector<128x128xf32>
    %86 = arith.addf %83, %85 : vector<128x128xf32>
    %cst_219 = arith.constant 0.000000e+00 : f32
    %87 = vector.broadcast %cst_219 : f32 to vector<128x128xf32>
    %88 = arith.maximumf %86, %87 : vector<128x128xf32>
    %89 = vector.shape_cast %88 : vector<128x128xf32> to vector<2x64x128xf32>
    %cst_220 = arith.constant dense<0.000000e+00> : vector<2x128xf32>
    %90 = vector.multi_reduction <add>, %89, %cst_220 [1] : vector<2x64x128xf32> to vector<2x128xf32>
    %cst_221 = arith.constant 1.562500e-02 : f32
    %91 = vector.broadcast %cst_221 : f32 to vector<2x128xf32>
    %92 = arith.mulf %90, %91 : vector<2x128xf32>
    %93 = arith.truncf %92 : vector<2x128xf32> to vector<2x128xbf16>
    %c0_222 = arith.constant 0 : index
    %c0_223 = arith.constant 0 : index
    %94 = vector.load %arg8[%c0_222, %c0_223] : memref<128x128xbf16, #tpu.memory_space<vmem>>, vector<128x128xbf16>
    %cst_224 = arith.constant dense<0.000000e+00> : vector<2x128xf32>
    %95 = tpu.matmul %93, %94, %cst_224 {dimension_numbers = #tpu.dot_dimension_numbers<[1], [0], [0], [1], [0, 0, 1, 1], [], []>} : vector<2x128xbf16>, vector<128x128xbf16>, vector<2x128xf32> -> vector<2x128xf32>
    %c0_225 = arith.constant 0 : index
    %c0_226 = arith.constant 0 : index
    %96 = vector.load %arg9[%c0_225, %c0_226] : memref<1x128xf32, #tpu.memory_space<vmem>>, vector<1x128xf32>
    %97 = vector.broadcast %96 : vector<1x128xf32> to vector<2x128xf32>
    %98 = arith.addf %95, %97 : vector<2x128xf32>
    %c0_227 = arith.constant 0 : index
    %c0_228 = arith.constant 0 : index
    %c0_229 = arith.constant 0 : index
    %99 = vector.load %arg10[%c0_227, %c0_228, %c0_229] : memref<1x2x128xf32, #tpu.memory_space<vmem>>, vector<1x2x128xf32>
    %100 = vector.shape_cast %99 : vector<1x2x128xf32> to vector<2x128xf32>
    %101 = vector.shape_cast %98 : vector<2x128xf32> to vector<1x2x128xf32>
    tpu.vector_store %arg10[%c0_227, %c0_228, %c0_229], %101 {strides = array<i32>} : memref<1x2x128xf32, #tpu.memory_space<vmem>>, vector<1x2x128xf32>,
    return
  }
  func.func @transform_0(%arg0: i32) -> (i32, i32, i32, i32) {
    %c0_i32 = arith.constant 0 : i32
    %c0_i32_0 = arith.constant 0 : i32
    %c0_i32_1 = arith.constant 0 : i32
    %c0_i32_2 = arith.constant 0 : i32
    return %arg0, %c0_i32, %c0_i32_0, %c0_i32_1 : i32, i32, i32, i32
  }
  func.func @transform_1(%arg0: i32) -> (i32, i32) {
    %c0_i32 = arith.constant 0 : i32
    %c0_i32_0 = arith.constant 0 : i32
    %c0_i32_1 = arith.constant 0 : i32
    return %c0_i32, %c0_i32_0 : i32, i32
  }
  func.func @transform_2(%arg0: i32) -> (i32, i32) {
    %c0_i32 = arith.constant 0 : i32
    %c0_i32_0 = arith.constant 0 : i32
    %c0_i32_1 = arith.constant 0 : i32
    return %c0_i32, %c0_i32_0 : i32, i32
  }
  func.func @transform_3(%arg0: i32) -> (i32, i32) {
    %c0_i32 = arith.constant 0 : i32
    %c0_i32_0 = arith.constant 0 : i32
    %c0_i32_1 = arith.constant 0 : i32
    return %c0_i32, %c0_i32_0 : i32, i32
  }
  func.func @transform_4(%arg0: i32) -> (i32, i32) {
    %c0_i32 = arith.constant 0 : i32
    %c0_i32_0 = arith.constant 0 : i32
    %c0_i32_1 = arith.constant 0 : i32
    return %c0_i32, %c0_i32_0 : i32, i32
  }
  func.func @transform_5(%arg0: i32) -> (i32, i32) {
    %c0_i32 = arith.constant 0 : i32
    %c0_i32_0 = arith.constant 0 : i32
    %c0_i32_1 = arith.constant 0 : i32
    return %c0_i32, %c0_i32_0 : i32, i32
  }
  func.func @transform_6(%arg0: i32) -> (i32, i32) {
    %c0_i32 = arith.constant 0 : i32
    %c0_i32_0 = arith.constant 0 : i32
    %c0_i32_1 = arith.constant 0 : i32
    return %c0_i32, %c0_i32_0 : i32, i32
  }
  func.func @transform_7(%arg0: i32) -> (i32, i32) {
    %c0_i32 = arith.constant 0 : i32
    %c0_i32_0 = arith.constant 0 : i32
    %c0_i32_1 = arith.constant 0 : i32
    return %c0_i32, %c0_i32_0 : i32, i32
  }
  func.func @transform_8(%arg0: i32) -> (i32, i32) {
    %c0_i32 = arith.constant 0 : i32
    %c0_i32_0 = arith.constant 0 : i32
    %c0_i32_1 = arith.constant 0 : i32
    return %c0_i32, %c0_i32_0 : i32, i32
  }
  func.func @transform_9(%arg0: i32) -> (i32, i32, i32) {
    %c0_i32 = arith.constant 0 : i32
    %c0_i32_0 = arith.constant 0 : i32
    %c0_i32_1 = arith.constant 0 : i32
    return %arg0, %c0_i32, %c0_i32_0 : i32, i32, i32
  }
}

</mosaic_0001>

<bundles_post_ra>
// kernel: vgg_forward.1
= control target key start
LH: loop header
LB: loop body
LE: loop exit
PB: predicated region body
PF: predicated region fallthrough
CT: control target
= control target key end

     0   :  { %s6766_s0 = inlined_call_operand.vmem [shape: bf16[4,4,64,32], index: 0, kind: input, shape index: {}]   ;;  %s6767_s1 = inlined_call_operand.vmem [shape: bf16[32,8], index: 1, kind: input, shape index: {}]   ;;  %s6768_s2 = inlined_call_operand.vmem [shape: f32[1,8], index: 2, kind: input, shape index: {}]   ;;  %s6769_s3 = inlined_call_operand.vmem [shape: bf16[200,128], index: 3, kind: input, shape index: {}]   ;;  %s6770_s4 = inlined_call_operand.vmem [shape: f32[1,128], index: 4, kind: input, shape index: {}]   ;;  %s6771_s5 = inlined_call_operand.vmem [shape: bf16[128,128], index: 5, kind: input, shape index: {}]   ;;  %s6772_s6 = inlined_call_operand.vmem [shape: f32[1,128], index: 6, kind: input, shape index: {}]   ;;  %s6773_s7 = inlined_call_operand.vmem [shape: bf16[128,128], index: 7, kind: input, shape index: {}]   ;;  %s6774_s8 = inlined_call_operand.vmem [shape: f32[1,128], index: 8, kind: input, shape index: {}]   ;;  %s6775_s9 = inlined_call_operand.hbm [shape: f32[2,2,128], index: 9, kind: output, shape index: {}]  }
   0x1   :  { %6810 = sst [smem:[#allocation9_spill]] %s6766_s0 }
   0x2   :  { %6811 = sst [smem:[#allocation10_spill]] %s6767_s1 }
   0x3   :  { %6812 = sst [smem:[#allocation11_spill]] %s6769_s3 }
   0x4   :  { %14 = vsyncpa [#allocation5], 0 }
   0x5   :  { %16 = vsyncpa [#allocation5 + $0x1], 0  ;;  %s4769_s30 = smov 0   ;;  %s4771_s10 = smov 0  }
   0x6   :  { %s4773_s11 = smov 0   ;;  %s4775_s12 = smov 0  }
   0x7 LB: > { %6813 = sst [smem:[#allocation7_spill]] %s4694_s11  ;;  %s4790_s13 = sadd.s32 4294967295, %s4698_s12   ;;  %s4698_s12 = sphi %s4775_s12, %s6856_s12   ;;  %s4694_s11 = sphi %s4773_s11, %s6853_s11   ;;  %s4690_s10 = sphi %s4771_s10, %s6855_s10   ;;  %s4686_s30 = sphi %s4769_s30, %s6854_s30  }
   0x8   : > { %s4217_s14 = sadd.s32 4294967294, %s4698_s12   ;;  %s4794_s15 = sadd.s32 1, %s4698_s12  }
   0x9   : > { %s223_s16 = sadd.s32 1, %s4694_s11  ;;  %s220_s17 = ssub.s32 %s4698_s12, %s4794_s15 }
   0xa   : > { %p233_p0 = scmp.ne.s32.totalorder %s4694_s11, %s4690_s10  ;;  %p221_p1 = scmp.eq.s32.totalorder %s220_s17, 0 }
   0xb   : > { %p234_p2 = scmp.eq.s32.totalorder %s4790_s13, 1  ;;  %p239_p3 = scmp.ne.s32.totalorder %s4690_s10, %s4686_s30 }
   0xc   : > { %p240_p4 = scmp.eq.s32.totalorder %s4217_s14, 1  ;;  %p4220_p7 = scmp.ge.s32.totalorder %s4698_s12, 1 }
   0xd   : > { %s4805_s18 = scalar_select %p221_p1, %s4694_s11, %s223_s16  }
   0xe   : > { %p4807_p5 = por %p234_p2, %p233_p0  ;;  %p4811_p6 = por %p240_p4, %p239_p3 }
   0xf   : > { %6814 = sst [smem:[#allocation8_spill]] %s4805_s18  ;;  %p292_p8 = scmp.lt.s32.totalorder %s4698_s12, 3 }
  0x11   : > { %p293_p9 = pnand %p4220_p7, %p292_p8 }
  0x12   : > { %s6817_s1 = sld [smem:[#allocation10_spill]] (!%p293_p9)  ;;  %s4222_s23 = sshll.u32 (!%p293_p9), %s4790_s13, 1 }
  0x13   : > { %296 = sbr.rel (%p293_p9) target bundleno = 1773 (0x6ed), region = 56  ;;  %p330_p10 = scmp.lt.s32.totalorder (!%p293_p9), %s4222_s23, 3 }
  0x14   : > { %s6818_s0 = sld [smem:[#allocation9_spill]] (!%p293_p9)  ;;  %s6804_s14 = smov (!%p293_p9), 8  }
  0x15   : > { %s6778_s16 = smov (!%p293_p9), 24   ;;  %s6792_s17 = smov (!%p293_p9), 32  }
  0x16   : > { %s6784_s21 = smov (!%p293_p9), 40   ;;  %s6802_s22 = smov (!%p293_p9), 16  }
  0x17   : > { %s6790_s24 = smov (!%p293_p9), 56   ;;  %s6786_s25 = smov (!%p293_p9), 64  }
  0x18   : > { %v4573_v0 = vld [vmem:[%s6817_s1 + $0x8] sm:$0xff]   ;;  %v4574_v1 = vld [vmem:[%s6817_s1] sm:$0xff]   ;;  %s6858_s23 = smov (!%p330_p10, %s4222_s23), 3  ;;  %vm584_vm0 = vcmask 261120   ;;  %vm6808_vm1 = vcmask 64512   ;;  %vm1148_vm2 = vcmask 60416  }
  0x19   : > { %4396 = vmatprep.subr.bf16.mxu0 %v4573_v0  ;;  %s4336_s26 = sshll.u32 %s6858_s23, 7  ;;  %v4700_v18 = vmov 0.0   ;;  %s6798_s23 = smov 48   ;;  %vm1166_vm3 = vcmask 58368   ;;  %vm1327_vm4 = vcmask 130112   ;;  %vm1424_vm5 = vcmask 195712  }
  0x1a   : > { %4397 = vmatpush3.bf16.msra.mxu0 %v4573_v0  ;;  %s4827_s29 = scalar_lea.vmem %s6818_s0, %s4336_s26  ;;  %1147 = vst.msk [vmem:[#allocation2] sm:$0xff] %vm6808_vm1, %v4700_v18  ;;  %1150 = vst.msk [vmem:[#allocation2 + $0x10] sm:$0xff] %vm6808_vm1, %v4700_v18  ;;  %s6782_s26 = smov 72   ;;  %v5008_v61 = vld [vmem:[%s6768_s2] ss:$0 sm:$0xff]  ;;  %vm1521_vm6 = vcmask 261312  }
  0x1b   : > { %4398 = vmatprep.subr.bf16.mxu0 %v4574_v1  ;;  %v4575_v2 = vld [vmem:[%s4827_s29] sm:$0xff]   ;;  %v4576_v3 = vld [vmem:[%s4827_s29 + $0x8] sm:$0xff]   ;;  %v4577_v4 = vld [vmem:[%s4827_s29 + $0x10] sm:$0xff]   ;;  %1149 = vst.msk [vmem:[#allocation2 + $0x8] sm:$0xf] %vm1148_vm2, %v4700_v18  ;;  %vm6807_vm7 = vcmask 326912  }
  0x1c   : > { %4400 = vmatprep.mubr.msk.bf16.mxu0 %vm584_vm0, %v4575_v2  ;;  %v4578_v5 = vld [vmem:[%s4827_s29 + $0x18] sm:$0xff]   ;;  %v4579_v6 = vld [vmem:[%s4827_s29 + $0x20] sm:$0xff]   ;;  %v4580_v7 = vld [vmem:[%s4827_s29 + $0x28] sm:$0xff]   ;;  %1151 = vst.msk [vmem:[#allocation2 + $0x18] sm:$0xf] %vm1148_vm2, %v4700_v18  ;;  %vm1716_vm8 = vcmask 392512  }
  0x1d   : > { %v4581_v8 = vld [vmem:[%s4827_s29 + $0x30] sm:$0xff]   ;;  %v4582_v9 = vld [vmem:[%s4827_s29 + $0x38] sm:$0xff]   ;;  %v4583_v10 = vld [vmem:[%s4827_s29 + $0x40] sm:$0xff]   ;;  %1152 = vst.msk [vmem:[#allocation2 + $0xc0] sm:$0xff] %vm6808_vm1, %v4700_v18  ;;  %vm1813_vm9 = vcmask 458112   ;;  %vm1910_vm10 = vcmask 523712  }
  0x1e   : > { %4399 = vmatpush3.bf16.msra.mxu0 %v4574_v1  ;;  %v4584_v11 = vld [vmem:[%s4827_s29 + $0x48] sm:$0xff]   ;;  %v4585_v12 = vld [vmem:[%s4827_s29 + $0x50] sm:$0xff]   ;;  %v4586_v13 = vld [vmem:[%s4827_s29 + $0x58] sm:$0xff]   ;;  %1153 = vst.msk [vmem:[#allocation2 + $0xc8] sm:$0xf] %vm1148_vm2, %v4700_v18  ;;  %vm2007_vm11 = vcmask 589312  }
  0x1f   : > { %v4587_v14 = vld [vmem:[%s4827_s29 + $0x60] sm:$0xff]   ;;  %v4588_v15 = vld [vmem:[%s4827_s29 + $0x68] sm:$0xff]   ;;  %v4589_v16 = vld [vmem:[%s4827_s29 + $0x70] sm:$0xff]   ;;  %1154 = vst.msk [vmem:[#allocation2 + $0xd0] sm:$0xff] %vm6808_vm1, %v4700_v18  ;;  %4496 = vmatprep.subr.bf16.mxu0 %v4700_v18  ;;  %vm6809_vm12 = vcmask 654912   ;;  %s6788_s27 = smov 80  }
  0x20   : > { %v4590_v17 = vld [vmem:[%s4827_s29 + $0x78] sm:$0xff]   ;;  %1155 = vst.msk [vmem:[#allocation2 + $0xd8] sm:$0xf] %vm1148_vm2, %v4700_v18  ;;  %1158 = vst.msk [vmem:[#allocation2 + $0xa8] sm:$0xf] %vm1148_vm2, %v4700_v18  ;;  %v4591_v28 = vld [vmem:[%s4827_s29 + $0x80] sm:$0xff]  }
  0x21   : > { %4401 = vmatmul.mubr.msk.bf16.vlgmr.msra.gmra.mxu0 %vm584_vm0, %v4576_v3  ;;  %1157 = vst.msk [vmem:[#allocation2 + $0xa0] sm:$0xff] %vm6808_vm1, %v4700_v18  ;;  %1159 = vst.msk [vmem:[#allocation2 + $0xb0] sm:$0xff] %vm6808_vm1, %v4700_v18  ;;  %v1636_v23 = vld [vmem:[#allocation2 + $0x10] sm:$0xff]  ;;  %v4592_v29 = vld [vmem:[%s4827_s29 + $0x88] sm:$0xff]   ;;  %s6780_s28 = smov 88   ;;  %s6821_s3 = sld [smem:[#allocation11_spill]] }
  0x22   : > { %4404 = vmatprep.mubr.msk.bf16.mxu0 %vm584_vm0, %v4577_v4  ;;  %1160 = vst.msk [vmem:[#allocation2 + $0xb8] sm:$0xf] %vm1148_vm2, %v4700_v18  ;;  %1162 = vst.msk [vmem:[#allocation2 + $0x168] sm:$0xf] %vm1148_vm2, %v4700_v18  ;;  %v1247_v19 = vld [vmem:[#allocation2 + $0x1] sm:$0xff]  ;;  %v4593_v30 = vld [vmem:[%s4827_s29 + $0x90] sm:$0xff]  }
  0x23   : > { %1161 = vst.msk [vmem:[#allocation2 + $0x160] sm:$0xff] %vm6808_vm1, %v4700_v18  ;;  %1163 = vst.msk [vmem:[#allocation2 + $0x170] sm:$0xff] %vm6808_vm1, %v4700_v18  ;;  %1279 = vrot.lane.b32.xlu0 %v1247_v19, %s6804_s14  ;;  %v1248_v20 = vld [vmem:[#allocation2 + $0x11] sm:$0xff]  ;;  %v1441_v21 = vld [vmem:[#allocation2 + $0x3] sm:$0xff]  ;;  %vm3685_vm13 = vcmask 1043456   ;;  %s6831_s0 = smov 104  }
  0x24   : > { %1164 = vst.msk [vmem:[#allocation2 + $0x178] sm:$0xf] %vm1148_vm2, %v4700_v18  ;;  %v1538_v22 = vld [vmem:[#allocation2 + $0x4] sm:$0xff]  ;;  %v1345_v25 = vld [vmem:[#allocation2 + $0x12] sm:$0xff]  ;;  %s6832_s1 = smov 112   ;;  %s6834_s11 = smov 8  }
  0x25   : > { %1232 = vst.msk [vmem:[#allocation3 + $0x10] sm:$0xff] %vm6808_vm1, %v1636_v23  ;;  %v1344_v24 = vld [vmem:[#allocation2 + $0x2] sm:$0xff]  ;;  %v1442_v26 = vld [vmem:[#allocation2 + $0x13] sm:$0xff]  ;;  %vm2201_vm14 = vcmask 720512   ;;  %vm2298_vm15 = vcmask 786112   ;;  %vm2492_vm2 = vcmask 917312  }
  0x26   : > { %1376 = vrot.lane.b32.xlu1 %v1344_v24, %s6802_s22  ;;  %1169 = vst.msk [vmem:[#allocation2 + $0x40] sm:$0x3] %vm1166_vm3, %v4700_v18  ;;  %1167 = vst.msk [vmem:[#allocation2 + $0x20] sm:$0x3] %vm1166_vm3, %v4700_v18  ;;  %v1539_v27 = vld [vmem:[#allocation2 + $0x14] sm:$0xff]  ;;  %v4595_v32 = vld [vmem:[%s4827_s29 + $0xa0] sm:$0xff]  }
  0x27   : > { %1281 = vrot.lane.b32.xlu0 %v1248_v20, %s6804_s14  ;;  %1168 = vst.msk [vmem:[#allocation2 + $0x30] sm:$0x3] %vm1166_vm3, %v4700_v18  ;;  %1170 = vst.msk [vmem:[#allocation2 + $0x50] sm:$0x3] %vm1166_vm3, %v4700_v18  ;;  %v4594_v31 = vld [vmem:[%s4827_s29 + $0x98] sm:$0xff]   ;;  %v4596_v33 = vld [vmem:[%s4827_s29 + $0xa8] sm:$0xff]  }
  0x28   : > { %1171 = vst.msk [vmem:[#allocation2 + $0x60] sm:$0x3] %vm1166_vm3, %v4700_v18  ;;  %1172 = vst.msk [vmem:[#allocation2 + $0x70] sm:$0x3] %vm1166_vm3, %v4700_v18  ;;  %v4597_v34 = vld [vmem:[%s4827_s29 + $0xb0] sm:$0xff]   ;;  %v4598_v35 = vld [vmem:[%s4827_s29 + $0xb8] sm:$0xff]  }
  0x29   : > { %4405 = vmatmul.mubr.msk.bf16.gmra.mxu0 %vm584_vm0, %v4578_v5  ;;  %1173 = vst.msk [vmem:[#allocation2 + $0x80] sm:$0x3] %vm1166_vm3, %v4700_v18  ;;  %1174 = vst.msk [vmem:[#allocation2 + $0x90] sm:$0x3] %vm1166_vm3, %v4700_v18  ;;  %v4599_v39 = vld [vmem:[%s4827_s29 + $0xc0] sm:$0xff]   ;;  %v4600_v40 = vld [vmem:[%s4827_s29 + $0xc8] sm:$0xff]  }
  0x2a   : > { %4408 = vmatprep.mubr.msk.bf16.mxu0 %vm584_vm0, %v4579_v6  ;;  %1378 = vrot.lane.b32.xlu1 %v1345_v25, %s6802_s22  ;;  %1175 = vst.msk [vmem:[#allocation2 + $0xe0] sm:$0x3] %vm1166_vm3, %v4700_v18  ;;  %1176 = vst.msk [vmem:[#allocation2 + $0xf0] sm:$0x3] %vm1166_vm3, %v4700_v18  ;;  %v1215_v45 = vld [vmem:[#allocation2] sm:$0xff]  ;;  %v4601_v46 = vld [vmem:[%s4827_s29 + $0xd0] sm:$0xff]  }
  0x2b   : > { %1473 = vrot.lane.b32.xlu0 %v1441_v21, %s6778_s16  ;;  %1177 = vst.msk [vmem:[#allocation2 + $0x100] sm:$0x3] %vm1166_vm3, %v4700_v18  ;;  %1178 = vst.msk [vmem:[#allocation2 + $0x110] sm:$0x3] %vm1166_vm3, %v4700_v18  ;;  %v4602_v47 = vld [vmem:[%s4827_s29 + $0xd8] sm:$0xff]   ;;  %v4603_v54 = vld [vmem:[%s4827_s29 + $0xe0] sm:$0xff]  }
  0x2c   : > { %1179 = vst.msk [vmem:[#allocation2 + $0x120] sm:$0x3] %vm1166_vm3, %v4700_v18  ;;  %1180 = vst.msk [vmem:[#allocation2 + $0x130] sm:$0x3] %vm1166_vm3, %v4700_v18  ;;  %v4604_v55 = vld [vmem:[%s4827_s29 + $0xe8] sm:$0xff]   ;;  %v4605_v63 = vld [vmem:[%s4827_s29 + $0xf0] sm:$0xff]  }
  0x2d   : > { %1181 = vst.msk [vmem:[#allocation2 + $0x140] sm:$0x3] %vm1166_vm3, %v4700_v18  ;;  %1182 = vst.msk [vmem:[#allocation2 + $0x150] sm:$0x3] %vm1166_vm3, %v4700_v18  ;;  %v4606_v0 = vld [vmem:[%s4827_s29 + $0xf8] sm:$0xff]   ;;  %s6776_s29 = smov 120  }
  0x2e   : > { %1475 = vrot.lane.b32.xlu1 %v1442_v26, %s6778_s16  ;;  %1183 = vst.msk [vmem:[#allocation2 + $0x2a] sm:$0x3] %vm1166_vm3, %v4700_v18  ;;  %1184 = vst.msk [vmem:[#allocation2 + $0x3a] sm:$0x3] %vm1166_vm3, %v4700_v18 }
  0x2f   : > { %1570 = vrot.lane.b32.xlu0 %v1538_v22, %s6792_s17  ;;  %1185 = vst.msk [vmem:[#allocation2 + $0x4a] sm:$0x3] %vm1166_vm3, %v4700_v18  ;;  %1186 = vst.msk [vmem:[#allocation2 + $0x5a] sm:$0x3] %vm1166_vm3, %v4700_v18 }
  0x30   : > { %1187 = vst.msk [vmem:[#allocation2 + $0x6a] sm:$0x3] %vm1166_vm3, %v4700_v18  ;;  %1188 = vst.msk [vmem:[#allocation2 + $0x7a] sm:$0x3] %vm1166_vm3, %v4700_v18 }
  0x31   : > { %4409 = vmatmul.mubr.msk.bf16.gmra.mxu0 %vm584_vm0, %v4580_v7  ;;  %1189 = vst.msk [vmem:[#allocation2 + $0x8a] sm:$0x3] %vm1166_vm3, %v4700_v18  ;;  %1190 = vst.msk [vmem:[#allocation2 + $0x9a] sm:$0x3] %vm1166_vm3, %v4700_v18 }
  0x32   : > { %4412 = vmatprep.mubr.msk.bf16.mxu0 %vm584_vm0, %v4581_v8  ;;  %1191 = vst.msk [vmem:[#allocation2 + $0xea] sm:$0x3] %vm1166_vm3, %v4700_v18  ;;  %1192 = vst.msk [vmem:[#allocation2 + $0xfa] sm:$0x3] %vm1166_vm3, %v4700_v18  ;;  %1572 = vrot.lane.b32.xlu1 %v1539_v27, %s6792_s17 }
  0x33   : > { %1668 = vrot.lane.b32.xlu0 %v1636_v23, %s6784_s21  ;;  %1193 = vst.msk [vmem:[#allocation2 + $0x10a] sm:$0x3] %vm1166_vm3, %v4700_v18  ;;  %1194 = vst.msk [vmem:[#allocation2 + $0x11a] sm:$0x3] %vm1166_vm3, %v4700_v18 }
  0x34   : > { %1195 = vst.msk [vmem:[#allocation2 + $0x12a] sm:$0x3] %vm1166_vm3, %v4700_v18  ;;  %1196 = vst.msk [vmem:[#allocation2 + $0x13a] sm:$0x3] %vm1166_vm3, %v4700_v18 }
  0x35   : > { %1197 = vst.msk [vmem:[#allocation2 + $0x14a] sm:$0x3] %vm1166_vm3, %v4700_v18  ;;  %1198 = vst.msk [vmem:[#allocation2 + $0x15a] sm:$0x3] %vm1166_vm3, %v4700_v18  ;;  %vm2589_vm3 = vcmask 982912  }
  0x36   : > { %1231 = vst.msk [vmem:[#allocation3] sm:$0xff] %vm6808_vm1, %v1215_v45 }
  0x37   : > { %1765 = vrot.lane.b32.xlu0 %v1248_v20, %s6798_s23 }
  0x39   : > { %4413 = vmatmul.mubr.msk.bf16.gmra.mxu0 %vm584_vm0, %v4582_v9 }
  0x3a   : > { %4416 = vmatprep.mubr.msk.bf16.mxu0 %vm584_vm0, %v4583_v10 }
  0x3b   : > { %1862 = vrot.lane.b32.xlu0 %v1345_v25, %s6790_s24 }
  0x3f   : > { %1959 = vrot.lane.b32.xlu0 %v1442_v26, %s6786_s25 }
  0x41   : > { %4417 = vmatmul.mubr.msk.bf16.gmra.mxu0 %vm584_vm0, %v4584_v11 }
  0x42   : > { %4420 = vmatprep.mubr.msk.bf16.mxu0 %vm584_vm0, %v4585_v12 }
  0x43   : > { %2056 = vrot.lane.b32.xlu0 %v1539_v27, %s6782_s26 }
  0x49   : > { %4421 = vmatmul.mubr.msk.bf16.gmra.mxu0 %vm584_vm0, %v4586_v13 }
  0x4a   : > { %4424 = vmatprep.mubr.msk.bf16.mxu0 %vm584_vm0, %v4587_v14 }
  0x51   : > { %4425 = vmatmul.mubr.msk.bf16.gmra.mxu0 %vm584_vm0, %v4588_v15 }
  0x52   : > { %4428 = vmatprep.mubr.msk.bf16.mxu0 %vm584_vm0, %v4589_v16 }
  0x59   : > { %4429 = vmatmul.mubr.msk.bf16.gmra.mxu0 %vm584_vm0, %v4590_v17 }
  0x5a   : > { %4432 = vmatprep.mubr.msk.bf16.mxu0 %vm584_vm0, %v4591_v28 }
  0x61   : > { %4433 = vmatmul.mubr.msk.bf16.gmra.mxu0 %vm584_vm0, %v4592_v29 }
  0x62   : > { %4436 = vmatprep.mubr.msk.bf16.mxu0 %vm584_vm0, %v4593_v30 }
  0x69   : > { %4437 = vmatmul.mubr.msk.bf16.gmra.mxu0 %vm584_vm0, %v4594_v31 }
  0x6a   : > { %4440 = vmatprep.mubr.msk.bf16.mxu0 %vm584_vm0, %v4595_v32 }
  0x71   : > { %4441 = vmatmul.mubr.msk.bf16.gmra.mxu0 %vm584_vm0, %v4596_v33 }
  0x72   : > { %4444 = vmatprep.mubr.msk.bf16.mxu0 %vm584_vm0, %v4597_v34 }
  0x79   : > { %4445 = vmatmul.mubr.msk.bf16.gmra.mxu0 %vm584_vm0, %v4598_v35 }
  0x7a   : > { %4448 = vmatprep.mubr.msk.bf16.mxu0 %vm584_vm0, %v4599_v39 }
  0x81   : > { %4449 = vmatmul.mubr.msk.bf16.gmra.mxu0 %vm584_vm0, %v4600_v40 }
  0x82   : > { %4452 = vmatprep.mubr.msk.bf16.mxu0 %vm584_vm0, %v4601_v46 }
  0x89   : > { %4453 = vmatmul.mubr.msk.bf16.gmra.mxu0 %vm584_vm0, %v4602_v47 }
  0x8a   : > { %4456 = vmatprep.mubr.msk.bf16.mxu0 %vm584_vm0, %v4603_v54 }
  0x91   : > { %4457 = vmatmul.mubr.msk.bf16.gmra.mxu0 %vm584_vm0, %v4604_v55 }
  0x92   : > { %4460 = vmatprep.mubr.msk.bf16.mxu0 %vm584_vm0, %v4605_v63 }
  0x95   : > { %v1280_v49 = vpop.permute.xlu0 %1279 }
  0x96   : > { %1328 = vst.msk [vmem:[#allocation3] sm:$0xff] %vm1327_vm4, %v1280_v49 }
  0x98   : > { %v1377_v8 = vpop.permute.xlu1 %1376 }
  0x99   : > { %v1282_v52 = vpop.permute.xlu0 %1281  ;;  %4461 = vmatmul.mubr.msk.bf16.gmra.mxu0 %vm584_vm0, %v4606_v0  ;;  %1425 = vst.msk [vmem:[#allocation3] sm:$0xff] %vm1424_vm5, %v1377_v8  ;;  %vm2395_vm0 = vcmask 851712  }
  0x9a   : > { %1329 = vst.msk [vmem:[#allocation3 + $0x10] sm:$0xff] %vm1327_vm4, %v1282_v52 }
  0x9c   : > { %v1379_v24 = vpop.permute.xlu1 %1378 }
  0x9d   : > { %v1474_v57 = vpop.permute.xlu0 %1473  ;;  %1426 = vst.msk [vmem:[#allocation3 + $0x10] sm:$0xff] %vm1424_vm5, %v1379_v24 }
  0x9e   : > { %1522 = vst.msk [vmem:[#allocation3] sm:$0xff] %vm1521_vm6, %v1474_v57 }
  0xa1   : > { %v1571_v60 = vpop.permute.xlu0 %1570 }
  0xa2   : > { %1619 = vst.msk [vmem:[#allocation3] sm:$0xff] %vm6807_vm7, %v1571_v60 }
  0xa5   : > { %v1669_v2 = vpop.permute.xlu0 %1668 }
  0xa6   : > { %1717 = vst.msk [vmem:[#allocation3] sm:$0xff] %vm1716_vm8, %v1669_v2 }
  0xa9   : > { %v1766_v12 = vpop.permute.xlu0 %1765 }
  0xaa   : > { %1814 = vst.msk [vmem:[#allocation3] sm:$0xff] %vm1813_vm9, %v1766_v12 }
  0xad   : > { %v1863_v28 = vpop.permute.xlu0 %1862 }
  0xae   : > { %1911 = vst.msk [vmem:[#allocation3] sm:$0xff] %vm1910_vm10, %v1863_v28 }
  0xb1   : > { %v1960_v47 = vpop.permute.xlu0 %1959 }
  0xb2   : > { %2008 = vst.msk [vmem:[#allocation3] sm:$0xff] %vm2007_vm11, %v1960_v47 }
  0xe1   : > { %v4402_v36 = vpop.f32.mrf.mxu0 }
  0xe2   : > { %v724_v3 = vadd.f32 %v4402_v36, %v5008_v61 }
  0xe3   : > { %v715_v37 = vpop.f32.mrf.mxu0 }
  0xe4   : > { %v716_v4 = vadd.f32 %v5008_v61, %v715_v37  ;;  %v972_v9 = vmax.f32 %v724_v3, 0.0 }
  0xe5   : > { %v4403_v38 = vpop.f32.mrf.mxu0 }
  0xe6   : > { %v727_v6 = vadd.f32 %v4403_v38, %v5008_v61  ;;  %v970_v10 = vmax.f32 %v716_v4, 0.0  ;;  %v5034_v25 = vsel %vm6808_vm1, %v972_v9, -inf }
  0xe7   : > { %v718_v41 = vpop.f32.mrf.mxu0 }
  0xe8   : > { %v719_v11 = vadd.f32 %v5008_v61, %v718_v41  ;;  %v973_v20 = vmax.f32 %v727_v6, 0.0  ;;  %v5040_v29 = vsel %vm6808_vm1, %v970_v10, -inf }
  0xe9   : > { %v4406_v42 = vpop.f32.mrf.mxu0 }
  0xea   : > { %v740_v13 = vadd.f32 %v4406_v42, %v5008_v61  ;;  %v971_v26 = vmax.f32 %v719_v11, 0.0  ;;  %v5045_v37 = vsel %vm6808_vm1, %v973_v20, -inf  ;;  %v1476_v42 = vpop.permute.xlu1 %1475 }
  0xeb   : > { %v731_v43 = vpop.f32.mrf.mxu0  ;;  %1523 = vst.msk [vmem:[#allocation3 + $0x10] sm:$0xff] %vm1521_vm6, %v1476_v42 }
  0xec   : > { %v732_v14 = vadd.f32 %v5008_v61, %v731_v43  ;;  %v976_v30 = vmax.f32 %v740_v13, 0.0  ;;  %v5049_v43 = vsel %vm6808_vm1, %v971_v26, -inf }
  0xed   : > { %v4407_v44 = vpop.f32.mrf.mxu0 }
  0xee   : > { %v743_v15 = vadd.f32 %v4407_v44, %v5008_v61  ;;  %v974_v31 = vmax.f32 %v732_v14, 0.0  ;;  %v5058_v49 = vsel %vm6808_vm1, %v976_v30, -inf  ;;  %v1573_v63 = vpop.permute.xlu1 %1572 }
  0xef   : > { %v4995_v48 = vpop.f32.mrf.mxu0  ;;  %1620 = vst.msk [vmem:[#allocation3 + $0x10] sm:$0xff] %vm6807_vm7, %v1573_v63 }
  0xf0   : > { %v977_v32 = vmax.f32 %v743_v15, 0.0  ;;  %v5053_v44 = vadd.f32 %v5008_v61, %v4995_v48 }
  0xf1   : > { %v4410_v50 = vpop.f32.mrf.mxu0 }
  0xf2   : > { %v756_v17 = vadd.f32 %v4410_v50, %v5008_v61  ;;  %v5061_v50 = vsel %vm6808_vm1, %v974_v31, -inf  ;;  %v975_v0 = vmax.f32 %v5053_v44, 0.0 }
  0xf3   : > { %v747_v51 = vpop.f32.mrf.mxu0 }
  0xf4   : > { %v748_v19 = vadd.f32 %v5008_v61, %v747_v51  ;;  %v980_v34 = vmax.f32 %v756_v17, 0.0  ;;  %v5064_v51 = vsel %vm6808_vm1, %v977_v32, -inf }
  0xf5   : > { %v4411_v53 = vpop.f32.mrf.mxu0 }
  0xf6   : > { %v759_v21 = vadd.f32 %v4411_v53, %v5008_v61  ;;  %v978_v35 = vmax.f32 %v748_v19, 0.0  ;;  %v1050_v48 = vsel %vm6808_vm1, %v980_v34, -inf }
  0xf7   : > { %v750_v56 = vpop.f32.mrf.mxu0  ;;  %v1051_v6 = vmax.f32 %v5034_v25, %v1050_v48 }
  0xf8   : > { %v751_v22 = vadd.f32 %v5008_v61, %v750_v56  ;;  %v981_v38 = vmax.f32 %v759_v21, 0.0  ;;  %v1036_v54 = vsel %vm6808_vm1, %v978_v35, -inf }
  0xf9   : > { %v4414_v58 = vpop.f32.mrf.mxu0 }
  0xfa   : > { %v772_v27 = vadd.f32 %v4414_v58, %v5008_v61  ;;  %v979_v39 = vmax.f32 %v751_v22, 0.0  ;;  %v1057_v56 = vsel %vm6808_vm1, %v981_v38, -inf }
  0xfb   : > { %v763_v59 = vpop.f32.mrf.mxu0  ;;  %v1058_v11 = vmax.f32 %v5045_v37, %v1057_v56 }
  0xfc   : > { %v764_v40 = vadd.f32 %v5008_v61, %v763_v59  ;;  %v984_v45 = vmax.f32 %v772_v27, 0.0  ;;  %v1043_v57 = vsel %vm6808_vm1, %v979_v39, -inf }
  0xfd   : > { %v5010_v62 = vpop.f32.mrf.mxu0  ;;  %v1044_v12 = vmax.f32 %v5049_v43, %v1043_v57 }
  0xfe   : > { %v982_v58 = vmax.f32 %v764_v40, 0.0  ;;  %v5075_v2 = vsel %vm6808_vm1, %v984_v45, -inf  ;;  %v775_v3 = vadd.f32 %v5010_v62, %v5008_v61 }
  0xff   : > { %v5014_v1 = vpop.f32.mrf.mxu0  ;;  %v1079_v14 = vmax.f32 %v5058_v49, %v5075_v2 }
 0x100   : > { %v1064_v15 = vsel %vm6808_vm1, %v982_v58, -inf  ;;  %v985_v20 = vmax.f32 %v775_v3, 0.0  ;;  %v767_v24 = vadd.f32 %v5008_v61, %v5014_v1 }
 0x101   : > { %v4418_v5 = vpop.f32.mrf.mxu0  ;;  %v1065_v2 = vmax.f32 %v5061_v50, %v1064_v15 }
 0x102   : > { %v788_v36 = vadd.f32 %v4418_v5, %v5008_v61  ;;  %v2057_v5 = vpop.permute.xlu0 %2056  ;;  %v1085_v48 = vsel %vm6808_vm1, %v985_v20, -inf }
 0x103   : > { %v779_v7 = vpop.f32.mrf.mxu0  ;;  %2105 = vst.msk [vmem:[#allocation3] sm:$0xff] %vm6809_vm12, %v2057_v5  ;;  %v1086_v50 = vmax.f32 %v5064_v51, %v1085_v48 }
 0x104   : > { %v780_v46 = vadd.f32 %v5008_v61, %v779_v7  ;;  %v988_v55 = vmax.f32 %v788_v36, 0.0  ;;  %v1037_v7 = vmax.f32 %v5040_v29, %v1036_v54 }
 0x105   : > { %v4419_v16 = vpop.f32.mrf.mxu0 }
 0x106   : > { %v791_v52 = vadd.f32 %v4419_v16, %v5008_v61  ;;  %v986_v4 = vmax.f32 %v780_v46, 0.0  ;;  %v1052_v62 = vsel %vm6808_vm1, %v988_v55, -inf }
 0x107   : > { %v782_v23 = vpop.f32.mrf.mxu0  ;;  %v1053_v25 = vmax.f32 %v1051_v6, %v1052_v62 }
 0x108   : > { %v783_v59 = vadd.f32 %v5008_v61, %v782_v23  ;;  %v989_v8 = vmax.f32 %v791_v52, 0.0  ;;  %v1038_v21 = vsel %vm6808_vm1, %v986_v4, -inf }
 0x109   : > { %v4422_v33 = vpop.f32.mrf.mxu0 }
 0x10a   : > { %v804_v9 = vadd.f32 %v4422_v33, %v5008_v61  ;;  %v987_v16 = vmax.f32 %v783_v59, 0.0  ;;  %v1059_v26 = vsel %vm6808_vm1, %v989_v8, -inf  ;;  %v1039_v33 = vmax.f32 %v1037_v7, %v1038_v21 }
 0x10b   : > { %v795_v41 = vpop.f32.mrf.mxu0  ;;  %v1060_v42 = vmax.f32 %v1058_v11, %v1059_v26  ;;  %v1070_v11 = vsel %vm6808_vm1, %v975_v0, -inf }
 0x10c   : > { %v796_v17 = vadd.f32 %v5008_v61, %v795_v41  ;;  %v992_v27 = vmax.f32 %v804_v9, 0.0  ;;  %v1045_v34 = vsel %vm6808_vm1, %v987_v16, -inf  ;;  %v983_v41 = vmax.f32 %v767_v24, 0.0 }
 0x10d   : > { %v4423_v53 = vpop.f32.mrf.mxu0  ;;  %v1046_v54 = vmax.f32 %v1044_v12, %v1045_v34 }
 0x10e   : > { %v807_v29 = vadd.f32 %v4423_v53, %v5008_v61  ;;  %v990_v35 = vmax.f32 %v796_v17, 0.0  ;;  %v1080_v43 = vsel %vm6808_vm1, %v992_v27, -inf  ;;  %v1071_v3 = vsel %vm6808_vm1, %v983_v41, -inf }
 0x10f   : > { %v798_v60 = vpop.f32.mrf.mxu0  ;;  %v1081_v4 = vmax.f32 %v1079_v14, %v1080_v43  ;;  %v1072_v21 = vmax.f32 %v1070_v11, %v1071_v3  ;;  %v4613_v11 = vld [vmem:[%s6821_s3 + $0x8] sm:$0xff]  }
 0x110   : > { %v799_v1 = vadd.f32 %v5008_v61, %v798_v60  ;;  %v993_v47 = vmax.f32 %v807_v29, 0.0  ;;  %v1066_v55 = vsel %vm6808_vm1, %v990_v35, -inf }
 0x111   : > { %v4426_v10 = vpop.f32.mrf.mxu0  ;;  %v1067_v12 = vmax.f32 %v1065_v2, %v1066_v55 }
 0x112   : > { %v820_v13 = vadd.f32 %v4426_v10, %v5008_v61  ;;  %v991_v58 = vmax.f32 %v799_v1, 0.0  ;;  %v1087_v7 = vsel %vm6808_vm1, %v993_v47, -inf }
 0x113   : > { %v811_v19 = vpop.f32.mrf.mxu0  ;;  %v1088_v0 = vmax.f32 %v1086_v50, %v1087_v7 }
 0x114   : > { %v996_v22 = vmax.f32 %v820_v13, 0.0  ;;  %v812_v23 = vadd.f32 %v5008_v61, %v811_v19  ;;  %v1073_v14 = vsel %vm6808_vm1, %v991_v58, -inf }
 0x115   : > { %v4427_v28 = vpop.f32.mrf.mxu0 }
 0x116   : > { %v1054_v30 = vsel %vm6808_vm1, %v996_v22, -inf  ;;  %v994_v31 = vmax.f32 %v812_v23, 0.0  ;;  %v823_v32 = vadd.f32 %v4427_v28, %v5008_v61 }
 0x117   : > { %v1055_v36 = vmax.f32 %v1053_v25, %v1054_v30  ;;  %v814_v37 = vpop.f32.mrf.mxu0  ;;  %v1074_v25 = vmax.f32 %v1072_v21, %v1073_v14 }
 0x118   : > { %v1040_v38 = vsel %vm6808_vm1, %v994_v31, -inf  ;;  %v997_v39 = vmax.f32 %v823_v32, 0.0  ;;  %v815_v40 = vadd.f32 %v5008_v61, %v814_v37 }
 0x119   : > { %1201 = vst.msk [vmem:[#allocation2 + $0x42] sm:$0xff] %vm6808_vm1, %v1055_v36  ;;  %v1041_v45 = vmax.f32 %v1039_v33, %v1040_v38  ;;  %v4430_v46 = vpop.f32.mrf.mxu0 }
 0x11a   : > { %v1061_v49 = vsel %vm6808_vm1, %v997_v39, -inf  ;;  %v995_v52 = vmax.f32 %v815_v40, 0.0  ;;  %v836_v53 = vadd.f32 %v4430_v46, %v5008_v61 }
 0x11b   : > { %1199 = vst.msk [vmem:[#allocation2 + $0x22] sm:$0xff] %vm6808_vm1, %v1041_v45  ;;  %v1062_v56 = vmax.f32 %v1060_v42, %v1061_v49  ;;  %v827_v57 = vpop.f32.mrf.mxu0  ;;  %v4607_v49 = vld [vmem:[%s6821_s3 + $0x38] sm:$0xff]  }
 0x11c   : > { %v1047_v59 = vsel %vm6808_vm1, %v995_v52, -inf  ;;  %v1000_v60 = vmax.f32 %v836_v53, 0.0  ;;  %v828_v63 = vadd.f32 %v5008_v61, %v827_v57  ;;  %v4716_v52 = vmov 0   ;;  %v4608_v53 = vld [vmem:[%s6821_s3 + $0x30] sm:$0xff]   ;;  %v4610_v57 = vld [vmem:[%s6821_s3 + $0x20] sm:$0xff]  }
 0x11d   : > { %1202 = vst.msk [vmem:[#allocation2 + $0x52] sm:$0xff] %vm6808_vm1, %v1062_v56  ;;  %v1048_v5 = vmax.f32 %v1046_v54, %v1047_v59  ;;  %v4431_v6 = vpop.f32.mrf.mxu0  ;;  %3689 = vmatprep.subr.bf16.mxu1 %v4716_v52  ;;  %v4609_v54 = vld [vmem:[%s6821_s3 + $0x28] sm:$0xff]  }
 0x11e   : > { %v1082_v8 = vsel %vm6808_vm1, %v1000_v60, -inf  ;;  %v998_v9 = vmax.f32 %v828_v63, 0.0  ;;  %v839_v10 = vadd.f32 %v4431_v6, %v5008_v61  ;;  %3690 = vmatpush1.bf16.msra.mxu1 %v4607_v49  ;;  %v4611_v60 = vld [vmem:[%s6821_s3 + $0x18] sm:$0xff]   ;;  %v4612_v6 = vld [vmem:[%s6821_s3 + $0x10] sm:$0xff]  }
 0x11f   : > { %1200 = vst.msk [vmem:[#allocation2 + $0x32] sm:$0xff] %vm6808_vm1, %v1048_v5  ;;  %v1083_v62 = vmax.f32 %v1081_v4, %v1082_v8  ;;  %v830_v13 = vpop.f32.mrf.mxu0  ;;  %3691 = vmatprep.subr.bf16.mxu1 %v4716_v52 }
 0x120   : > { %v1068_v15 = vsel %vm6808_vm1, %v998_v9, -inf  ;;  %v1001_v16 = vmax.f32 %v839_v10, 0.0  ;;  %v831_v17 = vadd.f32 %v5008_v61, %v830_v13  ;;  %v3025_v19 = vld [vmem:[#allocation2 + $0x40] sm:$0xff] }
 0x121   : > { %v5127_v20 = vld [vmem:[#allocation2 + $0x42] sm:$0xff]  ;;  %1205 = vst.msk [vmem:[#allocation2 + $0x82] sm:$0xff] %vm6808_vm1, %v1083_v62  ;;  %v1069_v51 = vmax.f32 %v1067_v12, %v1068_v15  ;;  %3057 = vrot.lane.b32.xlu0 %v3025_v19, %s6792_s17  ;;  %1235 = vst.msk [vmem:[#allocation3 + $0x40] sm:$0xff] %vm6808_vm1, %v3025_v19  ;;  %v5251_v48 = vpop.f32.mrf.mxu0 }
 0x122   : > { %v3121_v44 = vld [vmem:[#allocation2 + $0x41] sm:$0xff]  ;;  %2770 = vrot.lane.b32.xlu1 %v5127_v20, %s6804_s14  ;;  %v1089_v22 = vsel %vm6808_vm1, %v1001_v16, -inf  ;;  %v999_v23 = vmax.f32 %v831_v17, 0.0  ;;  %3692 = vmatpush1.bf16.msra.mxu1 %v4608_v53 }
 0x123   : > { %2721 = vst.msk [vmem:[#allocation3 + $0x18] sm:$0xff] %vm6808_vm1, %v3121_v44  ;;  %v5136_v24 = vld [vmem:[#allocation2 + $0x20] sm:$0xff]  ;;  %1203 = vst.msk [vmem:[#allocation2 + $0x62] sm:$0xff] %vm6808_vm1, %v1069_v51  ;;  %v1090_v26 = vmax.f32 %v1088_v0, %v1089_v22  ;;  %3693 = vmatprep.subr.bf16.mxu1 %v4716_v52  ;;  %v5261_v55 = vpop.f32.mrf.mxu0 }
 0x124   : > { %1233 = vst.msk [vmem:[#allocation3 + $0x20] sm:$0xff] %vm6808_vm1, %v5136_v24  ;;  %v1075_v27 = vsel %vm6808_vm1, %v999_v23, -inf  ;;  %v2833_v28 = vld [vmem:[#allocation2 + $0x43] sm:$0xff]  ;;  %v5142_v29 = vld [vmem:[#allocation2 + $0x50] sm:$0xff] }
 0x125   : > { %v5144_v30 = vld [vmem:[#allocation2 + $0x51] sm:$0xff]  ;;  %1206 = vst.msk [vmem:[#allocation2 + $0x92] sm:$0xff] %vm6808_vm1, %v1090_v26  ;;  %v1076_v31 = vmax.f32 %v1074_v25, %v1075_v27  ;;  %3153 = vrot.lane.b32.xlu0 %v3121_v44, %s6784_s21  ;;  %1236 = vst.msk [vmem:[#allocation3 + $0x50] sm:$0xff] %vm6808_vm1, %v5142_v29  ;;  %v2929_v34 = vld [vmem:[#allocation2 + $0x44] sm:$0xff]  ;;  %v5263_v56 = vpop.f32.mrf.mxu0 }
 0x126   : > { %2866 = vrot.lane.b32.xlu1 %v2833_v28, %s6802_s22  ;;  %2722 = vst.msk [vmem:[#allocation3 + $0x28] sm:$0xff] %vm6808_vm1, %v5144_v30  ;;  %v5153_v32 = vld [vmem:[#allocation2 + $0x31] sm:$0xff]  ;;  %v1734_v40 = vld [vmem:[#allocation2 + $0x21] sm:$0xff]  ;;  %3694 = vmatpush1.bf16.msra.mxu1 %v4609_v54 }
 0x127   : > { %v5155_v33 = vld [vmem:[#allocation2 + $0x30] sm:$0xff]  ;;  %1204 = vst.msk [vmem:[#allocation2 + $0x72] sm:$0xff] %vm6808_vm1, %v1076_v31  ;;  %2720 = vst.msk [vmem:[#allocation3 + $0x8] sm:$0xff] %vm6808_vm1, %v5153_v32  ;;  %v1831_v41 = vld [vmem:[#allocation2 + $0x22] sm:$0xff]  ;;  %3695 = vmatprep.subr.bf16.mxu1 %v4716_v52  ;;  %v5273_v58 = vpop.f32.mrf.mxu0  ;;  %v844_v31 = vadd.f32 %v5008_v61, %v5261_v55 }
 0x128   : > { %1234 = vst.msk [vmem:[#allocation3 + $0x30] sm:$0xff] %vm6808_vm1, %v5155_v33  ;;  %v5165_v35 = vld [vmem:[#allocation2 + $0x81] sm:$0xff]  ;;  %v3218_v45 = vld [vmem:[#allocation2 + $0x52] sm:$0xff] }
 0x129   : > { %3249 = vrot.lane.b32.xlu0 %v5127_v20, %s6798_s23  ;;  %2725 = vst.msk [vmem:[#allocation3 + $0x58] sm:$0xff] %vm6808_vm1, %v5165_v35  ;;  %v1928_v42 = vld [vmem:[#allocation2 + $0x23] sm:$0xff]  ;;  %v5212_v46 = vld [vmem:[#allocation2 + $0x53] sm:$0xff]  ;;  %v5275_v59 = vpop.f32.mrf.mxu0 }
 0x12a   : > { %2962 = vrot.lane.b32.xlu1 %v2929_v34, %s6778_s16  ;;  %v5169_v36 = vld [vmem:[#allocation2 + $0x61] sm:$0xff]  ;;  %v5217_v47 = vld [vmem:[#allocation2 + $0x54] sm:$0xff]  ;;  %3696 = vmatpush1.bf16.msra.mxu1 %v4610_v57 }
 0x12b   : > { %2723 = vst.msk [vmem:[#allocation3 + $0x38] sm:$0xff] %vm6808_vm1, %v5169_v36  ;;  %v1221_v37 = vld [vmem:[#allocation2 + $0x60] sm:$0xff]  ;;  %3697 = vmatprep.subr.bf16.mxu1 %v4716_v52  ;;  %v5284_v63 = vpop.f32.mrf.mxu0  ;;  %v5289_v4 = vld [vmem:[#allocation2 + $0x32] sm:$0xff] }
 0x12c   : > { %1237 = vst.msk [vmem:[#allocation3 + $0x60] sm:$0xff] %vm6808_vm1, %v1221_v37  ;;  %v2710_v39 = vld [vmem:[#allocation2 + $0x91] sm:$0xff]  ;;  %v2025_v43 = vld [vmem:[#allocation2 + $0x24] sm:$0xff]  ;;  %v860_v55 = vadd.f32 %v5008_v61, %v5284_v63 }
 0x12d   : > { %3345 = vrot.lane.b32.xlu0 %v2833_v28, %s6790_s24  ;;  %2726 = vst.msk [vmem:[#allocation3 + $0x68] sm:$0xff] %vm6808_vm1, %v2710_v39  ;;  %v5291_v5 = vpop.f32.mrf.mxu0  ;;  %v5317_v62 = vld [vmem:[#allocation2 + $0x33] sm:$0xff]  ;;  %v4614_v15 = vld [vmem:[%s6821_s3] sm:$0xff]   ;;  %v847_v39 = vadd.f32 %v5008_v61, %v5273_v58 }
 0x12e   : > { %1674 = vrot.lane.b32.xlu1 %v3025_v19, %s6784_s21  ;;  %v2708_v1 = vld [vmem:[#allocation2 + $0x71] sm:$0xff]  ;;  %3698 = vmatpush1.bf16.msra.mxu1 %v4611_v60 }
 0x12f   : > { %v1222_v38 = vld [vmem:[#allocation2 + $0x70] sm:$0xff]  ;;  %2724 = vst.msk [vmem:[#allocation3 + $0x48] sm:$0xff] %vm6808_vm1, %v2708_v1  ;;  %3699 = vmatprep.subr.bf16.mxu1 %v4716_v52  ;;  %v5301_v7 = vpop.f32.mrf.mxu0 }
 0x130   : > { %1238 = vst.msk [vmem:[#allocation3 + $0x70] sm:$0xff] %vm6808_vm1, %v1222_v38  ;;  %v5343_v22 = vld [vmem:[#allocation2 + $0x34] sm:$0xff]  ;;  %v855_v38 = vadd.f32 %v5263_v56, %v5008_v61  ;;  %v871_v56 = vadd.f32 %v5291_v5, %v5008_v61  ;;  %v863_v57 = vadd.f32 %v5008_v61, %v5301_v7  ;;  %v4619_v7 = vld [vmem:[%s6821_s3 + $0x40] sm:$0xff]  }
 0x131   : > { %3441 = vrot.lane.b32.xlu0 %v2929_v34, %s6786_s25  ;;  %v4442_v10 = vpop.f32.mrf.mxu0 }
 0x132   : > { %1771 = vrot.lane.b32.xlu1 %v3121_v44, %s6798_s23  ;;  %3700 = vmatpush1.bf16.msra.mxu1 %v4612_v6  ;;  %v1005_v58 = vmax.f32 %v855_v38, 0.0 }
 0x133   : > { %3701 = vmatprep.subr.bf16.mxu1 %v4716_v52  ;;  %v875_v13 = vpop.f32.mrf.mxu0 }
 0x135   : > { %1287 = vrot.lane.b32.xlu0 %v3121_v44, %s6804_s14  ;;  %v4443_v14 = vpop.f32.mrf.mxu0 }
 0x136   : > { %1868 = vrot.lane.b32.xlu1 %v5127_v20, %s6790_s24  ;;  %3702 = vmatpush1.bf16.msra.mxu1 %v4613_v11  ;;  %v887_v49 = vadd.f32 %v4443_v14, %v5008_v61 }
 0x137   : > { %3703 = vmatprep.subr.bf16.mxu1 %v4716_v52 }
 0x139   : > { %1384 = vrot.lane.b32.xlu0 %v5127_v20, %s6802_s22 }
 0x13a   : > { %2641 = vrot.lane.b32.xlu1 %v3025_v19, %s6776_s29  ;;  %s6794_s29 = smov 96   ;;  %3704 = vmatpush1.bf16.msra.mxu1 %v4614_v15 }
 0x13b   : > { %3711 = vmatprep.subr.bf16.mxu1 %v4716_v52 }
 0x13d   : > { %2157 = vrot.lane.b32.xlu0 %v3025_v19, %s6788_s27  ;;  %v878_v19 = vpop.f32.mrf.mxu0 }
 0x13e   : > { %1965 = vrot.lane.b32.xlu1 %v2833_v28, %s6786_s25 }
 0x141   : > { %1481 = vrot.lane.b32.xlu0 %v2833_v28, %s6778_s16  ;;  %s6800_s16 = smov 104  }
 0x142   : > { %2062 = vrot.lane.b32.xlu1 %v2929_v34, %s6782_s26 }
 0x145   : > { %2254 = vrot.lane.b32.xlu0 %v3121_v44, %s6780_s28  ;;  %s6796_s28 = smov 112   ;;  %v4446_v44 = vpop.f32.mrf.mxu0 }
 0x146   : > { %1670 = vrot.lane.b32.xlu1 %v5136_v24, %s6784_s21  ;;  %v900_v5 = vadd.f32 %v4446_v44, %v5008_v61  ;;  %v1009_v44 = vmax.f32 %v871_v56, 0.0 }
 0x147   : > { %v891_v23 = vpop.f32.mrf.mxu0 }
 0x148   : > { %v892_v14 = vadd.f32 %v5008_v61, %v891_v23  ;;  %v1016_v38 = vmax.f32 %v900_v5, 0.0 }
 0x149   : > { %1578 = vrot.lane.b32.xlu0 %v2929_v34, %s6792_s17  ;;  %v5352_v25 = vpop.f32.mrf.mxu0 }
 0x14a   : > { %1767 = vrot.lane.b32.xlu1 %v1734_v40, %s6798_s23 }
 0x14d   : > { %2351 = vrot.lane.b32.xlu0 %v5127_v20, %s6794_s29  ;;  %v4615_v20 = vld [vmem:[%s6821_s3 + $0x60] ss:$0 sps:$4 sm:$0xff]  }
 0x14e   : > { %1864 = vrot.lane.b32.xlu1 %v1831_v41, %s6790_s24  ;;  %v3687_v51 = vsel %vm3685_vm13, %v4615_v20, 0  ;;  %v1006_v20 = vmax.f32 %v860_v55, 0.0  ;;  %vm2687_vm13 = vcmask 1048512  }
 0x14f   : > { %3712 = vmatpush2.bf16.msra.mxu1 %v3687_v51  ;;  %v1007_v51 = vmax.f32 %v863_v57, 0.0  ;;  %v5458_v57 = vld [vmem:[#allocation2 + $0x83] sm:$0xff] }
 0x150   : > { %3713 = vmatprep.subr.bf16.mxu1 %v4716_v52 }
 0x151   : > { %2448 = vrot.lane.b32.xlu0 %v2833_v28, %s6800_s16  ;;  %v5358_v28 = vpop.f32.mrf.mxu0  ;;  %v5455_v55 = vsel %vm6808_vm1, %v1007_v51, -inf }
 0x152   : > { %1961 = vrot.lane.b32.xlu1 %v1928_v42, %s6786_s25 }
 0x155   : > { %2545 = vrot.lane.b32.xlu0 %v2929_v34, %s6796_s28  ;;  %v4450_v34 = vpop.f32.mrf.mxu0 }
 0x156   : > { %2058 = vrot.lane.b32.xlu1 %v2025_v43, %s6782_s26  ;;  %s6819_s26 = smov 24  }
 0x159   : > { %1283 = vrot.lane.b32.xlu0 %v1734_v40, %s6804_s14 }
 0x15a   : > { %3059 = vrot.lane.b32.xlu1 %v5142_v29, %s6792_s17 }
 0x15d   : > { %1380 = vrot.lane.b32.xlu0 %v1831_v41, %s6802_s22 }
 0x15e   : > { %3155 = vrot.lane.b32.xlu1 %v5144_v30, %s6784_s21  ;;  %s6820_s21 = smov 88  }
 0x161   : > { %2153 = vrot.lane.b32.xlu0 %v5136_v24, %s6788_s27  ;;  %v4616_v24 = vld [vmem:[%s6821_s3 + $0x58] sm:$0xff]  }
 0x162   : > { %3251 = vrot.lane.b32.xlu1 %v3218_v45, %s6798_s23  ;;  %3714 = vmatpush2.bf16.msra.mxu1 %v4616_v24 }
 0x163   : > { %3715 = vmatprep.subr.bf16.mxu1 %v4716_v52 }
 0x165   : > { %1477 = vrot.lane.b32.xlu0 %v1928_v42, %s6819_s26 }
 0x166   : > { %3347 = vrot.lane.b32.xlu1 %v5212_v46, %s6790_s24  ;;  %s6827_s24 = smov 72  }
 0x169   : > { %2250 = vrot.lane.b32.xlu0 %v1734_v40, %s6820_s21  ;;  %v868_v40 = vadd.f32 %v5275_v59, %v5008_v61  ;;  %v1003_v59 = vmax.f32 %v847_v39, 0.0 }
 0x16a   : > { %3443 = vrot.lane.b32.xlu1 %v5217_v47, %s6786_s25  ;;  %s6822_s25 = smov 40  }
 0x16b   : > { %v1008_v60 = vmax.f32 %v868_v40, 0.0  ;;  %v5430_v23 = vsel %vm6808_vm1, %v1003_v59, -inf }
 0x16d   : > { %1574 = vrot.lane.b32.xlu0 %v2025_v43, %s6792_s17 }
 0x16e   : > { %1289 = vrot.lane.b32.xlu1 %v5144_v30, %s6804_s14 }
 0x171   : > { %2347 = vrot.lane.b32.xlu0 %v1831_v41, %s6794_s29  ;;  %v907_v41 = vpop.f32.mrf.mxu0 }
 0x172   : > { %1386 = vrot.lane.b32.xlu1 %v3218_v45, %s6802_s22  ;;  %v908_v24 = vadd.f32 %v5008_v61, %v907_v41  ;;  %v1014_v41 = vmax.f32 %v892_v14, 0.0 }
 0x173   : > { %v4451_v53 = vpop.f32.mrf.mxu0 }
 0x174   : > { %v1018_v56 = vmax.f32 %v908_v24, 0.0 }
 0x175   : > { %2444 = vrot.lane.b32.xlu0 %v1928_v42, %s6800_s16  ;;  %v884_v42 = vadd.f32 %v4442_v10, %v5008_v61  ;;  %v910_v6 = vpop.f32.mrf.mxu0  ;;  %v916_v10 = vadd.f32 %v4450_v34, %v5008_v61 }
 0x176   : > { %2159 = vrot.lane.b32.xlu1 %v5142_v29, %s6788_s27  ;;  %s6825_s27 = smov 80  }
 0x177   : > { %v1012_v63 = vmax.f32 %v884_v42, 0.0  ;;  %v1020_v39 = vmax.f32 %v916_v10, 0.0  ;;  %v919_v42 = vadd.f32 %v4451_v53, %v5008_v61  ;;  %v5477_v10 = vsel %vm6808_vm1, %v1014_v41, -inf }
 0x179   : > { %2541 = vrot.lane.b32.xlu0 %v2025_v43, %s6796_s28  ;;  %v876_v43 = vadd.f32 %v5008_v61, %v875_v13  ;;  %v1013_v13 = vmax.f32 %v887_v49, 0.0  ;;  %v1106_v34 = vsel %vm6808_vm1, %v1012_v63, -inf  ;;  %v5452_v49 = vsel %vm6808_vm1, %v1009_v44, -inf }
 0x17a   : > { %1483 = vrot.lane.b32.xlu1 %v5212_v46, %s6819_s26  ;;  %v5472_v63 = vsel %vm6808_vm1, %v1016_v38, -inf }
 0x17b   : > { %v5442_v40 = vsel %vm6808_vm1, %v1013_v13, -inf }
 0x17d   : > { %2772 = vrot.lane.b32.xlu0 %v3218_v45, %s6804_s14 }
 0x17e   : > { %2256 = vrot.lane.b32.xlu1 %v5144_v30, %s6820_s21 }
 0x181   : > { %2868 = vrot.lane.b32.xlu0 %v5212_v46, %s6802_s22 }
 0x182   : > { %1580 = vrot.lane.b32.xlu1 %v5217_v47, %s6792_s17  ;;  %s6824_s17 = smov 120  }
 0x185   : > { %2964 = vrot.lane.b32.xlu0 %v5217_v47, %s6819_s26 }
 0x186   : > { %2353 = vrot.lane.b32.xlu1 %v3218_v45, %s6794_s29  ;;  %s6823_s29 = smov 56  }
 0x189   : > { %1676 = vrot.lane.b32.xlu0 %v5142_v29, %s6822_s25 }
 0x18a   : > { %2450 = vrot.lane.b32.xlu1 %v5212_v46, %s6800_s16  ;;  %s6828_s16 = smov 32  }
 0x18d   : > { %1773 = vrot.lane.b32.xlu0 %v5144_v30, %s6798_s23  ;;  %s6826_s23 = smov 64   ;;  %v852_v30 = vadd.f32 %v5251_v48, %v5008_v61 }
 0x18e   : > { %2547 = vrot.lane.b32.xlu1 %v5217_v47, %s6796_s28  ;;  %s6829_s28 = smov 16  }
 0x191   : > { %1870 = vrot.lane.b32.xlu0 %v3218_v45, %s6823_s29  ;;  %v4618_v45 = vld [vmem:[%s6821_s3 + $0x48] sm:$0xff]  }
 0x192   : > { %1285 = vrot.lane.b32.xlu1 %v5153_v32, %s6804_s14 }
 0x193   : > { %v5286_v2 = vpop.permute.xlu0 %3057 }
 0x194   : > { %v2771_v3 = vpop.permute.xlu1 %2770 }
 0x195   : > { %2817 = vst.msk [vmem:[#allocation3 + $0x18] sm:$0xff] %vm1327_vm4, %v2771_v3  ;;  %2643 = vrot.lane.b32.xlu0 %v5142_v29, %s6824_s17  ;;  %v4617_v29 = vld [vmem:[%s6821_s3 + $0x50] sm:$0xff]   ;;  %v879_v3 = vadd.f32 %v5008_v61, %v878_v19 }
 0x196   : > { %1382 = vrot.lane.b32.xlu1 %v5289_v4, %s6802_s22  ;;  %3716 = vmatpush2.bf16.msra.mxu1 %v4617_v29  ;;  %s6833_s22 = smov 48   ;;  %v5427_v29 = vsel %vm6808_vm1, %v1005_v58, -inf }
 0x197   : > { %v5303_v8 = vpop.permute.xlu0 %3153  ;;  %3717 = vmatprep.subr.bf16.mxu1 %v4716_v52 }
 0x198   : > { %v2867_v9 = vpop.permute.xlu1 %2866 }
 0x199   : > { %2913 = vst.msk [vmem:[#allocation3 + $0x18] sm:$0xff] %vm1424_vm5, %v2867_v9  ;;  %1967 = vrot.lane.b32.xlu0 %v5212_v46, %s6826_s23  ;;  %v1004_v46 = vmax.f32 %v852_v30, 0.0  ;;  %v1010_v9 = vmax.f32 %v876_v43, 0.0  ;;  %v1011_v30 = vmax.f32 %v879_v3, 0.0  ;;  %v911_v43 = vadd.f32 %v5008_v61, %v910_v6 }
 0x19a   : > { %2155 = vrot.lane.b32.xlu1 %v5155_v33, %s6825_s27  ;;  %3718 = vmatpush2.bf16.msra.mxu1 %v4618_v45  ;;  %v1114_v6 = vmax.f32 %v5427_v29, %v5442_v40 }
 0x19b   : > { %v5314_v50 = vpop.permute.xlu0 %3249  ;;  %v5413_v11 = vsel %vm6808_vm1, %v1004_v46, -inf  ;;  %3719 = vmatprep.subr.bf16.mxu1 %v4716_v52  ;;  %v5433_v52 = vsel %vm6808_vm1, %v1008_v60, -inf  ;;  %v1099_v59 = vsel %vm6808_vm1, %v1011_v30, -inf  ;;  %v903_v60 = vadd.f32 %v5352_v25, %v5008_v61 }
 0x19c   : > { %v2963_v12 = vpop.permute.xlu1 %2962  ;;  %v1107_v53 = vmax.f32 %v5413_v11, %v1106_v34  ;;  %v895_v25 = vadd.f32 %v5008_v61, %v5358_v28  ;;  %v1019_v11 = vmax.f32 %v911_v43, 0.0  ;;  %v1100_v14 = vmax.f32 %v5430_v23, %v1099_v59 }
 0x19d   : > { %3009 = vst.msk [vmem:[#allocation3 + $0x18] sm:$0xff] %vm1521_vm6, %v2963_v12  ;;  %2064 = vrot.lane.b32.xlu0 %v5217_v47, %s6827_s24  ;;  %v1002_v47 = vmax.f32 %v844_v31, 0.0  ;;  %v1135_v28 = vmax.f32 %v5433_v52, %v5472_v63  ;;  %v1017_v51 = vmax.f32 %v903_v60, 0.0 }
 0x19e   : > { %1479 = vrot.lane.b32.xlu1 %v5317_v62, %s6819_s26  ;;  %3720 = vmatpush2.bf16.msra.mxu1 %v4619_v7  ;;  %v1021_v7 = vmax.f32 %v919_v42, 0.0  ;;  %v1015_v38 = vmax.f32 %v895_v25, 0.0  ;;  %v1101_v40 = vsel %vm6808_vm1, %v1019_v11, -inf }
 0x19f   : > { %v5327_v16 = vpop.permute.xlu0 %3345  ;;  %v5416_v12 = vsel %vm6808_vm1, %v1002_v47, -inf }
 0x1a0   : > { %v5329_v17 = vpop.permute.xlu1 %1674  ;;  %v1127_v25 = vsel %vm6808_vm1, %v1015_v38, -inf }
 0x1a1   : > { %2768 = vrot.lane.b32.xlu0 %v5289_v4, %s6804_s14  ;;  %s6830_s14 = smov 96   ;;  %v1128_v38 = vmax.f32 %v5455_v55, %v1127_v25 }
 0x1a2   : > { %2252 = vrot.lane.b32.xlu1 %v5153_v32, %s6820_s21 }
 0x1a3   : > { %v5339_v21 = vpop.permute.xlu0 %3441 }
 0x1a4   : > { %v5341_v0 = vpop.permute.xlu1 %1771 }
 0x1a5   : > { %2864 = vrot.lane.b32.xlu0 %v5317_v62, %s6829_s28 }
 0x1a6   : > { %1576 = vrot.lane.b32.xlu1 %v5343_v22, %s6828_s16 }
 0x1a7   : > { %v1288_v27 = vpop.permute.xlu0 %1287 }
 0x1a8   : > { %v5355_v26 = vpop.permute.xlu1 %1868  ;;  %1332 = vst.msk [vmem:[#allocation3 + $0x40] sm:$0xff] %vm1327_vm4, %v1288_v27  ;;  %v5424_v27 = vld [vmem:[#allocation2 + $0x82] sm:$0xff] }
 0x1a9   : > { %2960 = vrot.lane.b32.xlu0 %v5343_v22, %s6819_s26 }
 0x1aa   : > { %2349 = vrot.lane.b32.xlu1 %v5289_v4, %s6830_s14 }
 0x1ab   : > { %v1385_v1 = vpop.permute.xlu0 %1384 }
 0x1ac   : > { %v5372_v37 = vpop.permute.xlu1 %2641  ;;  %1429 = vst.msk [vmem:[#allocation3 + $0x40] sm:$0xff] %vm1424_vm5, %v1385_v1  ;;  %v1092_v1 = vsel %vm6808_vm1, %v1010_v9, -inf  ;;  %v1108_v9 = vsel %vm6808_vm1, %v1020_v39, -inf  ;;  %v1115_v39 = vsel %vm6808_vm1, %v1021_v7, -inf  ;;  %v1102_v7 = vmax.f32 %v1100_v14, %v1101_v40 }
 0x1ad   : > { %1672 = vrot.lane.b32.xlu0 %v5155_v33, %s6822_s25  ;;  %v1093_v58 = vmax.f32 %v5416_v12, %v1092_v1  ;;  %v1109_v24 = vmax.f32 %v1107_v53, %v1108_v9  ;;  %v1141_v53 = vsel %vm6808_vm1, %v1017_v51, -inf  ;;  %v5524_v51 = vld [vmem:[#allocation2 + $0x62] sm:$0xff] }
 0x1ae   : > { %2446 = vrot.lane.b32.xlu1 %v5317_v62, %s6831_s0  ;;  %v1142_v14 = vmax.f32 %v5452_v49, %v1141_v53  ;;  %v4636_v49 = vld [vmem:[%s6768_s2] ss:$0 sm:$0xff]  ;;  %v5545_v53 = vld [vmem:[#allocation2 + $0x63] sm:$0xff] }
 0x1af   : > { %v5394_v54 = vpop.permute.xlu0 %2157 }
 0x1b0   : > { %v5392_v48 = vpop.permute.xlu1 %1965 }
 0x1b1   : > { %1769 = vrot.lane.b32.xlu0 %v5153_v32, %s6833_s22  ;;  %v4454_v32 = vpop.f32.mrf.mxu0 }
 0x1b2   : > { %2543 = vrot.lane.b32.xlu1 %v5343_v22, %s6832_s1  ;;  %v932_v5 = vadd.f32 %v4454_v32, %v5008_v61  ;;  %v5487_v32 = vld [vmem:[#allocation2 + $0x84] sm:$0xff] }
 0x1b3   : > { %v1482_v19 = vpop.permute.xlu0 %1481  ;;  %v923_v31 = vpop.f32.mrf.mxu0 }
 0x1b4   : > { %v5420_v15 = vpop.permute.xlu1 %2062  ;;  %1526 = vst.msk [vmem:[#allocation3 + $0x40] sm:$0xff] %vm1521_vm6, %v1482_v19  ;;  %v1094_v19 = vsel %vm6808_vm1, %v1018_v56, -inf  ;;  %v5506_v56 = vld [vmem:[#allocation2 + $0x80] sm:$0xff] }
 0x1b5   : > { %1866 = vrot.lane.b32.xlu0 %v5289_v4, %s6823_s29  ;;  %v4455_v45 = vpop.f32.mrf.mxu0  ;;  %v5449_v4 = vsel %vm6808_vm1, %v1006_v20, -inf  ;;  %v924_v20 = vadd.f32 %v5008_v61, %v923_v31  ;;  %v1024_v31 = vmax.f32 %v932_v5, 0.0  ;;  %v1095_v52 = vmax.f32 %v1093_v58, %v1094_v19 }
 0x1b6   : > { %2778 = vrot.lane.b32.xlu1 %v5424_v27, %s6834_s11  ;;  %v935_v29 = vadd.f32 %v4455_v45, %v5008_v61  ;;  %v1121_v30 = vmax.f32 %v5449_v4, %v5477_v10 }
 0x1b7   : > { %v5446_v46 = vpop.permute.xlu0 %2254  ;;  %v926_v3 = vpop.f32.mrf.mxu0  ;;  %v1022_v45 = vmax.f32 %v924_v20, 0.0  ;;  %v1136_v9 = vsel %vm6808_vm1, %v1024_v31, -inf }
 0x1b8   : > { %v1671_v47 = vpop.permute.xlu1 %1670  ;;  %v1025_v58 = vmax.f32 %v935_v29, 0.0 }
 0x1b9   : > { %1718 = vst.msk [vmem:[#allocation3 + $0x10] sm:$0xff] %vm1716_vm8, %v1671_v47  ;;  %2639 = vrot.lane.b32.xlu0 %v5155_v33, %s6824_s17  ;;  %v4458_v12 = vpop.f32.mrf.mxu0 }
 0x1ba   : > { %2874 = vrot.lane.b32.xlu1 %v5458_v57, %s6829_s28  ;;  %v948_v44 = vadd.f32 %v4458_v12, %v5008_v61  ;;  %v1143_v29 = vsel %vm6808_vm1, %v1025_v58, -inf }
 0x1bb   : > { %v1579_v33 = vpop.permute.xlu0 %1578  ;;  %v939_v23 = vpop.f32.mrf.mxu0  ;;  %v1144_v58 = vmax.f32 %v1142_v14, %v1143_v29 }
 0x1bc   : > { %v1768_v13 = vpop.permute.xlu1 %1767  ;;  %1623 = vst.msk [vmem:[#allocation3 + $0x40] sm:$0xff] %vm6807_vm7, %v1579_v33  ;;  %v1028_v34 = vmax.f32 %v948_v44, 0.0  ;;  %v940_v1 = vadd.f32 %v5008_v61, %v939_v23 }
 0x1bd   : > { %1815 = vst.msk [vmem:[#allocation3 + $0x10] sm:$0xff] %vm1813_vm9, %v1768_v13  ;;  %1963 = vrot.lane.b32.xlu0 %v5317_v62, %s6826_s23  ;;  %v4459_v41 = vpop.f32.mrf.mxu0  ;;  %v927_v62 = vadd.f32 %v5008_v61, %v926_v3  ;;  %v1116_v3 = vmax.f32 %v1114_v6, %v1115_v39 }
 0x1be   : > { %2970 = vrot.lane.b32.xlu1 %v5487_v32, %s6819_s26  ;;  %v1110_v47 = vsel %vm6808_vm1, %v1028_v34, -inf  ;;  %v1026_v4 = vmax.f32 %v940_v1, 0.0  ;;  %v951_v60 = vadd.f32 %v4459_v41, %v5008_v61 }
 0x1bf   : > { %v5501_v42 = vpop.permute.xlu0 %2351  ;;  %v1111_v59 = vmax.f32 %v1109_v24, %v1110_v47  ;;  %v942_v63 = vpop.f32.mrf.mxu0  ;;  %v1023_v6 = vmax.f32 %v927_v62, 0.0  ;;  %v1137_v24 = vmax.f32 %v1135_v28, %v1136_v9 }
 0x1c0   : > { %v1865_v43 = vpop.permute.xlu1 %1864  ;;  %v1096_v5 = vsel %vm6808_vm1, %v1026_v4, -inf  ;;  %v943_v10 = vadd.f32 %v5008_v61, %v942_v63  ;;  %v1029_v12 = vmax.f32 %v951_v60, 0.0 }
 0x1c1   : > { %1912 = vst.msk [vmem:[#allocation3 + $0x10] sm:$0xff] %vm1910_vm10, %v1865_v43  ;;  %2060 = vrot.lane.b32.xlu0 %v5343_v22, %s6827_s24  ;;  %v1097_v11 = vmax.f32 %v1095_v52, %v1096_v5  ;;  %v4462_v33 = vpop.f32.mrf.mxu0  ;;  %v1122_v22 = vsel %vm6808_vm1, %v1022_v45, -inf  ;;  %v1129_v45 = vsel %vm6808_vm1, %v1023_v6, -inf }
 0x1c2   : > { %1682 = vrot.lane.b32.xlu1 %v5506_v56, %s6822_s25  ;;  %1209 = vst.msk [vmem:[#allocation2 + $0x102] sm:$0xff] %vm6808_vm1, %v1111_v59  ;;  %v1027_v20 = vmax.f32 %v943_v10, 0.0  ;;  %v964_v44 = vadd.f32 %v4462_v33, %v5008_v61  ;;  %v1117_v23 = vsel %vm6808_vm1, %v1029_v12, -inf  ;;  %v1123_v52 = vmax.f32 %v1121_v30, %v1122_v22 }
 0x1c3   : > { %v5519_v13 = vpop.permute.xlu0 %2448  ;;  %1207 = vst.msk [vmem:[#allocation2 + $0xe2] sm:$0xff] %vm6808_vm1, %v1097_v11  ;;  %v955_v31 = vpop.f32.mrf.mxu0  ;;  %v1118_v61 = vmax.f32 %v1116_v3, %v1117_v23  ;;  %v1130_v3 = vmax.f32 %v1128_v38, %v1129_v45  ;;  %v5557_v11 = vld [vmem:[#allocation2 + $0x64] sm:$0xff] }
 0x1c4   : > { %v1962_v19 = vpop.permute.xlu1 %1961  ;;  %v1103_v34 = vsel %vm6808_vm1, %v1027_v20, -inf  ;;  %v1032_v1 = vmax.f32 %v964_v44, 0.0  ;;  %v956_v28 = vadd.f32 %v4636_v49, %v955_v31  ;;  %v5568_v20 = vld [vmem:[#allocation2 + $0x60] sm:$0xff] }
 0x1c5   : > { %2009 = vst.msk [vmem:[#allocation3 + $0x10] sm:$0xff] %vm2007_vm11, %v1962_v19  ;;  %3065 = vrot.lane.b32.xlu0 %v5506_v56, %s6828_s16  ;;  %v1104_v39 = vmax.f32 %v1102_v7, %v1103_v34  ;;  %v4463_v40 = vpop.f32.mrf.mxu0 }
 0x1c6   : > { %2774 = vrot.lane.b32.xlu1 %v5524_v51, %s6834_s11  ;;  %1210 = vst.msk [vmem:[#allocation2 + $0x112] sm:$0xff] %vm6808_vm1, %v1118_v61  ;;  %v1138_v62 = vsel %vm6808_vm1, %v1032_v1, -inf  ;;  %v1030_v47 = vmax.f32 %v956_v28, 0.0  ;;  %v967_v4 = vadd.f32 %v4636_v49, %v4463_v40 }
 0x1c7   : > { %v5539_v41 = vpop.permute.xlu0 %2545  ;;  %1208 = vst.msk [vmem:[#allocation2 + $0xf2] sm:$0xff] %vm6808_vm1, %v1104_v39  ;;  %v1139_v55 = vmax.f32 %v1137_v24, %v1138_v62  ;;  %v958_v30 = vpop.f32.mrf.mxu0 }
 0x1c8   : > { %v2059_v43 = vpop.permute.xlu1 %2058  ;;  %v1124_v59 = vsel %vm6808_vm1, %v1030_v47, -inf  ;;  %v1033_v60 = vmax.f32 %v967_v4, 0.0  ;;  %v959_v63 = vadd.f32 %v4636_v49, %v958_v30 }
 0x1c9   : > { %2106 = vst.msk [vmem:[#allocation3 + $0x10] sm:$0xff] %vm6809_vm12, %v2059_v43  ;;  %3161 = vrot.lane.b32.xlu0 %v5165_v35, %s6822_s25  ;;  %v1125_v9 = vmax.f32 %v1123_v52, %v1124_v59  ;;  %v5595_v61 = vld [vmem:[#allocation2 + $0x100] sm:$0xff] }
 0x1ca   : > { %2870 = vrot.lane.b32.xlu1 %v5545_v53, %s6829_s28  ;;  %1213 = vst.msk [vmem:[#allocation2 + $0x142] sm:$0xff] %vm6808_vm1, %v1139_v55  ;;  %v1145_v25 = vsel %vm6808_vm1, %v1033_v60, -inf  ;;  %v1031_v7 = vmax.f32 %v959_v63, 0.0  ;;  %v5581_v24 = vld [vmem:[#allocation2 + $0xe0] sm:$0xff]  ;;  %1243 = vst.msk [vmem:[#allocation3 + $0xc0] sm:$0xff] %vm6808_vm1, %v5595_v61  ;;  %v5664_v63 = vld [vmem:[#allocation2 + $0x90] sm:$0xff] }
 0x1cb   : > { %v1284_v10 = vpop.permute.xlu0 %1283  ;;  %1211 = vst.msk [vmem:[#allocation2 + $0x122] sm:$0xff] %vm6808_vm1, %v1125_v9  ;;  %v1146_v12 = vmax.f32 %v1144_v58, %v1145_v25  ;;  %1241 = vst.msk [vmem:[#allocation3 + $0xa0] sm:$0xff] %vm6808_vm1, %v5581_v24  ;;  %v5601_v49 = vld [vmem:[#allocation2 + $0x101] sm:$0xff] }
 0x1cc   : > { %v3060_v5 = vpop.permute.xlu1 %3059  ;;  %1330 = vst.msk [vmem:[#allocation3 + $0x20] sm:$0xff] %vm1327_vm4, %v1284_v10  ;;  %v1131_v33 = vsel %vm6808_vm1, %v1031_v7, -inf  ;;  %v5676_v10 = vld [vmem:[#allocation2 + $0x91] sm:$0xff] }
 0x1cd   : > { %3106 = vst.msk [vmem:[#allocation3 + $0x18] sm:$0xff] %vm6807_vm7, %v3060_v5  ;;  %3257 = vrot.lane.b32.xlu0 %v5424_v27, %s6833_s22  ;;  %v1132_v19 = vmax.f32 %v1130_v3, %v1131_v33  ;;  %v5605_v38 = vld [vmem:[#allocation2 + $0x110] sm:$0xff] }
 0x1ce   : > { %2966 = vrot.lane.b32.xlu1 %v5557_v11, %s6819_s26  ;;  %1214 = vst.msk [vmem:[#allocation2 + $0x152] sm:$0xff] %vm6808_vm1, %v1146_v12  ;;  %v5593_v31 = vld [vmem:[#allocation2 + $0xf1] sm:$0xff]  ;;  %2729 = vst.msk [vmem:[#allocation3 + $0x98] sm:$0xff] %vm6808_vm1, %v5601_v49 }
 0x1cf   : > { %v1381_v6 = vpop.permute.xlu0 %1380  ;;  %1212 = vst.msk [vmem:[#allocation2 + $0x132] sm:$0xff] %vm6808_vm1, %v1132_v19  ;;  %2728 = vst.msk [vmem:[#allocation3 + $0x88] sm:$0xff] %vm6808_vm1, %v5593_v31  ;;  %v5603_v28 = vld [vmem:[#allocation2 + $0xf0] sm:$0xff] }
 0x1d0   : > { %v3156_v22 = vpop.permute.xlu1 %3155  ;;  %1427 = vst.msk [vmem:[#allocation3 + $0x20] sm:$0xff] %vm1424_vm5, %v1381_v6  ;;  %v5611_v52 = vld [vmem:[#allocation2 + $0x111] sm:$0xff] }
 0x1d1   : > { %3202 = vst.msk [vmem:[#allocation3 + $0x18] sm:$0xff] %vm1716_vm8, %v3156_v22  ;;  %3353 = vrot.lane.b32.xlu0 %v5458_v57, %s6823_s29  ;;  %v5591_v57 = vld [vmem:[#allocation2 + $0xa1] sm:$0xff]  ;;  %v5670_v3 = vld [vmem:[#allocation2 + $0xd0] sm:$0xff] }
 0x1d2   : > { %1678 = vrot.lane.b32.xlu1 %v5568_v20, %s6822_s25  ;;  %2727 = vst.msk [vmem:[#allocation3 + $0x78] sm:$0xff] %vm6808_vm1, %v5591_v57  ;;  %1242 = vst.msk [vmem:[#allocation3 + $0xb0] sm:$0xff] %vm6808_vm1, %v5603_v28  ;;  %v5625_v39 = vld [vmem:[#allocation2 + $0x120] sm:$0xff]  ;;  %v5685_v12 = vld [vmem:[#allocation2 + $0x92] sm:$0xff] }
 0x1d3   : > { %v2154_v14 = vpop.permute.xlu0 %2153  ;;  %1244 = vst.msk [vmem:[#allocation3 + $0xd0] sm:$0xff] %vm6808_vm1, %v5605_v38  ;;  %2730 = vst.msk [vmem:[#allocation3 + $0xa8] sm:$0xff] %vm6808_vm1, %v5611_v52  ;;  %v5627_v45 = vld [vmem:[#allocation2 + $0x121] sm:$0xff]  ;;  %v5693_v22 = vld [vmem:[#allocation2 + $0x93] sm:$0xff] }
 0x1d4   : > { %v3252_v44 = vpop.permute.xlu1 %3251  ;;  %2202 = vst.msk [vmem:[#allocation3] sm:$0xff] %vm2201_vm14, %v2154_v14  ;;  %v5647_v55 = vld [vmem:[#allocation2 + $0x141] sm:$0xff] }
 0x1d5   : > { %3298 = vst.msk [vmem:[#allocation3 + $0x18] sm:$0xff] %vm1813_vm9, %v3252_v44  ;;  %3061 = vrot.lane.b32.xlu0 %v5568_v20, %s6828_s16  ;;  %v5651_v30 = vld [vmem:[#allocation2 + $0x151] sm:$0xff] }
 0x1d6   : > { %1775 = vrot.lane.b32.xlu1 %v5169_v36, %s6833_s22  ;;  %v5629_v62 = vld [vmem:[#allocation2 + $0x130] sm:$0xff]  ;;  %1245 = vst.msk [vmem:[#allocation3 + $0xe0] sm:$0xff] %vm6808_vm1, %v5625_v39  ;;  %2731 = vst.msk [vmem:[#allocation3 + $0xb8] sm:$0xff] %vm6808_vm1, %v5627_v45 }
 0x1d7   : > { %v1478_v23 = vpop.permute.xlu0 %1477  ;;  %v5635_v47 = vld [vmem:[#allocation2 + $0x131] sm:$0xff]  ;;  %1246 = vst.msk [vmem:[#allocation3 + $0xf0] sm:$0xff] %vm6808_vm1, %v5629_v62  ;;  %2733 = vst.msk [vmem:[#allocation3 + $0xd8] sm:$0xff] %vm6808_vm1, %v5647_v55 }
 0x1d8   : > { %v3348_v29 = vpop.permute.xlu1 %3347  ;;  %1524 = vst.msk [vmem:[#allocation3 + $0x20] sm:$0xff] %vm1521_vm6, %v1478_v23  ;;  %v3124_v23 = vld [vmem:[#allocation2 + $0x71] sm:$0xff] }
 0x1d9   : > { %3394 = vst.msk [vmem:[#allocation3 + $0x18] sm:$0xff] %vm1910_vm10, %v3348_v29  ;;  %3157 = vrot.lane.b32.xlu0 %v5169_v36, %s6822_s25 }
 0x1da   : > { %1872 = vrot.lane.b32.xlu1 %v5524_v51, %s6823_s29  ;;  %2732 = vst.msk [vmem:[#allocation3 + $0xc8] sm:$0xff] %vm6808_vm1, %v5635_v47  ;;  %2734 = vst.msk [vmem:[#allocation3 + $0xe8] sm:$0xff] %vm6808_vm1, %v5651_v30 }
 0x1db   : > { %v2251_v1 = vpop.permute.xlu0 %2250  ;;  %1240 = vst.msk [vmem:[#allocation3 + $0x90] sm:$0xff] %vm6808_vm1, %v5670_v3 }
 0x1dc   : > { %v3444_v34 = vpop.permute.xlu1 %3443  ;;  %2299 = vst.msk [vmem:[#allocation3] sm:$0xff] %vm2298_vm15, %v2251_v1 }
 0x1dd   : > { %3490 = vst.msk [vmem:[#allocation3 + $0x18] sm:$0xff] %vm2007_vm11, %v3444_v34  ;;  %3253 = vrot.lane.b32.xlu0 %v5524_v51, %s6833_s22 }
 0x1de   : > { %2645 = vrot.lane.b32.xlu1 %v5568_v20, %s6824_s17 }
 0x1df   : > { %v1575_v43 = vpop.permute.xlu0 %1574 }
 0x1e0   : > { %v1290_v40 = vpop.permute.xlu1 %1289  ;;  %1621 = vst.msk [vmem:[#allocation3 + $0x20] sm:$0xff] %vm6807_vm7, %v1575_v43 }
 0x1e1   : > { %1333 = vst.msk [vmem:[#allocation3 + $0x50] sm:$0xff] %vm1327_vm4, %v1290_v40  ;;  %3349 = vrot.lane.b32.xlu0 %v5545_v53, %s6823_s29  ;;  %v5717_v40 = vld [vmem:[#allocation2 + $0x72] sm:$0xff] }
 0x1e2   : > { %1969 = vrot.lane.b32.xlu1 %v5545_v53, %s6826_s23 }
 0x1e3   : > { %v2348_v58 = vpop.permute.xlu0 %2347 }
 0x1e4   : > { %v1387_v4 = vpop.permute.xlu1 %1386  ;;  %2396 = vst.msk [vmem:[#allocation3] sm:$0xff] %vm2395_vm0, %v2348_v58 }
 0x1e5   : > { %1430 = vst.msk [vmem:[#allocation3 + $0x50] sm:$0xff] %vm1424_vm5, %v1387_v4  ;;  %3445 = vrot.lane.b32.xlu0 %v5557_v11, %s6826_s23  ;;  %v5725_v4 = vld [vmem:[#allocation2 + $0x73] sm:$0xff] }
 0x1e6   : > { %2066 = vrot.lane.b32.xlu1 %v5557_v11, %s6827_s24 }
 0x1e7   : > { %v2445_v60 = vpop.permute.xlu0 %2444 }
 0x1e8   : > { %v5661_v59 = vpop.permute.xlu1 %2159  ;;  %2493 = vst.msk [vmem:[#allocation3] sm:$0xff] %vm2492_vm2, %v2445_v60 }
 0x1e9   : > { %1291 = vrot.lane.b32.xlu0 %v5169_v36, %s6834_s11 }
 0x1ea   : > { %3067 = vrot.lane.b32.xlu1 %v5664_v63, %s6828_s16 }
 0x1eb   : > { %v2542_v5 = vpop.permute.xlu0 %2541 }
 0x1ec   : > { %v1484_v9 = vpop.permute.xlu1 %1483  ;;  %2590 = vst.msk [vmem:[#allocation3] sm:$0xff] %vm2589_vm3, %v2542_v5 }
 0x1ed   : > { %1527 = vst.msk [vmem:[#allocation3 + $0x50] sm:$0xff] %vm1521_vm6, %v1484_v9  ;;  %1388 = vrot.lane.b32.xlu0 %v5524_v51, %s6829_s28 }
 0x1ee   : > { %3163 = vrot.lane.b32.xlu1 %v5676_v10, %s6822_s25 }
 0x1ef   : > { %v2773_v7 = vpop.permute.xlu0 %2772 }
 0x1f0   : > { %v5682_v25 = vpop.permute.xlu1 %2256  ;;  %2818 = vst.msk [vmem:[#allocation3 + $0x28] sm:$0xff] %vm1327_vm4, %v2773_v7 }
 0x1f1   : > { %2161 = vrot.lane.b32.xlu0 %v5568_v20, %s6825_s27  ;;  %v5702_v20 = vld [vmem:[#allocation2 + $0x70] sm:$0xff] }
 0x1f2   : > { %3259 = vrot.lane.b32.xlu1 %v5685_v12, %s6833_s22 }
 0x1f3   : > { %v2869_v19 = vpop.permute.xlu0 %2868 }
 0x1f4   : > { %v1581_v33 = vpop.permute.xlu1 %1580  ;;  %2914 = vst.msk [vmem:[#allocation3 + $0x28] sm:$0xff] %vm1424_vm5, %v2869_v19 }
 0x1f5   : > { %1624 = vst.msk [vmem:[#allocation3 + $0x50] sm:$0xff] %vm6807_vm7, %v1581_v33  ;;  %1485 = vrot.lane.b32.xlu0 %v5545_v53, %s6819_s26 }
 0x1f6   : > { %3355 = vrot.lane.b32.xlu1 %v5693_v22, %s6823_s29 }
 0x1f7   : > { %v2965_v44 = vpop.permute.xlu0 %2964 }
 0x1f8   : > { %v5699_v6 = vpop.permute.xlu1 %2353  ;;  %3010 = vst.msk [vmem:[#allocation3 + $0x28] sm:$0xff] %vm1521_vm6, %v2965_v44 }
 0x1f9   : > { %2258 = vrot.lane.b32.xlu0 %v5169_v36, %s6820_s21 }
 0x1fa   : > { %3063 = vrot.lane.b32.xlu1 %v5702_v20, %s6828_s16 }
 0x1fb   : > { %v1677_v29 = vpop.permute.xlu0 %1676 }
 0x1fc   : > { %v5708_v14 = vpop.permute.xlu1 %2450  ;;  %1721 = vst.msk [vmem:[#allocation3 + $0x40] sm:$0xff] %vm1716_vm8, %v1677_v29 }
 0x1fd   : > { %1582 = vrot.lane.b32.xlu0 %v5557_v11, %s6828_s16 }
 0x1fe   : > { %3159 = vrot.lane.b32.xlu1 %v3124_v23, %s6822_s25 }
 0x1ff   : > { %v1774_v1 = vpop.permute.xlu0 %1773 }
 0x200   : > { %v5714_v34 = vpop.permute.xlu1 %2547  ;;  %1818 = vst.msk [vmem:[#allocation3 + $0x40] sm:$0xff] %vm1813_vm9, %v1774_v1 }
 0x201   : > { %2355 = vrot.lane.b32.xlu0 %v5524_v51, %s6830_s14  ;;  %v5734_v51 = vld [vmem:[#allocation2 + $0x74] sm:$0xff] }
 0x202   : > { %3255 = vrot.lane.b32.xlu1 %v5717_v40, %s6833_s22 }
 0x203   : > { %v1871_v43 = vpop.permute.xlu0 %1870 }
 0x204   : > { %v1286_v36 = vpop.permute.xlu1 %1285  ;;  %1915 = vst.msk [vmem:[#allocation3 + $0x40] sm:$0xff] %vm1910_vm10, %v1871_v43 }
 0x205   : > { %1331 = vst.msk [vmem:[#allocation3 + $0x30] sm:$0xff] %vm1327_vm4, %v1286_v36  ;;  %2452 = vrot.lane.b32.xlu0 %v5545_v53, %s6831_s0 }
 0x206   : > { %3351 = vrot.lane.b32.xlu1 %v5725_v4, %s6823_s29 }
 0x207   : > { %v5731_v60 = vpop.permute.xlu0 %2643 }
 0x208   : > { %v1383_v58 = vpop.permute.xlu1 %1382 }
 0x209   : > { %1428 = vst.msk [vmem:[#allocation3 + $0x30] sm:$0xff] %vm1424_vm5, %v1383_v58  ;;  %2776 = vrot.lane.b32.xlu0 %v5717_v40, %s6834_s11 }
 0x20a   : > { %3447 = vrot.lane.b32.xlu1 %v5734_v51, %s6826_s23 }
 0x20b   : > { %v1968_v5 = vpop.permute.xlu0 %1967 }
 0x20c   : > { %v2156_v9 = vpop.permute.xlu1 %2155  ;;  %2012 = vst.msk [vmem:[#allocation3 + $0x40] sm:$0xff] %vm2007_vm11, %v1968_v5  ;;  %v5891_v5 = vld [vmem:[#allocation2 + $0xa0] sm:$0xff] }
 0x20d   : > { %2203 = vst.msk [vmem:[#allocation3 + $0x10] sm:$0xff] %vm2201_vm14, %v2156_v9  ;;  %2872 = vrot.lane.b32.xlu0 %v5725_v4, %s6829_s28  ;;  %v5889_v9 = vld [vmem:[#allocation2 + $0xd1] sm:$0xff] }
 0x20e   : > { %1293 = vrot.lane.b32.xlu1 %v3124_v23, %s6834_s11 }
 0x20f   : > { %v2065_v7 = vpop.permute.xlu0 %2064 }
 0x210   : > { %v1480_v53 = vpop.permute.xlu1 %1479  ;;  %2109 = vst.msk [vmem:[#allocation3 + $0x40] sm:$0xff] %vm6809_vm12, %v2065_v7 }
 0x211   : > { %1525 = vst.msk [vmem:[#allocation3 + $0x30] sm:$0xff] %vm1521_vm6, %v1480_v53  ;;  %2968 = vrot.lane.b32.xlu0 %v5734_v51, %s6819_s26 }
 0x212   : > { %1390 = vrot.lane.b32.xlu1 %v5717_v40, %s6829_s28 }
 0x213   : > { %v2769_v19 = vpop.permute.xlu0 %2768 }
 0x214   : > { %v2253_v33 = vpop.permute.xlu1 %2252  ;;  %2816 = vst.msk [vmem:[#allocation3 + $0x8] sm:$0xff] %vm1327_vm4, %v2769_v19 }
 0x215   : > { %2300 = vst.msk [vmem:[#allocation3 + $0x10] sm:$0xff] %vm2298_vm15, %v2253_v33  ;;  %1680 = vrot.lane.b32.xlu0 %v5702_v20, %s6822_s25  ;;  %v1449_v33 = vld [vmem:[#allocation2 + $0xc3] sm:$0xff] }
 0x216   : > { %2163 = vrot.lane.b32.xlu1 %v5702_v20, %s6825_s27 }
 0x217   : > { %v2865_v29 = vpop.permute.xlu0 %2864 }
 0x218   : > { %v1577_v44 = vpop.permute.xlu1 %1576  ;;  %2912 = vst.msk [vmem:[#allocation3 + $0x8] sm:$0xff] %vm1424_vm5, %v2865_v29  ;;  %v5901_v29 = vld [vmem:[#allocation2 + $0x84] sm:$0xff] }
 0x219   : > { %1622 = vst.msk [vmem:[#allocation3 + $0x30] sm:$0xff] %vm6807_vm7, %v1577_v44  ;;  %1777 = vrot.lane.b32.xlu0 %v3124_v23, %s6833_s22 }
 0x21a   : > { %1720 = vst.msk [vmem:[#allocation3 + $0x30] sm:$0xff] %vm1716_vm8, %v5329_v17  ;;  %1487 = vrot.lane.b32.xlu1 %v5725_v4, %s6819_s26 }
 0x21b   : > { %1817 = vst.msk [vmem:[#allocation3 + $0x30] sm:$0xff] %vm1813_vm9, %v5341_v0  ;;  %v2961_v36 = vpop.permute.xlu0 %2960 }
 0x21c   : > { %1914 = vst.msk [vmem:[#allocation3 + $0x30] sm:$0xff] %vm1910_vm10, %v5355_v26  ;;  %v2350_v1 = vpop.permute.xlu1 %2349  ;;  %v3508_v26 = vld [vmem:[#allocation3 + $0x18] sm:$0xff] }
 0x21d   : > { %2011 = vst.msk [vmem:[#allocation3 + $0x30] sm:$0xff] %vm2007_vm11, %v5392_v48  ;;  %2549 = vrot.lane.b32.xlu0 %v5557_v11, %s6832_s1 }
 0x21e   : > { %2397 = vst.msk [vmem:[#allocation3 + $0x10] sm:$0xff] %vm2395_vm0, %v2350_v1  ;;  %2260 = vrot.lane.b32.xlu1 %v3124_v23, %s6820_s21  ;;  %v1255_v23 = vld [vmem:[#allocation2 + $0xc1] sm:$0xff] }
 0x21f   : > { %3008 = vst.msk [vmem:[#allocation3 + $0x8] sm:$0xff] %vm1521_vm6, %v2961_v36  ;;  %v1673_v0 = vpop.permute.xlu0 %1672  ;;  %v5906_v1 = vld [vmem:[#allocation2 + $0xa4] sm:$0xff] }
 0x220   : > { %2108 = vst.msk [vmem:[#allocation3 + $0x30] sm:$0xff] %vm6809_vm12, %v5420_v15  ;;  %v2447_v17 = vpop.permute.xlu1 %2446 }
 0x221   : > { %3105 = vst.msk [vmem:[#allocation3 + $0x8] sm:$0xff] %vm6807_vm7, %v5286_v2  ;;  %3449 = vrot.lane.b32.xlu0 %v5487_v32, %s6826_s23  ;;  %vm3660_vm7 = vcmask 588800   ;;  %v1223_v32 = vld [vmem:[#allocation2 + $0xc0] sm:$0xff] }
 0x222   : > { %2205 = vst.msk [vmem:[#allocation3 + $0x30] sm:$0xff] %vm2201_vm14, %v5661_v59  ;;  %1584 = vrot.lane.b32.xlu1 %v5734_v51, %s6828_s16 }
 0x223   : > { %3201 = vst.msk [vmem:[#allocation3 + $0x8] sm:$0xff] %vm1716_vm8, %v5303_v8  ;;  %1719 = vst.msk [vmem:[#allocation3 + $0x20] sm:$0xff] %vm1716_vm8, %v1673_v0  ;;  %v1770_v8 = vpop.permute.xlu0 %1769  ;;  %v2224_v0 = vld [vmem:[#allocation2 + $0x81] sm:$0xff] }
 0x224   : > { %2302 = vst.msk [vmem:[#allocation3 + $0x30] sm:$0xff] %vm2298_vm15, %v5682_v25  ;;  %v2544_v2 = vpop.permute.xlu1 %2543 }
 0x225   : > { %3297 = vst.msk [vmem:[#allocation3 + $0x8] sm:$0xff] %vm1813_vm9, %v5314_v50  ;;  %1816 = vst.msk [vmem:[#allocation3 + $0x20] sm:$0xff] %vm1813_vm9, %v1770_v8  ;;  %1874 = vrot.lane.b32.xlu0 %v5717_v40, %s6823_s29 }
 0x226   : > { %2399 = vst.msk [vmem:[#allocation3 + $0x30] sm:$0xff] %vm2395_vm0, %v5699_v6  ;;  %2357 = vrot.lane.b32.xlu1 %v5717_v40, %s6830_s14 }
 0x227   : > { %3393 = vst.msk [vmem:[#allocation3 + $0x8] sm:$0xff] %vm1910_vm10, %v5327_v16  ;;  %v1867_v16 = vpop.permute.xlu0 %1866 }
 0x228   : > { %2494 = vst.msk [vmem:[#allocation3 + $0x10] sm:$0xff] %vm2492_vm2, %v2447_v17  ;;  %2496 = vst.msk [vmem:[#allocation3 + $0x30] sm:$0xff] %vm2492_vm2, %v5708_v14  ;;  %v2779_v50 = vpop.permute.xlu1 %2778 }
 0x229   : > { %3489 = vst.msk [vmem:[#allocation3 + $0x8] sm:$0xff] %vm2007_vm11, %v5339_v21  ;;  %2647 = vrot.lane.b32.xlu0 %v5702_v20, %s6824_s17 }
 0x22a   : > { %2593 = vst.msk [vmem:[#allocation3 + $0x30] sm:$0xff] %vm2589_vm3, %v5714_v34  ;;  %2591 = vst.msk [vmem:[#allocation3 + $0x10] sm:$0xff] %vm2589_vm3, %v2544_v2  ;;  %2454 = vrot.lane.b32.xlu1 %v5725_v4, %s6831_s0  ;;  %v5913_v2 = vld [vmem:[#allocation2 + $0xd2] sm:$0xff] }
 0x22b   : > { %2689 = vst.msk [vmem:[#allocation3 + $0x10] sm:$0xff] %vm2687_vm13, %v5372_v37  ;;  %v2640_v15 = vpop.permute.xlu0 %2639 }
 0x22c   : > { %2821 = vst.msk [vmem:[#allocation3 + $0x58] sm:$0xff] %vm1327_vm4, %v2779_v50  ;;  %v2875_v48 = vpop.permute.xlu1 %2874 }
 0x22d   : > { %1913 = vst.msk [vmem:[#allocation3 + $0x20] sm:$0xff] %vm1910_vm10, %v1867_v16  ;;  %2780 = vrot.lane.b32.xlu0 %v5685_v12, %s6834_s11  ;;  %v5834_v12 = vld [vmem:[#allocation2 + $0x94] sm:$0xff]  ;;  %v1546_v16 = vld [vmem:[#allocation2 + $0xc4] sm:$0xff] }
 0x22e   : > { %2917 = vst.msk [vmem:[#allocation3 + $0x58] sm:$0xff] %vm1424_vm5, %v2875_v48  ;;  %1779 = vrot.lane.b32.xlu1 %v5165_v35, %s6833_s22 }
 0x22f   : > { %2688 = vst.msk [vmem:[#allocation3] sm:$0xff] %vm2687_vm13, %v2640_v15  ;;  %v1964_v59 = vpop.permute.xlu0 %1963 }
 0x230   : > { %v3506_v21 = vld [vmem:[#allocation3 + $0x8] sm:$0xff]  ;;  %1239 = vst.msk [vmem:[#allocation3 + $0x80] sm:$0xff] %vm6808_vm1, %v1223_v32  ;;  %v2971_v11 = vpop.permute.xlu1 %2970  ;;  %vm6835_vm1 = vcmask 326912   ;;  %v5930_v32 = vld [vmem:[#allocation2 + $0xd3] sm:$0xff] }
 0x231   : > { %v3538_v37 = vpack.c.bf16 %v3508_v26, %v3506_v21  ;;  %3013 = vst.msk [vmem:[#allocation3 + $0x58] sm:$0xff] %vm1521_vm6, %v2971_v11  ;;  %1971 = vrot.lane.b32.xlu0 %v5725_v4, %s6826_s23  ;;  %v5882_v4 = vld [vmem:[#allocation2 + $0xa3] sm:$0xff] }
 0x232   : > { %2010 = vst.msk [vmem:[#allocation3 + $0x20] sm:$0xff] %vm2007_vm11, %v1964_v59  ;;  %2551 = vrot.lane.b32.xlu1 %v5734_v51, %s6832_s1  ;;  %v3507_v20 = vld [vmem:[#allocation3 + $0x10] sm:$0xff] }
 0x233   : > { %4306 = vmatprep.mubr.msk.bf16.mxu1 %vm3660_vm7, %v3538_v37  ;;  %v2061_v35 = vpop.permute.xlu0 %2060  ;;  %v3032_v37 = vld [vmem:[#allocation2 + $0xb0] sm:$0xff] }
 0x234   : > { %v5831_v25 = vpop.permute.xlu1 %1682  ;;  %2107 = vst.msk [vmem:[#allocation3 + $0x20] sm:$0xff] %vm6809_vm12, %v2061_v35 }
 0x235   : > { %2204 = vst.msk [vmem:[#allocation3 + $0x20] sm:$0xff] %vm2201_vm14, %v5394_v54  ;;  %2876 = vrot.lane.b32.xlu0 %v5693_v22, %s6829_s28 }
 0x236   : > { %v3505_v6 = vld [vmem:[#allocation3] sm:$0xff]  ;;  %3451 = vrot.lane.b32.xlu1 %v5834_v12, %s6826_s23  ;;  %2301 = vst.msk [vmem:[#allocation3 + $0x20] sm:$0xff] %vm2298_vm15, %v5446_v46 }
 0x237   : > { %v3537_v14 = vpack.c.bf16 %v3507_v20, %v3505_v6  ;;  %2398 = vst.msk [vmem:[#allocation3 + $0x20] sm:$0xff] %vm2395_vm0, %v5501_v42  ;;  %v5846_v40 = vpop.permute.xlu0 %3065  ;;  %v5865_v42 = vld [vmem:[#allocation2 + $0xa2] sm:$0xff]  ;;  %v3128_v6 = vld [vmem:[#allocation2 + $0xb1] sm:$0xff] }
 0x238   : > { %v2775_v34 = vpop.permute.xlu1 %2774  ;;  %2495 = vst.msk [vmem:[#allocation3 + $0x20] sm:$0xff] %vm2492_vm2, %v5519_v13 }
 0x239   : > { %3722 = vmatmul.mubr.bf16.vlgmr.msra.gmra.mxu1 %v3537_v14  ;;  %2819 = vst.msk [vmem:[#allocation3 + $0x38] sm:$0xff] %vm1327_vm4, %v2775_v34  ;;  %1295 = vrot.lane.b32.xlu0 %v1255_v23, %s6834_s11  ;;  %v5949_v23 = vld [vmem:[#allocation2 + $0xd4] sm:$0xff] }
 0x23a   : > { %2592 = vst.msk [vmem:[#allocation3 + $0x20] sm:$0xff] %vm2589_vm3, %v5539_v41  ;;  %1876 = vrot.lane.b32.xlu1 %v5424_v27, %s6823_s29  ;;  %v1352_v41 = vld [vmem:[#allocation2 + $0xc2] sm:$0xff] }
 0x23b   : > { %2690 = vst.msk [vmem:[#allocation3 + $0x20] sm:$0xff] %vm2687_vm13, %v5731_v60  ;;  %v5858_v46 = vpop.permute.xlu0 %3161 }
 0x23c   : > { %v2871_v54 = vpop.permute.xlu1 %2870 }
 0x23d   : > { %2915 = vst.msk [vmem:[#allocation3 + $0x38] sm:$0xff] %vm1424_vm5, %v2871_v54  ;;  %2068 = vrot.lane.b32.xlu0 %v5734_v51, %s6827_s24  ;;  %v2127_v51 = vld [vmem:[#allocation2 + $0x80] sm:$0xff] }
 0x23e   : > { %2649 = vrot.lane.b32.xlu1 %v5506_v56, %s6824_s17  ;;  %v5877_v56 = vld [vmem:[#allocation2 + $0x83] sm:$0xff] }
 0x23f   : > { %v5867_v27 = vpop.permute.xlu0 %3257 }
 0x240   : > { %v2967_v13 = vpop.permute.xlu1 %2966 }
 0x241   : > { %3011 = vst.msk [vmem:[#allocation3 + $0x38] sm:$0xff] %vm1521_vm6, %v2967_v13  ;;  %2972 = vrot.lane.b32.xlu0 %v5834_v12, %s6819_s26  ;;  %v3224_v13 = vld [vmem:[#allocation2 + $0xb2] sm:$0xff] }
 0x242   : > { %2782 = vrot.lane.b32.xlu1 %v5865_v42, %s6834_s11 }
 0x243   : > { %v5874_v43 = vpop.permute.xlu0 %3353 }
 0x244   : > { %v1679_v22 = vpop.permute.xlu1 %1678 }
 0x245   : > { %1722 = vst.msk [vmem:[#allocation3 + $0x50] sm:$0xff] %vm1716_vm8, %v1679_v22  ;;  %1392 = vrot.lane.b32.xlu0 %v1352_v41, %s6829_s28 }
 0x246   : > { %1973 = vrot.lane.b32.xlu1 %v5877_v56, %s6826_s23 }
 0x247   : > { %v3062_v60 = vpop.permute.xlu0 %3061 }
 0x248   : > { %v1776_v58 = vpop.permute.xlu1 %1775  ;;  %3107 = vst.msk [vmem:[#allocation3 + $0x28] sm:$0xff] %vm6835_vm1, %v3062_v60 }
 0x249   : > { %1819 = vst.msk [vmem:[#allocation3 + $0x50] sm:$0xff] %vm1813_vm9, %v1776_v58  ;;  %2165 = vrot.lane.b32.xlu0 %v2127_v51, %s6825_s27  ;;  %v2419_v51 = vld [vmem:[#allocation2 + $0x93] sm:$0xff] }
 0x24a   : > { %2878 = vrot.lane.b32.xlu1 %v5882_v4, %s6829_s28 }
 0x24b   : > { %v3158_v7 = vpop.permute.xlu0 %3157 }
 0x24c   : > { %v1873_v53 = vpop.permute.xlu1 %1872  ;;  %3203 = vst.msk [vmem:[#allocation3 + $0x28] sm:$0xff] %vm1716_vm8, %v3158_v7 }
 0x24d   : > { %1916 = vst.msk [vmem:[#allocation3 + $0x50] sm:$0xff] %vm1910_vm10, %v1873_v53  ;;  %3069 = vrot.lane.b32.xlu0 %v5891_v5, %s6828_s16 }
 0x24e   : > { %1297 = vrot.lane.b32.xlu1 %v5889_v9, %s6834_s11 }
 0x24f   : > { %v3254_v44 = vpop.permute.xlu0 %3253 }
 0x250   : > { %v2646_v19 = vpop.permute.xlu1 %2645  ;;  %3299 = vst.msk [vmem:[#allocation3 + $0x28] sm:$0xff] %vm1813_vm9, %v3254_v44 }
 0x251   : > { %2691 = vst.msk [vmem:[#allocation3 + $0x30] sm:$0xff] %vm2687_vm13, %v2646_v19  ;;  %1489 = vrot.lane.b32.xlu0 %v1449_v33, %s6819_s26 }
 0x252   : > { %2070 = vrot.lane.b32.xlu1 %v5901_v29, %s6827_s24 }
 0x253   : > { %v3350_v17 = vpop.permute.xlu0 %3349 }
 0x254   : > { %v1970_v36 = vpop.permute.xlu1 %1969  ;;  %3395 = vst.msk [vmem:[#allocation3 + $0x28] sm:$0xff] %vm1910_vm10, %v3350_v17 }
 0x255   : > { %2013 = vst.msk [vmem:[#allocation3 + $0x50] sm:$0xff] %vm2007_vm11, %v1970_v36  ;;  %2262 = vrot.lane.b32.xlu0 %v2224_v0, %s6820_s21  ;;  %v3509_v36 = vld [vmem:[#allocation3 + $0x20] sm:$0xff] }
 0x256   : > { %2974 = vrot.lane.b32.xlu1 %v5906_v1, %s6819_s26 }
 0x257   : > { %v3446_v50 = vpop.permute.xlu0 %3445 }
 0x258   : > { %v2067_v8 = vpop.permute.xlu1 %2066  ;;  %3491 = vst.msk [vmem:[#allocation3 + $0x28] sm:$0xff] %vm2007_vm11, %v3446_v50  ;;  %v3511_v53 = vld [vmem:[#allocation3 + $0x30] sm:$0xff] }
 0x259   : > { %2110 = vst.msk [vmem:[#allocation3 + $0x50] sm:$0xff] %vm6809_vm12, %v2067_v8  ;;  %3165 = vrot.lane.b32.xlu0 %v5591_v57, %s6822_s25  ;;  %v2321_v57 = vld [vmem:[#allocation2 + $0x82] sm:$0xff]  ;;  %vm6836_vm12 = vmmov %vm6835_vm1  ;;  %v3539_v17 = vpack.c.bf16 %v3511_v53, %v3509_v36  ;;  %v5995_v8 = vld [vmem:[#allocation2 + $0xf2] sm:$0xff] }
 0x25a   : > { %1394 = vrot.lane.b32.xlu1 %v5913_v2, %s6829_s28 }
 0x25b   : > { %v1292_v26 = vpop.permute.xlu0 %1291 }
 0x25c   : > { %v3068_v21 = vpop.permute.xlu1 %3067  ;;  %1334 = vst.msk [vmem:[#allocation3 + $0x60] sm:$0xff] %vm1327_vm4, %v1292_v26 }
 0x25d   : > { %3110 = vst.msk [vmem:[#allocation3 + $0x58] sm:$0xff] %vm6835_vm1, %v3068_v21  ;;  %1586 = vrot.lane.b32.xlu0 %v1546_v16, %s6828_s16  ;;  %v6009_v21 = vld [vmem:[#allocation2 + $0xf3] sm:$0xff] }
 0x25e   : > { %2167 = vrot.lane.b32.xlu1 %v5664_v63, %s6825_s27 }
 0x25f   : > { %v1389_v15 = vpop.permute.xlu0 %1388  ;;  %v3510_v19 = vld [vmem:[#allocation3 + $0x28] sm:$0xff] }
 0x260   : > { %v3164_v48 = vpop.permute.xlu1 %3163  ;;  %1431 = vst.msk [vmem:[#allocation3 + $0x60] sm:$0xff] %vm1424_vm5, %v1389_v15 }
 0x261   : > { %3206 = vst.msk [vmem:[#allocation3 + $0x58] sm:$0xff] %vm1716_vm8, %v3164_v48  ;;  %2359 = vrot.lane.b32.xlu0 %v2321_v57, %s6830_s14 }
 0x262   : > { %3071 = vrot.lane.b32.xlu1 %v3032_v37, %s6828_s16 }
 0x263   : > { %v2162_v59 = vpop.permute.xlu0 %2161 }
 0x264   : > { %v3260_v11 = vpop.permute.xlu1 %3259  ;;  %2206 = vst.msk [vmem:[#allocation3 + $0x40] sm:$0xff] %vm2201_vm14, %v2162_v59 }
 0x265   : > { %3302 = vst.msk [vmem:[#allocation3 + $0x58] sm:$0xff] %vm1813_vm9, %v3260_v11  ;;  %3261 = vrot.lane.b32.xlu0 %v5865_v42, %s6833_s22  ;;  %v2322_v42 = vld [vmem:[#allocation2 + $0x92] sm:$0xff] }
 0x266   : > { %1491 = vrot.lane.b32.xlu1 %v5930_v32, %s6819_s26  ;;  %v6034_v11 = vld [vmem:[#allocation2 + $0xf4] sm:$0xff] }
 0x267   : > { %v1486_v35 = vpop.permute.xlu0 %1485 }
 0x268   : > { %v3356_v63 = vpop.permute.xlu1 %3355  ;;  %1528 = vst.msk [vmem:[#allocation3 + $0x60] sm:$0xff] %vm1521_vm6, %v1486_v35 }
 0x269   : > { %3398 = vst.msk [vmem:[#allocation3 + $0x58] sm:$0xff] %vm1910_vm10, %v3356_v63  ;;  %1684 = vrot.lane.b32.xlu0 %v5670_v3, %s6822_s25  ;;  %v6042_v63 = vld [vmem:[#allocation2 + $0xe3] sm:$0xff] }
 0x26a   : > { %2264 = vrot.lane.b32.xlu1 %v5676_v10, %s6820_s21 }
 0x26b   : > { %v2259_v14 = vpop.permute.xlu0 %2258 }
 0x26c   : > { %v3064_v20 = vpop.permute.xlu1 %3063  ;;  %2303 = vst.msk [vmem:[#allocation3 + $0x40] sm:$0xff] %vm2298_vm15, %v2259_v14 }
 0x26d   : > { %3108 = vst.msk [vmem:[#allocation3 + $0x38] sm:$0xff] %vm6835_vm1, %v3064_v20  ;;  %2456 = vrot.lane.b32.xlu0 %v5877_v56, %s6831_s0  ;;  %v6050_v20 = vld [vmem:[#allocation2 + $0x103] sm:$0xff] }
 0x26e   : > { %3167 = vrot.lane.b32.xlu1 %v3128_v6, %s6822_s25 }
 0x26f   : > { %v1583_v54 = vpop.permute.xlu0 %1582 }
 0x270   : > { %v3160_v34 = vpop.permute.xlu1 %3159  ;;  %1625 = vst.msk [vmem:[#allocation3 + $0x60] sm:$0xff] %vm6836_vm12, %v1583_v54  ;;  %vm6837_vm12 = vmmov %vm6835_vm1 }
 0x271   : > { %3204 = vst.msk [vmem:[#allocation3 + $0x38] sm:$0xff] %vm1716_vm8, %v3160_v34  ;;  %3357 = vrot.lane.b32.xlu0 %v5882_v4, %s6823_s29 }
 0x272   : > { %1588 = vrot.lane.b32.xlu1 %v5949_v23, %s6828_s16 }
 0x273   : > { %v2356_v10 = vpop.permute.xlu0 %2355 }
 0x274   : > { %v3256_v3 = vpop.permute.xlu1 %3255  ;;  %2400 = vst.msk [vmem:[#allocation3 + $0x40] sm:$0xff] %vm2395_vm0, %v2356_v10 }
 0x275   : > { %3300 = vst.msk [vmem:[#allocation3 + $0x38] sm:$0xff] %vm1813_vm9, %v3256_v3  ;;  %1781 = vrot.lane.b32.xlu0 %v5889_v9, %s6833_s22  ;;  %v3320_v9 = vld [vmem:[#allocation2 + $0xb3] sm:$0xff]  ;;  %v6064_v3 = vld [vmem:[#allocation2 + $0xe4] sm:$0xff] }
 0x276   : > { %2361 = vrot.lane.b32.xlu1 %v2322_v42, %s6830_s14 }
 0x277   : > { %v2453_v22 = vpop.permute.xlu0 %2452 }
 0x278   : > { %v3352_v41 = vpop.permute.xlu1 %3351  ;;  %2497 = vst.msk [vmem:[#allocation3 + $0x40] sm:$0xff] %vm2492_vm2, %v2453_v22 }
 0x279   : > { %3396 = vst.msk [vmem:[#allocation3 + $0x38] sm:$0xff] %vm1910_vm10, %v3352_v41  ;;  %2553 = vrot.lane.b32.xlu0 %v5901_v29, %s6832_s1  ;;  %v2613_v29 = vld [vmem:[#allocation2 + $0x90] sm:$0xff]  ;;  %v6072_v41 = vld [vmem:[#allocation2 + $0x104] sm:$0xff] }
 0x27a   : > { %3263 = vrot.lane.b32.xlu1 %v3224_v13, %s6833_s22 }
 0x27b   : > { %v2777_v4 = vpop.permute.xlu0 %2776 }
 0x27c   : > { %v3448_v56 = vpop.permute.xlu1 %3447  ;;  %2820 = vst.msk [vmem:[#allocation3 + $0x48] sm:$0xff] %vm1327_vm4, %v2777_v4 }
 0x27d   : > { %3492 = vst.msk [vmem:[#allocation3 + $0x38] sm:$0xff] %vm2007_vm11, %v3448_v56  ;;  %3453 = vrot.lane.b32.xlu0 %v5906_v1, %s6826_s23 }
 0x27e   : > { %1686 = vrot.lane.b32.xlu1 %v5581_v24, %s6822_s25 }
 0x27f   : > { %v2873_v60 = vpop.permute.xlu0 %2872 }
 0x280   : > { %v1294_v58 = vpop.permute.xlu1 %1293  ;;  %2916 = vst.msk [vmem:[#allocation3 + $0x48] sm:$0xff] %vm1424_vm5, %v2873_v60 }
 0x281   : > { %1335 = vst.msk [vmem:[#allocation3 + $0x70] sm:$0xff] %vm1327_vm4, %v1294_v58  ;;  %1878 = vrot.lane.b32.xlu0 %v5913_v2, %s6823_s29 }
 0x282   : > { %2458 = vrot.lane.b32.xlu1 %v2419_v51, %s6831_s0 }
 0x283   : > { %v2969_v33 = vpop.permute.xlu0 %2968 }
 0x284   : > { %v1391_v7 = vpop.permute.xlu1 %1390  ;;  %v3512_v44 = vld [vmem:[#allocation3 + $0x38] sm:$0xff]  ;;  %3012 = vst.msk [vmem:[#allocation3 + $0x48] sm:$0xff] %vm1521_vm6, %v2969_v33 }
 0x285   : > { %1432 = vst.msk [vmem:[#allocation3 + $0x70] sm:$0xff] %vm1424_vm5, %v1391_v7  ;;  %v3540_v1 = vpack.c.bf16 %v3512_v44, %v3510_v19  ;;  %2651 = vrot.lane.b32.xlu0 %v2613_v29, %s6824_s17 }
 0x286   : > { %3109 = vst.msk [vmem:[#allocation3 + $0x48] sm:$0xff] %vm6837_vm12, %v5846_v40  ;;  %3359 = vrot.lane.b32.xlu1 %v3320_v9, %s6823_s29  ;;  %v5993_v40 = vld [vmem:[#allocation2 + $0xe1] sm:$0xff]  ;;  %vm6838_vm12 = vcmask 654912  }
 0x287   : > { %3205 = vst.msk [vmem:[#allocation3 + $0x48] sm:$0xff] %vm1716_vm8, %v5858_v46  ;;  %4307 = vmatprep.mubr.msk.bf16.mxu1 %vm3660_vm7, %v3540_v1  ;;  %v1681_v2 = vpop.permute.xlu0 %1680 }
 0x288   : > { %3301 = vst.msk [vmem:[#allocation3 + $0x48] sm:$0xff] %vm1813_vm9, %v5867_v27  ;;  %v2164_v0 = vpop.permute.xlu1 %2163  ;;  %3730 = vmatmul.mubr.bf16.gmra.mxu1 %v3539_v17 }
 0x289   : > { %3397 = vst.msk [vmem:[#allocation3 + $0x48] sm:$0xff] %vm1910_vm10, %v5874_v43  ;;  %2784 = vrot.lane.b32.xlu0 %v5995_v8, %s6834_s11  ;;  %v3416_v43 = vld [vmem:[#allocation2 + $0xb4] sm:$0xff] }
 0x28a   : > { %2207 = vst.msk [vmem:[#allocation3 + $0x50] sm:$0xff] %vm2201_vm14, %v2164_v0  ;;  %1783 = vrot.lane.b32.xlu1 %v5993_v40, %s6833_s22 }
 0x28b   : > { %1723 = vst.msk [vmem:[#allocation3 + $0x60] sm:$0xff] %vm1716_vm8, %v1681_v2  ;;  %v1778_v27 = vpop.permute.xlu0 %1777 }
 0x28c   : > { %v1488_v46 = vpop.permute.xlu1 %1487  ;;  %1820 = vst.msk [vmem:[#allocation3 + $0x60] sm:$0xff] %vm1813_vm9, %v1778_v27 }
 0x28d   : > { %1529 = vst.msk [vmem:[#allocation3 + $0x70] sm:$0xff] %vm1521_vm6, %v1488_v46  ;;  %1975 = vrot.lane.b32.xlu0 %v5930_v32, %s6826_s23  ;;  %v6032_v32 = vld [vmem:[#allocation2 + $0x102] sm:$0xff] }
 0x28e   : > { %2555 = vrot.lane.b32.xlu1 %v5834_v12, %s6832_s1  ;;  %v6016_v12 = vld [vmem:[#allocation2 + $0xe2] sm:$0xff] }
 0x28f   : > { %v2550_v16 = vpop.permute.xlu0 %2549 }
 0x290   : > { %v2261_v50 = vpop.permute.xlu1 %2260  ;;  %2594 = vst.msk [vmem:[#allocation3 + $0x40] sm:$0xff] %vm2589_vm3, %v2550_v16 }
 0x291   : > { %2304 = vst.msk [vmem:[#allocation3 + $0x50] sm:$0xff] %vm2298_vm15, %v2261_v50  ;;  %2880 = vrot.lane.b32.xlu0 %v6009_v21, %s6829_s28  ;;  %v6129_v50 = vld [vmem:[#allocation2 + $0x112] sm:$0xff] }
 0x292   : > { %3455 = vrot.lane.b32.xlu1 %v3416_v43, %s6826_s23 }
 0x293   : > { %v3450_v37 = vpop.permute.xlu0 %3449 }
 0x294   : > { %v1585_v26 = vpop.permute.xlu1 %1584  ;;  %3493 = vst.msk [vmem:[#allocation3 + $0x48] sm:$0xff] %vm2007_vm11, %v3450_v37 }
 0x295   : > { %1626 = vst.msk [vmem:[#allocation3 + $0x70] sm:$0xff] %vm6835_vm1, %v1585_v26  ;;  %1299 = vrot.lane.b32.xlu0 %v5993_v40, %s6834_s11 }
 0x296   : > { %1724 = vst.msk [vmem:[#allocation3 + $0x70] sm:$0xff] %vm1716_vm8, %v5831_v25  ;;  %1880 = vrot.lane.b32.xlu1 %v6016_v12, %s6823_s29 }
 0x297   : > { %v1875_v15 = vpop.permute.xlu0 %1874 }
 0x298   : > { %v2358_v48 = vpop.permute.xlu1 %2357  ;;  %1917 = vst.msk [vmem:[#allocation3 + $0x60] sm:$0xff] %vm1910_vm10, %v1875_v15  ;;  %v6149_v15 = vld [vmem:[#allocation2 + $0x113] sm:$0xff] }
 0x299   : > { %2401 = vst.msk [vmem:[#allocation3 + $0x50] sm:$0xff] %vm2395_vm0, %v2358_v48  ;;  %2072 = vrot.lane.b32.xlu0 %v5949_v23, %s6827_s24 }
 0x29a   : > { %2653 = vrot.lane.b32.xlu1 %v5891_v5, %s6824_s17 }
 0x29b   : > { %v2648_v25 = vpop.permute.xlu0 %2647  ;;  %v3514_v42 = vld [vmem:[#allocation3 + $0x48] sm:$0xff] }
 0x29c   : > { %v2455_v57 = vpop.permute.xlu1 %2454  ;;  %2692 = vst.msk [vmem:[#allocation3 + $0x40] sm:$0xff] %vm2687_vm13, %v2648_v25 }
 0x29d   : > { %2498 = vst.msk [vmem:[#allocation3 + $0x50] sm:$0xff] %vm2492_vm2, %v2455_v57  ;;  %2976 = vrot.lane.b32.xlu0 %v6034_v11, %s6819_s26 }
 0x29e   : > { %2786 = vrot.lane.b32.xlu1 %v6032_v32, %s6834_s11 }
 0x29f   : > { %v2781_v59 = vpop.permute.xlu0 %2780 }
 0x2a0   : > { %v1780_v5 = vpop.permute.xlu1 %1779  ;;  %2822 = vst.msk [vmem:[#allocation3 + $0x68] sm:$0xff] %vm1327_vm4, %v2781_v59 }
 0x2a1   : > { %1821 = vst.msk [vmem:[#allocation3 + $0x70] sm:$0xff] %vm1813_vm9, %v1780_v5  ;;  %1396 = vrot.lane.b32.xlu0 %v6016_v12, %s6829_s28 }
 0x2a2   : > { %1977 = vrot.lane.b32.xlu1 %v6042_v63, %s6826_s23 }
 0x2a3   : > { %v1972_v6 = vpop.permute.xlu0 %1971  ;;  %v3513_v51 = vld [vmem:[#allocation3 + $0x40] sm:$0xff] }
 0x2a4   : > { %v2552_v35 = vpop.permute.xlu1 %2551  ;;  %2014 = vst.msk [vmem:[#allocation3 + $0x60] sm:$0xff] %vm2007_vm11, %v1972_v6 }
 0x2a5   : > { %2595 = vst.msk [vmem:[#allocation3 + $0x50] sm:$0xff] %vm2589_vm3, %v2552_v35  ;;  %2169 = vrot.lane.b32.xlu0 %v5581_v24, %s6825_s27 }
 0x2a6   : > { %2882 = vrot.lane.b32.xlu1 %v6050_v20, %s6829_s28 }
 0x2a7   : > { %v2877_v23 = vpop.permute.xlu0 %2876 }
 0x2a8   : > { %v3452_v14 = vpop.permute.xlu1 %3451  ;;  %2918 = vst.msk [vmem:[#allocation3 + $0x68] sm:$0xff] %vm1424_vm5, %v2877_v23  ;;  %v6190_v23 = vld [vmem:[%s6770_s4] ss:$0 sm:$0xff] }
 0x2a9   : > { %3494 = vst.msk [vmem:[#allocation3 + $0x58] sm:$0xff] %vm2007_vm11, %v3452_v14  ;;  %3073 = vrot.lane.b32.xlu0 %v5595_v61, %s6828_s16 }
 0x2aa   : > { %1301 = vrot.lane.b32.xlu1 %v5593_v31, %s6834_s11 }
 0x2ab   : > { %v1296_v54 = vpop.permute.xlu0 %1295 }
 0x2ac   : > { %v1877_v34 = vpop.permute.xlu1 %1876  ;;  %1336 = vst.msk [vmem:[#allocation3 + $0x80] sm:$0xff] %vm1327_vm4, %v1296_v54 }
 0x2ad   : > { %1918 = vst.msk [vmem:[#allocation3 + $0x70] sm:$0xff] %vm1910_vm10, %v1877_v34  ;;  %1493 = vrot.lane.b32.xlu0 %v6042_v63, %s6819_s26 }
 0x2ae   : > { %2074 = vrot.lane.b32.xlu1 %v6064_v3, %s6827_s24 }
 0x2af   : > { %v2069_v10 = vpop.permute.xlu0 %2068 }
 0x2b0   : > { %v2650_v24 = vpop.permute.xlu1 %2649  ;;  %v3516_v13 = vld [vmem:[#allocation3 + $0x58] sm:$0xff]  ;;  %2111 = vst.msk [vmem:[#allocation3 + $0x60] sm:$0xff] %vm6838_vm12, %v2069_v10  ;;  %v6194_v10 = vld [vmem:[#allocation2 + $0x122] sm:$0xff] }
 0x2b1   : > { %2693 = vst.msk [vmem:[#allocation3 + $0x50] sm:$0xff] %vm2687_vm13, %v2650_v24  ;;  %v3542_v22 = vpack.c.bf16 %v3516_v13, %v3514_v42  ;;  %2266 = vrot.lane.b32.xlu0 %v5993_v40, %s6820_s21 }
 0x2b2   : > { %2978 = vrot.lane.b32.xlu1 %v6072_v41, %s6819_s26 }
 0x2b3   : > { %4308 = vmatprep.mubr.msk.bf16.mxu1 %vm3660_vm7, %v3542_v22  ;;  %v2973_v4 = vpop.permute.xlu0 %2972 }
 0x2b4   : > { %v2783_v56 = vpop.permute.xlu1 %2782  ;;  %3014 = vst.msk [vmem:[#allocation3 + $0x68] sm:$0xff] %vm1521_vm6, %v2973_v4 }
 0x2b5   : > { %2823 = vst.msk [vmem:[#allocation3 + $0x78] sm:$0xff] %vm1327_vm4, %v2783_v56  ;;  %3169 = vrot.lane.b32.xlu0 %v5601_v49, %s6822_s25 }
 0x2b6   : > { %1398 = vrot.lane.b32.xlu1 %v5995_v8, %s6829_s28 }
 0x2b7   : > { %v1393_v60 = vpop.permute.xlu0 %1392 }
 0x2b8   : > { %v1974_v58 = vpop.permute.xlu1 %1973  ;;  %v3515_v9 = vld [vmem:[#allocation3 + $0x50] sm:$0xff]  ;;  %1433 = vst.msk [vmem:[#allocation3 + $0x80] sm:$0xff] %vm1424_vm5, %v1393_v60 }
 0x2b9   : > { %2015 = vst.msk [vmem:[#allocation3 + $0x70] sm:$0xff] %vm2007_vm11, %v1974_v58  ;;  %v3541_v53 = vpack.c.bf16 %v3515_v9, %v3513_v51  ;;  %1590 = vrot.lane.b32.xlu0 %v6064_v3, %s6828_s16 }
 0x2ba   : > { %2171 = vrot.lane.b32.xlu1 %v5603_v28, %s6825_s27 }
 0x2bb   : > { %3738 = vmatmul.mubr.bf16.gmra.mxu1 %v3541_v53  ;;  %v2166_v33 = vpop.permute.xlu0 %2165 }
 0x2bc   : > { %v2879_v7 = vpop.permute.xlu1 %2878  ;;  %2208 = vst.msk [vmem:[#allocation3 + $0x60] sm:$0xff] %vm2201_vm14, %v2166_v33 }
 0x2bd   : > { %2919 = vst.msk [vmem:[#allocation3 + $0x78] sm:$0xff] %vm1424_vm5, %v2879_v7  ;;  %2363 = vrot.lane.b32.xlu0 %v6016_v12, %s6830_s14  ;;  %v6212_v7 = vld [vmem:[#allocation2 + $0x123] sm:$0xff] }
 0x2be   : > { %3075 = vrot.lane.b32.xlu1 %v5605_v38, %s6828_s16 }
 0x2bf   : > { %v3070_v44 = vpop.permute.xlu0 %3069 }
 0x2c0   : > { %v1298_v19 = vpop.permute.xlu1 %1297  ;;  %3111 = vst.msk [vmem:[#allocation3 + $0x68] sm:$0xff] %vm6835_vm1, %v3070_v44 }
 0x2c1   : > { %1337 = vst.msk [vmem:[#allocation3 + $0x90] sm:$0xff] %vm1327_vm4, %v1298_v19  ;;  %3265 = vrot.lane.b32.xlu0 %v6032_v32, %s6833_s22 }
 0x2c2   : > { %1495 = vrot.lane.b32.xlu1 %v6009_v21, %s6819_s26 }
 0x2c3   : > { %v1490_v1 = vpop.permute.xlu0 %1489 }
 0x2c4   : > { %v2071_v29 = vpop.permute.xlu1 %2070  ;;  %1530 = vst.msk [vmem:[#allocation3 + $0x80] sm:$0xff] %vm1521_vm6, %v1490_v1 }
 0x2c5   : > { %2112 = vst.msk [vmem:[#allocation3 + $0x70] sm:$0xff] %vm6838_vm12, %v2071_v29  ;;  %1688 = vrot.lane.b32.xlu0 %v5603_v28, %s6822_s25  ;;  %vm6839_vm12 = vmmov %vm6835_vm1 }
 0x2c6   : > { %2268 = vrot.lane.b32.xlu1 %v5593_v31, %s6820_s21 }
 0x2c7   : > { %v2263_v17 = vpop.permute.xlu0 %2262 }
 0x2c8   : > { %v2975_v36 = vpop.permute.xlu1 %2974  ;;  %2305 = vst.msk [vmem:[#allocation3 + $0x60] sm:$0xff] %vm2298_vm15, %v2263_v17 }
 0x2c9   : > { %3015 = vst.msk [vmem:[#allocation3 + $0x78] sm:$0xff] %vm1521_vm6, %v2975_v36  ;;  %2460 = vrot.lane.b32.xlu0 %v6042_v63, %s6831_s0  ;;  %v6169_v63 = vld [vmem:[#allocation2 + $0x114] sm:$0xff] }
 0x2ca   : > { %3171 = vrot.lane.b32.xlu1 %v5611_v52, %s6822_s25 }
 0x2cb   : > { %v3166_v2 = vpop.permute.xlu0 %3165 }
 0x2cc   : > { %v1395_v0 = vpop.permute.xlu1 %1394  ;;  %3207 = vst.msk [vmem:[#allocation3 + $0x68] sm:$0xff] %vm1716_vm8, %v3166_v2 }
 0x2cd   : > { %1434 = vst.msk [vmem:[#allocation3 + $0x90] sm:$0xff] %vm1424_vm5, %v1395_v0  ;;  %3361 = vrot.lane.b32.xlu0 %v6050_v20, %s6823_s29  ;;  %v6232_v0 = vld [vmem:[#allocation2 + $0x124] sm:$0xff] }
 0x2ce   : > { %1592 = vrot.lane.b32.xlu1 %v6034_v11, %s6828_s16 }
 0x2cf   : > { %v1587_v46 = vpop.permute.xlu0 %1586 }
 0x2d0   : > { %v2168_v40 = vpop.permute.xlu1 %2167  ;;  %1627 = vst.msk [vmem:[#allocation3 + $0x80] sm:$0xff] %vm6835_vm1, %v1587_v46 }
 0x2d1   : > { %2209 = vst.msk [vmem:[#allocation3 + $0x70] sm:$0xff] %vm2201_vm14, %v2168_v40  ;;  %1785 = vrot.lane.b32.xlu0 %v5593_v31, %s6833_s22 }
 0x2d2   : > { %2365 = vrot.lane.b32.xlu1 %v5995_v8, %s6830_s14 }
 0x2d3   : > { %v2360_v43 = vpop.permute.xlu0 %2359 }
 0x2d4   : > { %v3072_v27 = vpop.permute.xlu1 %3071  ;;  %2402 = vst.msk [vmem:[#allocation3 + $0x60] sm:$0xff] %vm2395_vm0, %v2360_v43 }
 0x2d5   : > { %3112 = vst.msk [vmem:[#allocation3 + $0x78] sm:$0xff] %vm6839_vm12, %v3072_v27  ;;  %2557 = vrot.lane.b32.xlu0 %v6064_v3, %s6832_s1  ;;  %vm6840_vm12 = vcmask 654912  }
 0x2d6   : > { %3267 = vrot.lane.b32.xlu1 %v6129_v50, %s6833_s22 }
 0x2d7   : > { %v3262_v26 = vpop.permute.xlu0 %3261 }
 0x2d8   : > { %v1492_v16 = vpop.permute.xlu1 %1491  ;;  %3303 = vst.msk [vmem:[#allocation3 + $0x68] sm:$0xff] %vm1813_vm9, %v3262_v26 }
 0x2d9   : > { %1531 = vst.msk [vmem:[#allocation3 + $0x90] sm:$0xff] %vm1521_vm6, %v1492_v16  ;;  %3457 = vrot.lane.b32.xlu0 %v6072_v41, %s6826_s23 }
 0x2da   : > { %1690 = vrot.lane.b32.xlu1 %v5595_v61, %s6822_s25 }
 0x2db   : > { %v1685_v37 = vpop.permute.xlu0 %1684 }
 0x2dc   : > { %v2265_v31 = vpop.permute.xlu1 %2264  ;;  %1725 = vst.msk [vmem:[#allocation3 + $0x80] sm:$0xff] %vm1716_vm8, %v1685_v37 }
 0x2dd   : > { %2306 = vst.msk [vmem:[#allocation3 + $0x70] sm:$0xff] %vm2298_vm15, %v2265_v31  ;;  %1882 = vrot.lane.b32.xlu0 %v5995_v8, %s6823_s29 }
 0x2de   : > { %2462 = vrot.lane.b32.xlu1 %v6009_v21, %s6831_s0 }
 0x2df   : > { %v2457_v48 = vpop.permute.xlu0 %2456 }
 0x2e0   : > { %v3168_v12 = vpop.permute.xlu1 %3167  ;;  %2499 = vst.msk [vmem:[#allocation3 + $0x60] sm:$0xff] %vm2492_vm2, %v2457_v48 }
 0x2e1   : > { %3208 = vst.msk [vmem:[#allocation3 + $0x78] sm:$0xff] %vm1716_vm8, %v3168_v12  ;;  %2655 = vrot.lane.b32.xlu0 %v5603_v28, %s6824_s17 }
 0x2e2   : > { %3363 = vrot.lane.b32.xlu1 %v6149_v15, %s6823_s29 }
 0x2e3   : > { %v3358_v25 = vpop.permute.xlu0 %3357 }
 0x2e4   : > { %v1589_v57 = vpop.permute.xlu1 %1588  ;;  %3399 = vst.msk [vmem:[#allocation3 + $0x68] sm:$0xff] %vm1910_vm10, %v3358_v25 }
 0x2e5   : > { %1628 = vst.msk [vmem:[#allocation3 + $0x90] sm:$0xff] %vm6835_vm1, %v1589_v57  ;;  %2788 = vrot.lane.b32.xlu0 %v6129_v50, %s6834_s11 }
 0x2e6   : > { %1787 = vrot.lane.b32.xlu1 %v5601_v49, %s6833_s22 }
 0x2e7   : > { %v1782_v5 = vpop.permute.xlu0 %1781 }
 0x2e8   : > { %v2362_v8 = vpop.permute.xlu1 %2361  ;;  %1822 = vst.msk [vmem:[#allocation3 + $0x80] sm:$0xff] %vm1813_vm9, %v1782_v5 }
 0x2e9   : > { %2403 = vst.msk [vmem:[#allocation3 + $0x70] sm:$0xff] %vm2395_vm0, %v2362_v8  ;;  %1979 = vrot.lane.b32.xlu0 %v6009_v21, %s6826_s23 }
 0x2ea   : > { %2559 = vrot.lane.b32.xlu1 %v6034_v11, %s6832_s1 }
 0x2eb   : > { %v2554_v59 = vpop.permute.xlu0 %2553 }
 0x2ec   : > { %v3264_v28 = vpop.permute.xlu1 %3263  ;;  %2596 = vst.msk [vmem:[#allocation3 + $0x60] sm:$0xff] %vm2589_vm3, %v2554_v59 }
 0x2ed   : > { %3304 = vst.msk [vmem:[#allocation3 + $0x78] sm:$0xff] %vm1813_vm9, %v3264_v28  ;;  %2884 = vrot.lane.b32.xlu0 %v6149_v15, %s6829_s28 }
 0x2ee   : > { %3459 = vrot.lane.b32.xlu1 %v6169_v63, %s6826_s23 }
 0x2ef   : > { %v3454_v6 = vpop.permute.xlu0 %3453 }
 0x2f0   : > { %v1687_v35 = vpop.permute.xlu1 %1686  ;;  %3495 = vst.msk [vmem:[#allocation3 + $0x68] sm:$0xff] %vm2007_vm11, %v3454_v6 }
 0x2f1   : > { %1726 = vst.msk [vmem:[#allocation3 + $0x90] sm:$0xff] %vm1716_vm8, %v1687_v35  ;;  %1303 = vrot.lane.b32.xlu0 %v5601_v49, %s6834_s11 }
 0x2f2   : > { %1884 = vrot.lane.b32.xlu1 %v6032_v32, %s6823_s29 }
 0x2f3   : > { %v1879_v14 = vpop.permute.xlu0 %1878 }
 0x2f4   : > { %v2459_v21 = vpop.permute.xlu1 %2458  ;;  %1919 = vst.msk [vmem:[#allocation3 + $0x80] sm:$0xff] %vm1910_vm10, %v1879_v14 }
 0x2f5   : > { %2500 = vst.msk [vmem:[#allocation3 + $0x70] sm:$0xff] %vm2492_vm2, %v2459_v21  ;;  %2076 = vrot.lane.b32.xlu0 %v6034_v11, %s6827_s24  ;;  %v6289_v21 = vld [vmem:[#allocation2 + $0x132] sm:$0xff] }
 0x2f6   : > { %2657 = vrot.lane.b32.xlu1 %v5595_v61, %s6824_s17 }
 0x2f7   : > { %v2652_v3 = vpop.permute.xlu0 %2651 }
 0x2f8   : > { %v3360_v54 = vpop.permute.xlu1 %3359  ;;  %2694 = vst.msk [vmem:[#allocation3 + $0x60] sm:$0xff] %vm2687_vm13, %v2652_v3 }
 0x2f9   : > { %v3723_v34 = vpop.f32.mrf.mxu1  ;;  %3400 = vst.msk [vmem:[#allocation3 + $0x78] sm:$0xff] %vm1910_vm10, %v3360_v54  ;;  %2980 = vrot.lane.b32.xlu0 %v6169_v63, %s6819_s26 }
 0x2fa   : > { %v3724_v42 = vadd.f32 %v6190_v23, %v3723_v34  ;;  %2790 = vrot.lane.b32.xlu1 %v6194_v10, %s6834_s11 }
 0x2fb   : > { %v3725_v24 = vpop.f32.mrf.mxu1  ;;  %v2785_v56 = vpop.permute.xlu0 %2784 }
 0x2fc   : > { %v1784_v22 = vpop.permute.xlu1 %1783  ;;  %2824 = vst.msk [vmem:[#allocation3 + $0x88] sm:$0xff] %vm1327_vm4, %v2785_v56  ;;  %v3786_v58 = vmax.f32 %v3724_v42, 0.0  ;;  %v6309_v24 = vld [vmem:[#allocation2 + $0x133] sm:$0xff]  ;;  %v6315_v42 = vld [vmem:[#allocation2 + $0x161] sm:$0xff] }
 0x2fd   : > { %v3726_v11 = vpop.f32.mrf.mxu1  ;;  %1823 = vst.msk [vmem:[#allocation3 + $0x90] sm:$0xff] %vm1813_vm9, %v1784_v22  ;;  %1400 = vrot.lane.b32.xlu0 %v6032_v32, %s6829_s28 }
 0x2fe   : > { %v3727_v13 = vadd.f32 %v6190_v23, %v3726_v11  ;;  %1981 = vrot.lane.b32.xlu1 %v6050_v20, %s6826_s23 }
 0x2ff   : > { %v3728_v4 = vpop.f32.mrf.mxu1  ;;  %v1976_v53 = vpop.permute.xlu0 %1975  ;;  %v3517_v16 = vld [vmem:[#allocation3 + $0x60] sm:$0xff] }
 0x300   : > { %v3787_v60 = vmax.f32 %v3727_v13, 0.0  ;;  %v2556_v9 = vpop.permute.xlu1 %2555  ;;  %2016 = vst.msk [vmem:[#allocation3 + $0x80] sm:$0xff] %vm2007_vm11, %v1976_v53 }
 0x301   : > { %2597 = vst.msk [vmem:[#allocation3 + $0x70] sm:$0xff] %vm2589_vm3, %v2556_v9  ;;  %2173 = vrot.lane.b32.xlu0 %v5595_v61, %s6825_s27  ;;  %v3518_v61 = vld [vmem:[#allocation3 + $0x68] sm:$0xff] }
 0x302   : > { %v6208_v51 = vpack.c.bf16 %v3787_v60, %v3786_v58  ;;  %2886 = vrot.lane.b32.xlu1 %v6212_v7, %s6829_s28  ;;  %v6333_v58 = vld [vmem:[#allocation2 + $0x134] sm:$0xff] }
 0x303   : > { %v2881_v19 = vpop.permute.xlu0 %2880 }
 0x304   : > { %v3456_v33 = vpop.permute.xlu1 %3455  ;;  %2920 = vst.msk [vmem:[#allocation3 + $0x88] sm:$0xff] %vm1424_vm5, %v2881_v19 }
 0x305   : > { %3496 = vst.msk [vmem:[#allocation3 + $0x78] sm:$0xff] %vm2007_vm11, %v3456_v33  ;;  %3077 = vrot.lane.b32.xlu0 %v5625_v39, %s6828_s16 }
 0x306   : > { %1305 = vrot.lane.b32.xlu1 %v5611_v52, %s6834_s11 }
 0x307   : > { %v1300_v29 = vpop.permute.xlu0 %1299 }
 0x308   : > { %v1881_v44 = vpop.permute.xlu1 %1880  ;;  %1338 = vst.msk [vmem:[#allocation3 + $0xa0] sm:$0xff] %vm1327_vm4, %v1300_v29 }
 0x309   : > { %1920 = vst.msk [vmem:[#allocation3 + $0x90] sm:$0xff] %vm1910_vm10, %v1881_v44  ;;  %1497 = vrot.lane.b32.xlu0 %v6050_v20, %s6819_s26 }
 0x30a   : > { %2078 = vrot.lane.b32.xlu1 %v6072_v41, %s6827_s24 }
 0x30b   : > { %v2073_v36 = vpop.permute.xlu0 %2072 }
 0x30c   : > { %v2654_v1 = vpop.permute.xlu1 %2653  ;;  %v3520_v17 = vld [vmem:[#allocation3 + $0x78] sm:$0xff]  ;;  %2113 = vst.msk [vmem:[#allocation3 + $0x80] sm:$0xff] %vm6840_vm12, %v2073_v36 }
 0x30d   : > { %2695 = vst.msk [vmem:[#allocation3 + $0x70] sm:$0xff] %vm2687_vm13, %v2654_v1  ;;  %v3544_v2 = vpack.c.bf16 %v3520_v17, %v3518_v61  ;;  %2270 = vrot.lane.b32.xlu0 %v5601_v49, %s6820_s21 }
 0x30e   : > { %2982 = vrot.lane.b32.xlu1 %v6232_v0, %s6819_s26 }
 0x30f   : > { %4309 = vmatprep.mubr.msk.bf16.mxu1 %vm3660_vm7, %v3544_v2  ;;  %v2977_v46 = vpop.permute.xlu0 %2976 }
 0x310   : > { %v2787_v40 = vpop.permute.xlu1 %2786  ;;  %3016 = vst.msk [vmem:[#allocation3 + $0x88] sm:$0xff] %vm1521_vm6, %v2977_v46  ;;  %v6357_v46 = vld [vmem:[#allocation2 + $0x142] sm:$0xff] }
 0x311   : > { %2825 = vst.msk [vmem:[#allocation3 + $0x98] sm:$0xff] %vm1327_vm4, %v2787_v40  ;;  %3173 = vrot.lane.b32.xlu0 %v5627_v45, %s6822_s25 }
 0x312   : > { %1402 = vrot.lane.b32.xlu1 %v6129_v50, %s6829_s28 }
 0x313   : > { %v1397_v43 = vpop.permute.xlu0 %1396 }
 0x314   : > { %v1978_v27 = vpop.permute.xlu1 %1977  ;;  %v3519_v26 = vld [vmem:[#allocation3 + $0x70] sm:$0xff]  ;;  %1435 = vst.msk [vmem:[#allocation3 + $0xa0] sm:$0xff] %vm1424_vm5, %v1397_v43 }
 0x315   : > { %2017 = vst.msk [vmem:[#allocation3 + $0x90] sm:$0xff] %vm2007_vm11, %v1978_v27  ;;  %v3543_v49 = vpack.c.bf16 %v3519_v26, %v3517_v16  ;;  %1594 = vrot.lane.b32.xlu0 %v6072_v41, %s6828_s16  ;;  %v6371_v26 = vld [vmem:[#allocation2 + $0x143] sm:$0xff] }
 0x316   : > { %2175 = vrot.lane.b32.xlu1 %v5605_v38, %s6825_s27 }
 0x317   : > { %3746 = vmatmul.mubr.bf16.gmra.mxu1 %v3543_v49  ;;  %v2170_v37 = vpop.permute.xlu0 %2169 }
 0x318   : > { %v2883_v31 = vpop.permute.xlu1 %2882  ;;  %2210 = vst.msk [vmem:[#allocation3 + $0x80] sm:$0xff] %vm2201_vm14, %v2170_v37  ;;  %v6379_v37 = vld [vmem:[#allocation2 + $0x140] sm:$0xff] }
 0x319   : > { %2921 = vst.msk [vmem:[#allocation3 + $0x98] sm:$0xff] %vm1424_vm5, %v2883_v31  ;;  %2367 = vrot.lane.b32.xlu0 %v6032_v32, %s6830_s14 }
 0x31a   : > { %3079 = vrot.lane.b32.xlu1 %v5629_v62, %s6828_s16 }
 0x31b   : > { %v3074_v48 = vpop.permute.xlu0 %3073 }
 0x31c   : > { %v1302_v12 = vpop.permute.xlu1 %1301  ;;  %3113 = vst.msk [vmem:[#allocation3 + $0x88] sm:$0xff] %vm6835_vm1, %v3074_v48 }
 0x31d   : > { %1339 = vst.msk [vmem:[#allocation3 + $0xb0] sm:$0xff] %vm1327_vm4, %v1302_v12  ;;  %3269 = vrot.lane.b32.xlu0 %v6194_v10, %s6833_s22 }
 0x31e   : > { %1499 = vrot.lane.b32.xlu1 %v6149_v15, %s6819_s26 }
 0x31f   : > { %v1494_v25 = vpop.permute.xlu0 %1493 }
 0x320   : > { %v2075_v57 = vpop.permute.xlu1 %2074  ;;  %1532 = vst.msk [vmem:[#allocation3 + $0xa0] sm:$0xff] %vm1521_vm6, %v1494_v25 }
 0x321   : > { %2114 = vst.msk [vmem:[#allocation3 + $0x90] sm:$0xff] %vm6840_vm12, %v2075_v57  ;;  %1692 = vrot.lane.b32.xlu0 %v5605_v38, %s6822_s25  ;;  %vm6841_vm12 = vmmov %vm6835_vm1 }
 0x322   : > { %2272 = vrot.lane.b32.xlu1 %v5611_v52, %s6820_s21 }
 0x323   : > { %v2267_v8 = vpop.permute.xlu0 %2266 }
 0x324   : > { %v2979_v32 = vpop.permute.xlu1 %2978  ;;  %2307 = vst.msk [vmem:[#allocation3 + $0x80] sm:$0xff] %vm2298_vm15, %v2267_v8  ;;  %v6393_v8 = vld [vmem:[#allocation2 + $0x144] sm:$0xff] }
 0x325   : > { %3017 = vst.msk [vmem:[#allocation3 + $0x98] sm:$0xff] %vm1521_vm6, %v2979_v32  ;;  %2464 = vrot.lane.b32.xlu0 %v6050_v20, %s6831_s0 }
 0x326   : > { %3175 = vrot.lane.b32.xlu1 %v5635_v47, %s6822_s25 }
 0x327   : > { %v3170_v28 = vpop.permute.xlu0 %3169 }
 0x328   : > { %v1399_v5 = vpop.permute.xlu1 %1398  ;;  %3209 = vst.msk [vmem:[#allocation3 + $0x88] sm:$0xff] %vm1716_vm8, %v3170_v28 }
 0x329   : > { %1436 = vst.msk [vmem:[#allocation3 + $0xb0] sm:$0xff] %vm1424_vm5, %v1399_v5  ;;  %3365 = vrot.lane.b32.xlu0 %v6212_v7, %s6823_s29 }
 0x32a   : > { %1596 = vrot.lane.b32.xlu1 %v6169_v63, %s6828_s16 }
 0x32b   : > { %v1591_v35 = vpop.permute.xlu0 %1590 }
 0x32c   : > { %v2172_v59 = vpop.permute.xlu1 %2171  ;;  %1629 = vst.msk [vmem:[#allocation3 + $0xa0] sm:$0xff] %vm6835_vm1, %v1591_v35  ;;  %vm6842_vm1 = vcmask 64512  }
 0x32d   : > { %2211 = vst.msk [vmem:[#allocation3 + $0x90] sm:$0xff] %vm2201_vm14, %v2172_v59  ;;  %1789 = vrot.lane.b32.xlu0 %v5611_v52, %s6833_s22 }
 0x32e   : > { %2369 = vrot.lane.b32.xlu1 %v6129_v50, %s6830_s14  ;;  %2735 = vst.msk [vmem:[#allocation3 + $0xf8] sm:$0xff] %vm6842_vm1, %v6315_v42  ;;  %vm6843_vm1 = vcmask 654912  }
 0x32f   : > { %v2364_v6 = vpop.permute.xlu0 %2363 }
 0x330   : > { %v3076_v20 = vpop.permute.xlu1 %3075  ;;  %2404 = vst.msk [vmem:[#allocation3 + $0x80] sm:$0xff] %vm2395_vm0, %v2364_v6 }
 0x331   : > { %3114 = vst.msk [vmem:[#allocation3 + $0x98] sm:$0xff] %vm6841_vm12, %v3076_v20  ;;  %2561 = vrot.lane.b32.xlu0 %v6072_v41, %s6832_s1 }
 0x332   : > { %3271 = vrot.lane.b32.xlu1 %v6289_v21, %s6833_s22 }
 0x333   : > { %v3266_v34 = vpop.permute.xlu0 %3265 }
 0x334   : > { %v1496_v14 = vpop.permute.xlu1 %1495  ;;  %3305 = vst.msk [vmem:[#allocation3 + $0x88] sm:$0xff] %vm1813_vm9, %v3266_v34 }
 0x335   : > { %1533 = vst.msk [vmem:[#allocation3 + $0xb0] sm:$0xff] %vm1521_vm6, %v1496_v14  ;;  %3461 = vrot.lane.b32.xlu0 %v6232_v0, %s6826_s23 }
 0x336   : > { %1694 = vrot.lane.b32.xlu1 %v5625_v39, %s6822_s25 }
 0x337   : > { %v1689_v54 = vpop.permute.xlu0 %1688 }
 0x338   : > { %v2269_v52 = vpop.permute.xlu1 %2268  ;;  %1727 = vst.msk [vmem:[#allocation3 + $0xa0] sm:$0xff] %vm1716_vm8, %v1689_v54  ;;  %v6414_v54 = vld [vmem:[#allocation2 + $0x150] sm:$0xff] }
 0x339   : > { %2308 = vst.msk [vmem:[#allocation3 + $0x90] sm:$0xff] %vm2298_vm15, %v2269_v52  ;;  %1886 = vrot.lane.b32.xlu0 %v6129_v50, %s6823_s29 }
 0x33a   : > { %2466 = vrot.lane.b32.xlu1 %v6149_v15, %s6831_s0 }
 0x33b   : > { %v2461_v3 = vpop.permute.xlu0 %2460 }
 0x33c   : > { %v3172_v41 = vpop.permute.xlu1 %3171  ;;  %2501 = vst.msk [vmem:[#allocation3 + $0x80] sm:$0xff] %vm2492_vm2, %v2461_v3 }
 0x33d   : > { %3210 = vst.msk [vmem:[#allocation3 + $0x98] sm:$0xff] %vm1716_vm8, %v3172_v41  ;;  %2659 = vrot.lane.b32.xlu0 %v5605_v38, %s6824_s17 }
 0x33e   : > { %3367 = vrot.lane.b32.xlu1 %v6309_v24, %s6823_s29 }
 0x33f   : > { %v3362_v11 = vpop.permute.xlu0 %3361 }
 0x340   : > { %v1593_v50 = vpop.permute.xlu1 %1592  ;;  %3401 = vst.msk [vmem:[#allocation3 + $0x88] sm:$0xff] %vm1910_vm10, %v3362_v11 }
 0x341   : > { %1630 = vst.msk [vmem:[#allocation3 + $0xb0] sm:$0xff] %vm6841_vm12, %v1593_v50  ;;  %2792 = vrot.lane.b32.xlu0 %v6289_v21, %s6834_s11 }
 0x342   : > { %1791 = vrot.lane.b32.xlu1 %v5627_v45, %s6833_s22 }
 0x343   : > { %v1786_v22 = vpop.permute.xlu0 %1785 }
 0x344   : > { %v2366_v13 = vpop.permute.xlu1 %2365  ;;  %1824 = vst.msk [vmem:[#allocation3 + $0xa0] sm:$0xff] %vm1813_vm9, %v1786_v22 }
 0x345   : > { %2405 = vst.msk [vmem:[#allocation3 + $0x90] sm:$0xff] %vm2395_vm0, %v2366_v13  ;;  %1983 = vrot.lane.b32.xlu0 %v6149_v15, %s6826_s23 }
 0x346   : > { %2563 = vrot.lane.b32.xlu1 %v6169_v63, %s6832_s1 }
 0x347   : > { %v2558_v56 = vpop.permute.xlu0 %2557 }
 0x348   : > { %v3268_v38 = vpop.permute.xlu1 %3267  ;;  %2598 = vst.msk [vmem:[#allocation3 + $0x80] sm:$0xff] %vm2589_vm3, %v2558_v56  ;;  %v3731_v4 = vpop.f32.mrf.mxu1 }
 0x349   : > { %3306 = vst.msk [vmem:[#allocation3 + $0x98] sm:$0xff] %vm1813_vm9, %v3268_v38  ;;  %2888 = vrot.lane.b32.xlu0 %v6309_v24, %s6829_s28  ;;  %v3732_v9 = vadd.f32 %v6190_v23, %v3731_v4 }
 0x34a   : > { %3463 = vrot.lane.b32.xlu1 %v6333_v58, %s6826_s23  ;;  %v3733_v60 = vpop.f32.mrf.mxu1 }
 0x34b   : > { %v3458_v15 = vpop.permute.xlu0 %3457  ;;  %v3788_v29 = vmax.f32 %v3732_v9, 0.0 }
 0x34c   : > { %v1691_v53 = vpop.permute.xlu1 %1690  ;;  %3497 = vst.msk [vmem:[#allocation3 + $0x88] sm:$0xff] %vm2007_vm11, %v3458_v15  ;;  %v3734_v33 = vpop.f32.mrf.mxu1 }
 0x34d   : > { %1728 = vst.msk [vmem:[#allocation3 + $0xb0] sm:$0xff] %vm1716_vm8, %v1691_v53  ;;  %v3735_v19 = vadd.f32 %v6190_v23, %v3734_v33  ;;  %1307 = vrot.lane.b32.xlu0 %v5627_v45, %s6834_s11 }
 0x34e   : > { %1888 = vrot.lane.b32.xlu1 %v6194_v10, %s6823_s29  ;;  %v3736_v44 = vpop.f32.mrf.mxu1 }
 0x34f   : > { %v3789_v61 = vmax.f32 %v3735_v19, 0.0  ;;  %v1883_v36 = vpop.permute.xlu0 %1882 }
 0x350   : > { %v2463_v1 = vpop.permute.xlu1 %2462  ;;  %1921 = vst.msk [vmem:[#allocation3 + $0xa0] sm:$0xff] %vm1910_vm10, %v1883_v36  ;;  %v6456_v36 = vld [vmem:[#allocation2 + $0x152] sm:$0xff] }
 0x351   : > { %2502 = vst.msk [vmem:[#allocation3 + $0x90] sm:$0xff] %vm2492_vm2, %v2463_v1  ;;  %v6349_v17 = vpack.c.bf16 %v3789_v61, %v3788_v29  ;;  %2080 = vrot.lane.b32.xlu0 %v6169_v63, %s6827_s24 }
 0x352   : > { %2661 = vrot.lane.b32.xlu1 %v5625_v39, %s6824_s17 }
 0x353   : > { %v2656_v40 = vpop.permute.xlu0 %2655  ;;  %v3522_v25 = vld [vmem:[#allocation3 + $0x88] sm:$0xff] }
 0x354   : > { %v3364_v2 = vpop.permute.xlu1 %3363  ;;  %2696 = vst.msk [vmem:[#allocation3 + $0x80] sm:$0xff] %vm2687_vm13, %v2656_v40 }
 0x355   : > { %3402 = vst.msk [vmem:[#allocation3 + $0x98] sm:$0xff] %vm1910_vm10, %v3364_v2  ;;  %2984 = vrot.lane.b32.xlu0 %v6333_v58, %s6819_s26 }
 0x356   : > { %2794 = vrot.lane.b32.xlu1 %v6357_v46, %s6834_s11 }
 0x357   : > { %v2789_v43 = vpop.permute.xlu0 %2788 }
 0x358   : > { %v1788_v27 = vpop.permute.xlu1 %1787  ;;  %2826 = vst.msk [vmem:[#allocation3 + $0xa8] sm:$0xff] %vm1327_vm4, %v2789_v43 }
 0x359   : > { %1825 = vst.msk [vmem:[#allocation3 + $0xb0] sm:$0xff] %vm1813_vm9, %v1788_v27  ;;  %1404 = vrot.lane.b32.xlu0 %v6194_v10, %s6829_s28 }
 0x35a   : > { %1985 = vrot.lane.b32.xlu1 %v6212_v7, %s6826_s23 }
 0x35b   : > { %v1980_v16 = vpop.permute.xlu0 %1979  ;;  %v3521_v6 = vld [vmem:[#allocation3 + $0x80] sm:$0xff] }
 0x35c   : > { %v2560_v63 = vpop.permute.xlu1 %2559  ;;  %2018 = vst.msk [vmem:[#allocation3 + $0xa0] sm:$0xff] %vm2007_vm11, %v1980_v16 }
 0x35d   : > { %2599 = vst.msk [vmem:[#allocation3 + $0x90] sm:$0xff] %vm2589_vm3, %v2560_v63  ;;  %2177 = vrot.lane.b32.xlu0 %v5625_v39, %s6825_s27  ;;  %v6476_v63 = vld [vmem:[#allocation2 + $0x153] sm:$0xff] }
 0x35e   : > { %2890 = vrot.lane.b32.xlu1 %v6371_v26, %s6829_s28 }
 0x35f   : > { %v2885_v31 = vpop.permute.xlu0 %2884 }
 0x360   : > { %v3460_v49 = vpop.permute.xlu1 %3459  ;;  %2922 = vst.msk [vmem:[#allocation3 + $0xa8] sm:$0xff] %vm1424_vm5, %v2885_v31 }
 0x361   : > { %3498 = vst.msk [vmem:[#allocation3 + $0x98] sm:$0xff] %vm2007_vm11, %v3460_v49  ;;  %3081 = vrot.lane.b32.xlu0 %v6379_v37, %s6828_s16 }
 0x362   : > { %1309 = vrot.lane.b32.xlu1 %v5635_v47, %s6834_s11 }
 0x363   : > { %v1304_v48 = vpop.permute.xlu0 %1303 }
 0x364   : > { %v1885_v12 = vpop.permute.xlu1 %1884  ;;  %1340 = vst.msk [vmem:[#allocation3 + $0xc0] sm:$0xff] %vm1327_vm4, %v1304_v48  ;;  %v6496_v48 = vld [vmem:[#allocation2 + $0x154] sm:$0xff] }
 0x365   : > { %1922 = vst.msk [vmem:[#allocation3 + $0xb0] sm:$0xff] %vm1910_vm10, %v1885_v12  ;;  %1501 = vrot.lane.b32.xlu0 %v6212_v7, %s6819_s26 }
 0x366   : > { %2082 = vrot.lane.b32.xlu1 %v6232_v0, %s6827_s24 }
 0x367   : > { %v2077_v57 = vpop.permute.xlu0 %2076 }
 0x368   : > { %v2658_v39 = vpop.permute.xlu1 %2657  ;;  %v3524_v32 = vld [vmem:[#allocation3 + $0x98] sm:$0xff]  ;;  %2115 = vst.msk [vmem:[#allocation3 + $0xa0] sm:$0xff] %vm6843_vm1, %v2077_v57 }
 0x369   : > { %2697 = vst.msk [vmem:[#allocation3 + $0x90] sm:$0xff] %vm2687_vm13, %v2658_v39  ;;  %v3546_v5 = vpack.c.bf16 %v3524_v32, %v3522_v25  ;;  %2274 = vrot.lane.b32.xlu0 %v5627_v45, %s6820_s21  ;;  %v2751_v32 = vld [vmem:[#allocation2 + $0x162] sm:$0xff] }
 0x36a   : > { %2986 = vrot.lane.b32.xlu1 %v6393_v8, %s6819_s26 }
 0x36b   : > { %4310 = vmatprep.mubr.msk.bf16.mxu1 %vm3660_vm7, %v3546_v5  ;;  %v2981_v59 = vpop.permute.xlu0 %2980 }
 0x36c   : > { %v2791_v28 = vpop.permute.xlu1 %2790  ;;  %3018 = vst.msk [vmem:[#allocation3 + $0xa8] sm:$0xff] %vm1521_vm6, %v2981_v59 }
 0x36d   : > { %2827 = vst.msk [vmem:[#allocation3 + $0xb8] sm:$0xff] %vm1327_vm4, %v2791_v28  ;;  %3177 = vrot.lane.b32.xlu0 %v5647_v55, %s6822_s25 }
 0x36e   : > { %1406 = vrot.lane.b32.xlu1 %v6289_v21, %s6829_s28 }
 0x36f   : > { %v1401_v20 = vpop.permute.xlu0 %1400 }
 0x370   : > { %v1982_v35 = vpop.permute.xlu1 %1981  ;;  %v3523_v14 = vld [vmem:[#allocation3 + $0x90] sm:$0xff]  ;;  %1437 = vst.msk [vmem:[#allocation3 + $0xc0] sm:$0xff] %vm1424_vm5, %v1401_v20  ;;  %v2847_v20 = vld [vmem:[#allocation2 + $0x163] sm:$0xff] }
 0x371   : > { %2019 = vst.msk [vmem:[#allocation3 + $0xb0] sm:$0xff] %vm2007_vm11, %v1982_v35  ;;  %v3545_v45 = vpack.c.bf16 %v3523_v14, %v3521_v6  ;;  %1598 = vrot.lane.b32.xlu0 %v6232_v0, %s6828_s16 }
 0x372   : > { %2179 = vrot.lane.b32.xlu1 %v5629_v62, %s6825_s27 }
 0x373   : > { %3754 = vmatmul.mubr.bf16.gmra.mxu1 %v3545_v45  ;;  %v2174_v52 = vpop.permute.xlu0 %2173 }
 0x374   : > { %v2887_v34 = vpop.permute.xlu1 %2886  ;;  %2212 = vst.msk [vmem:[#allocation3 + $0xa0] sm:$0xff] %vm2201_vm14, %v2174_v52 }
 0x375   : > { %2923 = vst.msk [vmem:[#allocation3 + $0xb8] sm:$0xff] %vm1424_vm5, %v2887_v34  ;;  %2371 = vrot.lane.b32.xlu0 %v6194_v10, %s6830_s14  ;;  %v2943_v34 = vld [vmem:[#allocation2 + $0x164] sm:$0xff] }
 0x376   : > { %3083 = vrot.lane.b32.xlu1 %v6414_v54, %s6828_s16 }
 0x377   : > { %v3078_v3 = vpop.permute.xlu0 %3077 }
 0x378   : > { %v1306_v41 = vpop.permute.xlu1 %1305  ;;  %3115 = vst.msk [vmem:[#allocation3 + $0xa8] sm:$0xff] %vm6841_vm12, %v3078_v3 }
 0x379   : > { %1341 = vst.msk [vmem:[#allocation3 + $0xd0] sm:$0xff] %vm1327_vm4, %v1306_v41  ;;  %3273 = vrot.lane.b32.xlu0 %v6357_v46, %s6833_s22 }
 0x37a   : > { %1503 = vrot.lane.b32.xlu1 %v6309_v24, %s6819_s26 }
 0x37b   : > { %v3739_v50 = vpop.f32.mrf.mxu1  ;;  %v1498_v13 = vpop.permute.xlu0 %1497 }
 0x37c   : > { %v2079_v11 = vpop.permute.xlu1 %2078  ;;  %1534 = vst.msk [vmem:[#allocation3 + $0xc0] sm:$0xff] %vm1521_vm6, %v1498_v13  ;;  %v3740_v22 = vadd.f32 %v6190_v23, %v3739_v50  ;;  %v3040_v13 = vld [vmem:[#allocation2 + $0x170] sm:$0xff] }
 0x37d   : > { %2116 = vst.msk [vmem:[#allocation3 + $0xb0] sm:$0xff] %vm6843_vm1, %v2079_v11  ;;  %v3741_v10 = vpop.f32.mrf.mxu1  ;;  %1696 = vrot.lane.b32.xlu0 %v5629_v62, %s6822_s25  ;;  %vm6844_vm1 = vmmov %vm6841_vm12 }
 0x37e   : > { %2276 = vrot.lane.b32.xlu1 %v5635_v47, %s6820_s21  ;;  %v3790_v53 = vmax.f32 %v3740_v22, 0.0 }
 0x37f   : > { %v3742_v38 = vpop.f32.mrf.mxu1  ;;  %v2271_v60 = vpop.permute.xlu0 %2270 }
 0x380   : > { %v3743_v56 = vadd.f32 %v6190_v23, %v3742_v38  ;;  %v2983_v4 = vpop.permute.xlu1 %2982  ;;  %2309 = vst.msk [vmem:[#allocation3 + $0xa0] sm:$0xff] %vm2298_vm15, %v2271_v60 }
 0x381   : > { %3019 = vst.msk [vmem:[#allocation3 + $0xb8] sm:$0xff] %vm1521_vm6, %v2983_v4  ;;  %v3744_v9 = vpop.f32.mrf.mxu1  ;;  %2468 = vrot.lane.b32.xlu0 %v6212_v7, %s6831_s0 }
 0x382   : > { %v3791_v15 = vmax.f32 %v3743_v56, 0.0  ;;  %3179 = vrot.lane.b32.xlu1 %v5651_v30, %s6822_s25  ;;  %v3136_v9 = vld [vmem:[#allocation2 + $0x171] sm:$0xff] }
 0x383   : > { %v3174_v44 = vpop.permute.xlu0 %3173 }
 0x384   : > { %v6440_v33 = vpack.c.bf16 %v3791_v15, %v3790_v53  ;;  %v1403_v19 = vpop.permute.xlu1 %1402  ;;  %3211 = vst.msk [vmem:[#allocation3 + $0xa8] sm:$0xff] %vm1716_vm8, %v3174_v44  ;;  %v4621_v44 = vld [vmem:[%s6771_s5 + $0x30] sm:$0xff]  }
 0x385   : > { %1438 = vst.msk [vmem:[#allocation3 + $0xd0] sm:$0xff] %vm1424_vm5, %v1403_v19  ;;  %3369 = vrot.lane.b32.xlu0 %v6371_v26, %s6823_s29 }
 0x386   : > { %1600 = vrot.lane.b32.xlu1 %v6333_v58, %s6828_s16 }
 0x387   : > { %v1595_v61 = vpop.permute.xlu0 %1594 }
 0x388   : > { %v2176_v29 = vpop.permute.xlu1 %2175  ;;  %1631 = vst.msk [vmem:[#allocation3 + $0xc0] sm:$0xff] %vm6841_vm12, %v1595_v61  ;;  %vm6845_vm12 = vmmov %vm6844_vm1  ;;  %v3232_v61 = vld [vmem:[#allocation2 + $0x172] sm:$0xff] }
 0x389   : > { %2213 = vst.msk [vmem:[#allocation3 + $0xb0] sm:$0xff] %vm2201_vm14, %v2176_v29  ;;  %1793 = vrot.lane.b32.xlu0 %v5635_v47, %s6833_s22 }
 0x38a   : > { %2373 = vrot.lane.b32.xlu1 %v6289_v21, %s6830_s14 }
 0x38b   : > { %v2368_v1 = vpop.permute.xlu0 %2367 }
 0x38c   : > { %v3080_v7 = vpop.permute.xlu1 %3079  ;;  %2406 = vst.msk [vmem:[#allocation3 + $0xa0] sm:$0xff] %vm2395_vm0, %v2368_v1 }
 0x38d   : > { %3116 = vst.msk [vmem:[#allocation3 + $0xb8] sm:$0xff] %vm6844_vm1, %v3080_v7  ;;  %2565 = vrot.lane.b32.xlu0 %v6232_v0, %s6832_s1  ;;  %vm6846_vm1 = vcmask 654912  }
 0x38e   : > { %3275 = vrot.lane.b32.xlu1 %v6456_v36, %s6833_s22 }
 0x38f   : > { %v3270_v40 = vpop.permute.xlu0 %3269 }
 0x390   : > { %v1500_v2 = vpop.permute.xlu1 %1499  ;;  %3307 = vst.msk [vmem:[#allocation3 + $0xa8] sm:$0xff] %vm1813_vm9, %v3270_v40 }
 0x391   : > { %1535 = vst.msk [vmem:[#allocation3 + $0xd0] sm:$0xff] %vm1521_vm6, %v1500_v2  ;;  %3465 = vrot.lane.b32.xlu0 %v6393_v8, %s6826_s23  ;;  %v4622_v2 = vld [vmem:[%s6771_s5 + $0x28] sm:$0xff]  }
 0x392   : > { %1698 = vrot.lane.b32.xlu1 %v6379_v37, %s6822_s25 }
 0x393   : > { %v1693_v27 = vpop.permute.xlu0 %1692 }
 0x394   : > { %v2273_v47 = vpop.permute.xlu1 %2272  ;;  %1729 = vst.msk [vmem:[#allocation3 + $0xc0] sm:$0xff] %vm1716_vm8, %v1693_v27 }
 0x395   : > { %2310 = vst.msk [vmem:[#allocation3 + $0xb0] sm:$0xff] %vm2298_vm15, %v2273_v47  ;;  %1890 = vrot.lane.b32.xlu0 %v6289_v21, %s6823_s29 }
 0x396   : > { %2470 = vrot.lane.b32.xlu1 %v6309_v24, %s6831_s0 }
 0x397   : > { %v2465_v43 = vpop.permute.xlu0 %2464 }
 0x398   : > { %v3176_v0 = vpop.permute.xlu1 %3175  ;;  %2503 = vst.msk [vmem:[#allocation3 + $0xa0] sm:$0xff] %vm2492_vm2, %v2465_v43 }
 0x399   : > { %3212 = vst.msk [vmem:[#allocation3 + $0xb8] sm:$0xff] %vm1716_vm8, %v3176_v0  ;;  %2663 = vrot.lane.b32.xlu0 %v5629_v62, %s6824_s17 }
 0x39a   : > { %3371 = vrot.lane.b32.xlu1 %v6476_v63, %s6823_s29 }
 0x39b   : > { %v3366_v49 = vpop.permute.xlu0 %3365 }
 0x39c   : > { %v1597_v16 = vpop.permute.xlu1 %1596  ;;  %3403 = vst.msk [vmem:[#allocation3 + $0xa8] sm:$0xff] %vm1910_vm10, %v3366_v49 }
 0x39d   : > { %1632 = vst.msk [vmem:[#allocation3 + $0xd0] sm:$0xff] %vm6845_vm12, %v1597_v16  ;;  %2796 = vrot.lane.b32.xlu0 %v6456_v36, %s6834_s11  ;;  %v4623_v16 = vld [vmem:[%s6771_s5 + $0x20] sm:$0xff]  }
 0x39e   : > { %1795 = vrot.lane.b32.xlu1 %v5647_v55, %s6833_s22 }
 0x39f   : > { %v1790_v31 = vpop.permute.xlu0 %1789 }
 0x3a0   : > { %v2370_v21 = vpop.permute.xlu1 %2369  ;;  %1826 = vst.msk [vmem:[#allocation3 + $0xc0] sm:$0xff] %vm1813_vm9, %v1790_v31 }
 0x3a1   : > { %2407 = vst.msk [vmem:[#allocation3 + $0xb0] sm:$0xff] %vm2395_vm0, %v2370_v21  ;;  %1987 = vrot.lane.b32.xlu0 %v6309_v24, %s6826_s23 }
 0x3a2   : > { %2567 = vrot.lane.b32.xlu1 %v6333_v58, %s6832_s1 }
 0x3a3   : > { %v2562_v12 = vpop.permute.xlu0 %2561 }
 0x3a4   : > { %v3272_v62 = vpop.permute.xlu1 %3271  ;;  %2600 = vst.msk [vmem:[#allocation3 + $0xa0] sm:$0xff] %vm2589_vm3, %v2562_v12  ;;  %v4624_v12 = vld [vmem:[%s6771_s5 + $0x18] sm:$0xff]  }
 0x3a5   : > { %3308 = vst.msk [vmem:[#allocation3 + $0xb8] sm:$0xff] %vm1813_vm9, %v3272_v62  ;;  %2892 = vrot.lane.b32.xlu0 %v6476_v63, %s6829_s28 }
 0x3a6   : > { %3467 = vrot.lane.b32.xlu1 %v6496_v48, %s6826_s23 }
 0x3a7   : > { %v3462_v57 = vpop.permute.xlu0 %3461 }
 0x3a8   : > { %v1695_v39 = vpop.permute.xlu1 %1694  ;;  %3499 = vst.msk [vmem:[#allocation3 + $0xa8] sm:$0xff] %vm2007_vm11, %v3462_v57  ;;  %v3424_v57 = vld [vmem:[#allocation2 + $0x174] sm:$0xff] }
 0x3a9   : > { %1730 = vst.msk [vmem:[#allocation3 + $0xd0] sm:$0xff] %vm1716_vm8, %v1695_v39  ;;  %2084 = vrot.lane.b32.xlu0 %v6333_v58, %s6827_s24  ;;  %v6519_v58 = vld [vmem:[#allocation2 + $0x160] sm:$0xff] }
 0x3aa   : > { %1892 = vrot.lane.b32.xlu1 %v6357_v46, %s6823_s29 }
 0x3ab   : > { %v1887_v25 = vpop.permute.xlu0 %1886 }
 0x3ac   : > { %v2467_v24 = vpop.permute.xlu1 %2466  ;;  %1923 = vst.msk [vmem:[#allocation3 + $0xc0] sm:$0xff] %vm1910_vm10, %v1887_v25 }
 0x3ad   : > { %2504 = vst.msk [vmem:[#allocation3 + $0xb0] sm:$0xff] %vm2492_vm2, %v2467_v24  ;;  %2988 = vrot.lane.b32.xlu0 %v6496_v48, %s6819_s26  ;;  %v4625_v24 = vld [vmem:[%s6771_s5 + $0x10] sm:$0xff]  }
 0x3ae   : > { %2665 = vrot.lane.b32.xlu1 %v6379_v37, %s6824_s17 }
 0x3af   : > { %v2660_v28 = vpop.permute.xlu0 %2659  ;;  %v3526_v50 = vld [vmem:[#allocation3 + $0xa8] sm:$0xff] }
 0x3b0   : > { %v3368_v5 = vpop.permute.xlu1 %3367  ;;  %2698 = vst.msk [vmem:[#allocation3 + $0xa0] sm:$0xff] %vm2687_vm13, %v2660_v28 }
 0x3b1   : > { %3404 = vst.msk [vmem:[#allocation3 + $0xb8] sm:$0xff] %vm1910_vm10, %v3368_v5  ;;  %2181 = vrot.lane.b32.xlu0 %v6379_v37, %s6825_s27  ;;  %v4626_v5 = vld [vmem:[%s6771_s5 + $0x8] sm:$0xff]  }
 0x3b2   : > { %2798 = vrot.lane.b32.xlu1 %v2751_v32, %s6834_s11 }
 0x3b3   : > { %v2793_v35 = vpop.permute.xlu0 %2792 }
 0x3b4   : > { %v1792_v59 = vpop.permute.xlu1 %1791  ;;  %2828 = vst.msk [vmem:[#allocation3 + $0xc8] sm:$0xff] %vm1327_vm4, %v2793_v35 }
 0x3b5   : > { %1827 = vst.msk [vmem:[#allocation3 + $0xd0] sm:$0xff] %vm1813_vm9, %v1792_v59  ;;  %3085 = vrot.lane.b32.xlu0 %v6519_v58, %s6828_s16  ;;  %v4627_v59 = vld [vmem:[%s6771_s5] sm:$0xff]  }
 0x3b6   : > { %1989 = vrot.lane.b32.xlu1 %v6371_v26, %s6826_s23 }
 0x3b7   : > { %v1984_v14 = vpop.permute.xlu0 %1983  ;;  %v3525_v56 = vld [vmem:[#allocation3 + $0xa0] sm:$0xff] }
 0x3b8   : > { %v2564_v6 = vpop.permute.xlu1 %2563  ;;  %2020 = vst.msk [vmem:[#allocation3 + $0xc0] sm:$0xff] %vm2007_vm11, %v1984_v14 }
 0x3b9   : > { %2601 = vst.msk [vmem:[#allocation3 + $0xb0] sm:$0xff] %vm2589_vm3, %v2564_v6  ;;  %2278 = vrot.lane.b32.xlu0 %v5647_v55, %s6820_s21 }
 0x3ba   : > { %2894 = vrot.lane.b32.xlu1 %v2847_v20, %s6829_s28 }
 0x3bb   : > { %v2889_v45 = vpop.permute.xlu0 %2888 }
 0x3bc   : > { %v3464_v37 = vpop.permute.xlu1 %3463  ;;  %2924 = vst.msk [vmem:[#allocation3 + $0xc8] sm:$0xff] %vm1424_vm5, %v2889_v45 }
 0x3bd   : > { %3500 = vst.msk [vmem:[#allocation3 + $0xb8] sm:$0xff] %vm2007_vm11, %v3464_v37  ;;  %3181 = vrot.lane.b32.xlu0 %v6315_v42, %s6822_s25 }
 0x3be   : > { %2086 = vrot.lane.b32.xlu1 %v6393_v8, %s6827_s24 }
 0x3bf   : > { %v1308_v41 = vpop.permute.xlu0 %1307 }
 0x3c0   : > { %v1889_v52 = vpop.permute.xlu1 %1888  ;;  %1342 = vst.msk [vmem:[#allocation3 + $0xe0] sm:$0xff] %vm1327_vm4, %v1308_v41 }
 0x3c1   : > { %1924 = vst.msk [vmem:[#allocation3 + $0xd0] sm:$0xff] %vm1910_vm10, %v1889_v52  ;;  %2375 = vrot.lane.b32.xlu0 %v6357_v46, %s6830_s14 }
 0x3c2   : > { %2990 = vrot.lane.b32.xlu1 %v2943_v34, %s6819_s26 }
 0x3c3   : > { %v2081_v3 = vpop.permute.xlu0 %2080 }
 0x3c4   : > { %v2662_v55 = vpop.permute.xlu1 %2661  ;;  %v3528_v11 = vld [vmem:[#allocation3 + $0xb8] sm:$0xff]  ;;  %2117 = vst.msk [vmem:[#allocation3 + $0xc0] sm:$0xff] %vm6846_vm1, %v2081_v3 }
 0x3c5   : > { %2699 = vst.msk [vmem:[#allocation3 + $0xb0] sm:$0xff] %vm2687_vm13, %v2662_v55  ;;  %v3548_v42 = vpack.c.bf16 %v3528_v11, %v3526_v50  ;;  %3277 = vrot.lane.b32.xlu0 %v2751_v32, %s6833_s22 }
 0x3c6   : > { %2183 = vrot.lane.b32.xlu1 %v6414_v54, %s6825_s27 }
 0x3c7   : > { %4311 = vmatprep.mubr.msk.bf16.mxu1 %vm3660_vm7, %v3548_v42  ;;  %v2985_v22 = vpop.permute.xlu0 %2984 }
 0x3c8   : > { %v2795_v10 = vpop.permute.xlu1 %2794  ;;  %3020 = vst.msk [vmem:[#allocation3 + $0xc8] sm:$0xff] %vm1521_vm6, %v2985_v22 }
 0x3c9   : > { %2829 = vst.msk [vmem:[#allocation3 + $0xd8] sm:$0xff] %vm1327_vm4, %v2795_v10  ;;  %2472 = vrot.lane.b32.xlu0 %v6371_v26, %s6831_s0  ;;  %v4620_v26 = vld [vmem:[%s6771_s5 + $0x38] sm:$0xff]  }
 0x3ca   : > { %3087 = vrot.lane.b32.xlu1 %v3040_v13, %s6828_s16  ;;  %4464 = vmatprep.subr.bf16.mxu1 %v4620_v26 }
 0x3cb   : > { %v1405_v38 = vpop.permute.xlu0 %1404  ;;  %4465 = vmatpush3.bf16.msra.mxu1 %v4620_v26 }
 0x3cc   : > { %v1986_v46 = vpop.permute.xlu1 %1985  ;;  %v3527_v4 = vld [vmem:[#allocation3 + $0xb0] sm:$0xff]  ;;  %1439 = vst.msk [vmem:[#allocation3 + $0xe0] sm:$0xff] %vm1424_vm5, %v1405_v38  ;;  %4466 = vmatprep.subr.bf16.mxu1 %v4621_v44 }
 0x3cd   : > { %2021 = vst.msk [vmem:[#allocation3 + $0xd0] sm:$0xff] %vm2007_vm11, %v1986_v46  ;;  %v3547_v60 = vpack.c.bf16 %v3527_v4, %v3525_v56  ;;  %3373 = vrot.lane.b32.xlu0 %v2847_v20, %s6823_s29 }
 0x3ce   : > { %2280 = vrot.lane.b32.xlu1 %v5651_v30, %s6820_s21  ;;  %s326_s21 = sand.u32 1, %s4690_s10  }
 0x3cf   : > { %3762 = vmatmul.mubr.bf16.gmra.mxu1 %v3547_v60  ;;  %v2178_v15 = vpop.permute.xlu0 %2177  ;;  %s4221_s24 = sshll.u32 %s326_s21, 1 }
 0x3d0   : > { %v2891_v53 = vpop.permute.xlu1 %2890  ;;  %2214 = vst.msk [vmem:[#allocation3 + $0xc0] sm:$0xff] %vm2201_vm14, %v2178_v15  ;;  %4467 = vmatpush3.bf16.msra.mxu1 %v4621_v44  ;;  %s328_s28 = scalar_lea.vmem [#allocation4], %s4221_s24 }
 0x3d1   : > { %2925 = vst.msk [vmem:[#allocation3 + $0xd8] sm:$0xff] %vm1424_vm5, %v2891_v53  ;;  %2569 = vrot.lane.b32.xlu0 %v6393_v8, %s6832_s1  ;;  %4468 = vmatprep.subr.bf16.mxu1 %v4622_v2 }
 0x3d2   : > { %3183 = vrot.lane.b32.xlu1 %v3136_v9, %s6822_s25 }
 0x3d3   : > { %v3082_v19 = vpop.permute.xlu0 %3081 }
 0x3d4   : > { %v1310_v30 = vpop.permute.xlu1 %1309  ;;  %3117 = vst.msk [vmem:[#allocation3 + $0xc8] sm:$0xff] %vm6845_vm12, %v3082_v19  ;;  %4469 = vmatpush3.bf16.msra.mxu1 %v4622_v2 }
 0x3d5   : > { %1343 = vst.msk [vmem:[#allocation3 + $0xf0] sm:$0xff] %vm1327_vm4, %v1310_v30  ;;  %3469 = vrot.lane.b32.xlu0 %v2943_v34, %s6826_s23  ;;  %4470 = vmatprep.subr.bf16.mxu1 %v4623_v16 }
 0x3d6   : > { %2377 = vrot.lane.b32.xlu1 %v6456_v36, %s6830_s14  ;;  %s4333_s14 = sshll.u32 %s4790_s13, 5  ;;  %s4718_s13 = smov [#allocation4]  }
 0x3d7   : > { %v3747_v29 = vpop.f32.mrf.mxu1  ;;  %v1502_v7 = vpop.permute.xlu0 %1501  ;;  %s6725_s3 = scalar_lea.hbm %s6775_s9, %s4333_s14 }
 0x3d8   : > { %v2083_v8 = vpop.permute.xlu1 %2082  ;;  %1536 = vst.msk [vmem:[#allocation3 + $0xe0] sm:$0xff] %vm1521_vm6, %v1502_v7  ;;  %v3748_v40 = vadd.f32 %v6190_v23, %v3747_v29  ;;  %4471 = vmatpush3.bf16.msra.mxu1 %v4623_v16 }
 0x3d9   : > { %2118 = vst.msk [vmem:[#allocation3 + $0xd0] sm:$0xff] %vm6846_vm1, %v2083_v8  ;;  %v3749_v1 = vpop.f32.mrf.mxu1  ;;  %2667 = vrot.lane.b32.xlu0 %v6414_v54, %s6824_s17  ;;  %v3328_v54 = vld [vmem:[#allocation2 + $0x173] sm:$0xff]  ;;  %4472 = vmatprep.subr.bf16.mxu1 %v4624_v12  ;;  %vm6847_vm1 = vmmov %vm6845_vm12 }
 0x3da   : > { %3279 = vrot.lane.b32.xlu1 %v3232_v61, %s6833_s22  ;;  %v3792_v49 = vmax.f32 %v3748_v40, 0.0  ;;  %s4158_s22 = sshll.u32 %s328_s28, 4  ;;  %s6727_s22 = int_to_ptr.vmem [resolvable:$true] %s4158_s22 }
 0x3db   : > { %v3750_v36 = vpop.f32.mrf.mxu1  ;;  %v2275_v0 = vpop.permute.xlu0 %2274  ;;  %s4638_s18 = scalar_lea.vmem %s6727_s22, 32 }
 0x3dc   : > { %v3751_v47 = vadd.f32 %v6190_v23, %v3750_v36  ;;  %v2987_v27 = vpop.permute.xlu1 %2986  ;;  %2311 = vst.msk [vmem:[#allocation3 + $0xc0] sm:$0xff] %vm2298_vm15, %v2275_v0  ;;  %4473 = vmatpush3.bf16.msra.mxu1 %v4624_v12  ;;  %p4639_p11 = scmp.ne.s32.totalorder %s6727_s22, %s4638_s18 }
 0x3dd   : > { %3021 = vst.msk [vmem:[#allocation3 + $0xd8] sm:$0xff] %vm1521_vm6, %v2987_v27  ;;  %v3752_v43 = vpop.f32.mrf.mxu1  ;;  %4474 = vmatprep.subr.bf16.mxu1 %v4625_v24 }
 0x3de   : > { %v3793_v21 = vmax.f32 %v3751_v47, 0.0  ;;  %2474 = vrot.lane.b32.xlu1 %v6476_v63, %s6831_s0  ;;  %p4640_p12 = pnand %p4639_p11, %p4807_p5 }
 0x3df   : > { %v3178_v62 = vpop.permute.xlu0 %3177 }
 0x3e0   : > { %v6592_v23 = vpack.c.bf16 %v3793_v21, %v3792_v49  ;;  %v1407_v31 = vpop.permute.xlu1 %1406  ;;  %3213 = vst.msk [vmem:[#allocation3 + $0xc8] sm:$0xff] %vm1716_vm8, %v3178_v62  ;;  %4475 = vmatpush3.bf16.msra.mxu1 %v4625_v24  ;;  %p4641_p13 = pneg %p4640_p12 }
 0x3e1   : > { %1440 = vst.msk [vmem:[#allocation3 + $0xf0] sm:$0xff] %vm1424_vm5, %v1407_v31  ;;  %4476 = vmatprep.subr.bf16.mxu1 %v4626_v5 }
 0x3e2   : > { %3375 = vrot.lane.b32.xlu1 %v3328_v54, %s6823_s29  ;;  %s4145_s29 = scalar_lea.sflag [#allocation5], %s326_s21 }
 0x3e3   : > { %v1599_v63 = vpop.permute.xlu0 %1598 }
 0x3e4   : > { %v2180_v39 = vpop.permute.xlu1 %2179  ;;  %1633 = vst.msk [vmem:[#allocation3 + $0xe0] sm:$0xff] %vm6845_vm12, %v1599_v63  ;;  %4477 = vmatpush3.bf16.msra.mxu1 %v4626_v5  ;;  %vm6848_vm12 = vmmov %vm6847_vm1 }
 0x3e5   : > { %2215 = vst.msk [vmem:[#allocation3 + $0xd0] sm:$0xff] %vm2201_vm14, %v2180_v39  ;;  %4478 = vmatprep.subr.bf16.mxu1 %v4627_v59 }
 0x3e6   : > { %2571 = vrot.lane.b32.xlu1 %v6496_v48, %s6832_s1  ;;  %s4642_s1 = sshll.u32 %s4718_s13, 4  ;;  %s4643_s1 = int_to_ptr.vmem [resolvable:$false] %s4642_s1 }
 0x3e7   : > { %v2372_v32 = vpop.permute.xlu0 %2371  ;;  %s4644_s26 = scalar_lea.vmem %s4643_s1, 64  ;;  %p4645_p0 = scmp.lt.s32.totalorder %s6727_s22, %s4643_s1 }
 0x3e8   : > { %v3084_v25 = vpop.permute.xlu1 %3083  ;;  %2408 = vst.msk [vmem:[#allocation3 + $0xc0] sm:$0xff] %vm2395_vm0, %v2372_v32  ;;  %4479 = vmatpush3.bf16.msra.mxu1 %v4627_v59  ;;  %p4646_p1 = scmp.lt.s32.totalorder %s4644_s26, %s4638_s18 }
 0x3e9   : > { %3118 = vst.msk [vmem:[#allocation3 + $0xd8] sm:$0xff] %vm6847_vm1, %v3084_v25  ;;  %vm6849_vm1 = vcmask 654912  }
 0x3ea   : > { %3471 = vrot.lane.b32.xlu1 %v3424_v57, %s6826_s23  ;;  %p4647_p2 = por %p4646_p1, %p4645_p0 }
 0x3eb   : > { %v3274_v28 = vpop.permute.xlu0 %3273 }
 0x3ec   : > { %v1504_v48 = vpop.permute.xlu1 %1503  ;;  %3309 = vst.msk [vmem:[#allocation3 + $0xc8] sm:$0xff] %vm1813_vm9, %v3274_v28  ;;  %p4648_p3 = pnand %p4647_p2, %p4641_p13 }
 0x3ed   : > { %1537 = vst.msk [vmem:[#allocation3 + $0xf0] sm:$0xff] %vm1521_vm6, %v1504_v48 }
 0x3ee   : > { %2669 = vrot.lane.b32.xlu1 %v6519_v58, %s6824_s17 }
 0x3ef   : > { %v1697_v20 = vpop.permute.xlu0 %1696 }
 0x3f0   : > { %v2277_v35 = vpop.permute.xlu1 %2276  ;;  %1731 = vst.msk [vmem:[#allocation3 + $0xe0] sm:$0xff] %vm1716_vm8, %v1697_v20 }
 0x3f1   : > { %2312 = vst.msk [vmem:[#allocation3 + $0xd0] sm:$0xff] %vm2298_vm15, %v2277_v35 }
 0x3f3   : > { %v2469_v14 = vpop.permute.xlu0 %2468 }
 0x3f4   : > { %v3180_v6 = vpop.permute.xlu1 %3179  ;;  %2505 = vst.msk [vmem:[#allocation3 + $0xc0] sm:$0xff] %vm2492_vm2, %v2469_v14 }
 0x3f5   : > { %3214 = vst.msk [vmem:[#allocation3 + $0xd8] sm:$0xff] %vm1716_vm8, %v3180_v6 }
 0x3f7   : > { %v3370_v45 = vpop.permute.xlu0 %3369 }
 0x3f8   : > { %v1601_v37 = vpop.permute.xlu1 %1600  ;;  %3405 = vst.msk [vmem:[#allocation3 + $0xc8] sm:$0xff] %vm1910_vm10, %v3370_v45 }
 0x3f9   : > { %1634 = vst.msk [vmem:[#allocation3 + $0xf0] sm:$0xff] %vm6848_vm12, %v1601_v37 }
 0x3fb   : > { %v1794_v34 = vpop.permute.xlu0 %1793 }
 0x3fc   : > { %v2374_v58 = vpop.permute.xlu1 %2373  ;;  %1828 = vst.msk [vmem:[#allocation3 + $0xe0] sm:$0xff] %vm1813_vm9, %v1794_v34 }
 0x3fd   : > { %2409 = vst.msk [vmem:[#allocation3 + $0xd0] sm:$0xff] %vm2395_vm0, %v2374_v58 }
 0x3ff   : > { %v2566_v41 = vpop.permute.xlu0 %2565 }
 0x400   : > { %v3276_v52 = vpop.permute.xlu1 %3275  ;;  %2602 = vst.msk [vmem:[#allocation3 + $0xc0] sm:$0xff] %vm2589_vm3, %v2566_v41 }
 0x401   : > { %3310 = vst.msk [vmem:[#allocation3 + $0xd8] sm:$0xff] %vm1813_vm9, %v3276_v52 }
 0x403   : > { %v3466_v3 = vpop.permute.xlu0 %3465 }
 0x404   : > { %v1699_v55 = vpop.permute.xlu1 %1698  ;;  %3501 = vst.msk [vmem:[#allocation3 + $0xc8] sm:$0xff] %vm2007_vm11, %v3466_v3 }
 0x405   : > { %1732 = vst.msk [vmem:[#allocation3 + $0xf0] sm:$0xff] %vm1716_vm8, %v1699_v55  ;;  %v4637_v55 = vld [vmem:[%s6770_s4] ss:$0 sm:$0xff] }
 0x407   : > { %v1891_v11 = vpop.permute.xlu0 %1890 }
 0x408   : > { %v2471_v50 = vpop.permute.xlu1 %2470  ;;  %1925 = vst.msk [vmem:[#allocation3 + $0xe0] sm:$0xff] %vm1910_vm10, %v1891_v11 }
 0x409   : > { %2506 = vst.msk [vmem:[#allocation3 + $0xd0] sm:$0xff] %vm2492_vm2, %v2471_v50 }
 0x40b   : > { %v2664_v13 = vpop.permute.xlu0 %2663  ;;  %v3530_v26 = vld [vmem:[#allocation3 + $0xc8] sm:$0xff] }
 0x40c   : > { %v3372_v42 = vpop.permute.xlu1 %3371  ;;  %2700 = vst.msk [vmem:[#allocation3 + $0xc0] sm:$0xff] %vm2687_vm13, %v2664_v13 }
 0x40d   : > { %3406 = vst.msk [vmem:[#allocation3 + $0xd8] sm:$0xff] %vm1910_vm10, %v3372_v42 }
 0x40f   : > { %v2797_v22 = vpop.permute.xlu0 %2796 }
 0x410   : > { %v1796_v10 = vpop.permute.xlu1 %1795  ;;  %2830 = vst.msk [vmem:[#allocation3 + $0xe8] sm:$0xff] %vm1327_vm4, %v2797_v22 }
 0x411   : > { %1829 = vst.msk [vmem:[#allocation3 + $0xf0] sm:$0xff] %vm1813_vm9, %v1796_v10 }
 0x413   : > { %v1988_v38 = vpop.permute.xlu0 %1987  ;;  %v3529_v7 = vld [vmem:[#allocation3 + $0xc0] sm:$0xff] }
 0x414   : > { %v2568_v46 = vpop.permute.xlu1 %2567  ;;  %2022 = vst.msk [vmem:[#allocation3 + $0xe0] sm:$0xff] %vm2007_vm11, %v1988_v38 }
 0x415   : > { %2603 = vst.msk [vmem:[#allocation3 + $0xd0] sm:$0xff] %vm2589_vm3, %v2568_v46 }
 0x417   : > { %v2893_v4 = vpop.permute.xlu0 %2892 }
 0x418   : > { %v3468_v56 = vpop.permute.xlu1 %3467  ;;  %2926 = vst.msk [vmem:[#allocation3 + $0xe8] sm:$0xff] %vm1424_vm5, %v2893_v4 }
 0x419   : > { %3502 = vst.msk [vmem:[#allocation3 + $0xd8] sm:$0xff] %vm2007_vm11, %v3468_v56 }
 0x41b   : > { %v2085_v9 = vpop.permute.xlu0 %2084 }
 0x41c   : > { %v1893_v60 = vpop.permute.xlu1 %1892  ;;  %2119 = vst.msk [vmem:[#allocation3 + $0xe0] sm:$0xff] %vm6849_vm1, %v2085_v9 }
 0x41d   : > { %1926 = vst.msk [vmem:[#allocation3 + $0xf0] sm:$0xff] %vm1910_vm10, %v1893_v60 }
 0x41f   : > { %v2989_v15 = vpop.permute.xlu0 %2988 }
 0x420   : > { %v2666_v53 = vpop.permute.xlu1 %2665  ;;  %v3532_v30 = vld [vmem:[#allocation3 + $0xd8] sm:$0xff]  ;;  %3022 = vst.msk [vmem:[#allocation3 + $0xe8] sm:$0xff] %vm1521_vm6, %v2989_v15  ;;  %v4630_v15 = vld [vmem:[%s6773_s7 + $0x28] sm:$0xff]  }
 0x421   : > { %2701 = vst.msk [vmem:[#allocation3 + $0xd0] sm:$0xff] %vm2687_vm13, %v2666_v53  ;;  %v3550_v19 = vpack.c.bf16 %v3532_v30, %v3530_v26 }
 0x423   : > { %4312 = vmatprep.mubr.msk.bf16.mxu1 %vm3660_vm7, %v3550_v19  ;;  %v2182_v29 = vpop.permute.xlu0 %2181 }
 0x424   : > { %v2799_v44 = vpop.permute.xlu1 %2798  ;;  %2216 = vst.msk [vmem:[#allocation3 + $0xe0] sm:$0xff] %vm2201_vm14, %v2182_v29  ;;  %v4631_v29 = vld [vmem:[%s6773_s7 + $0x20] sm:$0xff]  }
 0x425   : > { %2831 = vst.msk [vmem:[#allocation3 + $0xf8] sm:$0xff] %vm1327_vm4, %v2799_v44  ;;  %vm6850_vm4 = vmmov %vm6849_vm1 }
 0x427   : > { %v3086_v8 = vpop.permute.xlu0 %3085 }
 0x428   : > { %v1990_v61 = vpop.permute.xlu1 %1989  ;;  %v3531_v1 = vld [vmem:[#allocation3 + $0xd0] sm:$0xff]  ;;  %3119 = vst.msk [vmem:[#allocation3 + $0xe8] sm:$0xff] %vm6848_vm12, %v3086_v8 }
 0x429   : > { %2023 = vst.msk [vmem:[#allocation3 + $0xf0] sm:$0xff] %vm2007_vm11, %v1990_v61  ;;  %v3549_v2 = vpack.c.bf16 %v3531_v1, %v3529_v7  ;;  %v4632_v1 = vld [vmem:[%s6773_s7 + $0x18] sm:$0xff]  }
 0x42b   : > { %3770 = vmatmul.mubr.bf16.gmra.mxu1 %v3549_v2  ;;  %v2279_v36 = vpop.permute.xlu0 %2278  ;;  %v4633_v2 = vld [vmem:[%s6773_s7 + $0x10] sm:$0xff]  }
 0x42c   : > { %v2895_v40 = vpop.permute.xlu1 %2894  ;;  %2313 = vst.msk [vmem:[#allocation3 + $0xe0] sm:$0xff] %vm2298_vm15, %v2279_v36 }
 0x42d   : > { %2927 = vst.msk [vmem:[#allocation3 + $0xf8] sm:$0xff] %vm1424_vm5, %v2895_v40  ;;  %vm6851_vm5 = vmmov %vm6848_vm12 }
 0x42f   : > { %v3182_v27 = vpop.permute.xlu0 %3181 }
 0x430   : > { %v2087_v47 = vpop.permute.xlu1 %2086  ;;  %3215 = vst.msk [vmem:[#allocation3 + $0xe8] sm:$0xff] %vm1716_vm8, %v3182_v27 }
 0x431   : > { %2120 = vst.msk [vmem:[#allocation3 + $0xf0] sm:$0xff] %vm6850_vm4, %v2087_v47 }
 0x433   : > { %v3755_v0 = vpop.f32.mrf.mxu1  ;;  %v2376_v16 = vpop.permute.xlu0 %2375 }
 0x434   : > { %v2991_v43 = vpop.permute.xlu1 %2990  ;;  %2410 = vst.msk [vmem:[#allocation3 + $0xe0] sm:$0xff] %vm2395_vm0, %v2376_v16  ;;  %v3756_v50 = vadd.f32 %v4637_v55, %v3755_v0 }
 0x435   : > { %3023 = vst.msk [vmem:[#allocation3 + $0xf8] sm:$0xff] %vm1521_vm6, %v2991_v43  ;;  %v3757_v49 = vpop.f32.mrf.mxu1  ;;  %vm4717_vm6 = vmmov 0  }
 0x436   : > { %v3794_v42 = vmax.f32 %v3756_v50, 0.0  ;;  %4512 = vmatprep.mubr.msk.bf16.mxu0 %vm4717_vm6, %v4700_v18 }
 0x437   : > { %v3758_v21 = vpop.f32.mrf.mxu1  ;;  %v3278_v31 = vpop.permute.xlu0 %3277 }
 0x438   : > { %v2184_v54 = vpop.permute.xlu1 %2183  ;;  %3311 = vst.msk [vmem:[#allocation3 + $0xe8] sm:$0xff] %vm1813_vm9, %v3278_v31  ;;  %v3759_v3 = vadd.f32 %v4637_v55, %v3758_v21  ;;  %v4635_v31 = vld [vmem:[%s6773_s7] sm:$0xff]  }
 0x439   : > { %2217 = vst.msk [vmem:[#allocation3 + $0xf0] sm:$0xff] %vm2201_vm14, %v2184_v54  ;;  %v3760_v62 = vpop.f32.mrf.mxu1  ;;  %v4634_v54 = vld [vmem:[%s6773_s7 + $0x8] sm:$0xff]  }
 0x43a   : > { %v3795_v11 = vmax.f32 %v3759_v3, 0.0 }
 0x43b   : > { %v2473_v39 = vpop.permute.xlu0 %2472 }
 0x43c   : > { %v3088_v12 = vpop.permute.xlu1 %3087  ;;  %2507 = vst.msk [vmem:[#allocation3 + $0xe0] sm:$0xff] %vm2492_vm2, %v2473_v39  ;;  %v3806_v13 = vpack.c.bf16 %v3795_v11, %v3794_v42 }
 0x43d   : > { %3120 = vst.msk [vmem:[#allocation3 + $0xf8] sm:$0xff] %vm6851_vm5, %v3088_v12 }
 0x43f   : > { %v3374_v57 = vpop.permute.xlu0 %3373 }
 0x440   : > { %v2281_v63 = vpop.permute.xlu1 %2280  ;;  %3407 = vst.msk [vmem:[#allocation3 + $0xe8] sm:$0xff] %vm1910_vm10, %v3374_v57 }
 0x441   : > { %2314 = vst.msk [vmem:[#allocation3 + $0xf0] sm:$0xff] %vm2298_vm15, %v2281_v63 }
 0x443   : > { %v2570_v25 = vpop.permute.xlu0 %2569 }
 0x444   : > { %v3184_v24 = vpop.permute.xlu1 %3183  ;;  %2604 = vst.msk [vmem:[#allocation3 + $0xe0] sm:$0xff] %vm2589_vm3, %v2570_v25 }
 0x445   : > { %3216 = vst.msk [vmem:[#allocation3 + $0xf8] sm:$0xff] %vm1716_vm8, %v3184_v24  ;;  %v4314_v24 = vld [vmem:[%s6772_s6] ss:$0 sm:$0xff] }
 0x447   : > { %v3470_v5 = vpop.permute.xlu0 %3469 }
 0x448   : > { %v2378_v32 = vpop.permute.xlu1 %2377  ;;  %3503 = vst.msk [vmem:[#allocation3 + $0xe8] sm:$0xff] %vm2007_vm11, %v3470_v5 }
 0x449   : > { %2411 = vst.msk [vmem:[#allocation3 + $0xf0] sm:$0xff] %vm2395_vm0, %v2378_v32 }
 0x44b   : > { %v2668_v28 = vpop.permute.xlu0 %2667 }
 0x44c   : > { %v3280_v48 = vpop.permute.xlu1 %3279  ;;  %2702 = vst.msk [vmem:[#allocation3 + $0xe0] sm:$0xff] %vm2687_vm13, %v2668_v28 }
 0x44d   : > { %3312 = vst.msk [vmem:[#allocation3 + $0xf8] sm:$0xff] %vm1813_vm9, %v3280_v48 }
 0x44f   : > { %v3534_v37 = vld [vmem:[#allocation3 + $0xe8] sm:$0xff] }
 0x450   : > { %v2475_v59 = vpop.permute.xlu1 %2474 }
 0x451   : > { %2508 = vst.msk [vmem:[#allocation3 + $0xf0] sm:$0xff] %vm2492_vm2, %v2475_v59 }
 0x453   : > { %v3533_v34 = vld [vmem:[#allocation3 + $0xe0] sm:$0xff] }
 0x454   : > { %v3376_v35 = vpop.permute.xlu1 %3375 }
 0x455   : > { %3408 = vst.msk [vmem:[#allocation3 + $0xf8] sm:$0xff] %vm1910_vm10, %v3376_v35 }
 0x458   : > { %v2572_v20 = vpop.permute.xlu1 %2571 }
 0x459   : > { %2605 = vst.msk [vmem:[#allocation3 + $0xf0] sm:$0xff] %vm2589_vm3, %v2572_v20 }
 0x45c   : > { %v3472_v6 = vpop.permute.xlu1 %3471 }
 0x45d   : > { %3504 = vst.msk [vmem:[#allocation3 + $0xf8] sm:$0xff] %vm2007_vm11, %v3472_v6 }
 0x460   : > { %v2670_v14 = vpop.permute.xlu1 %2669 }
 0x461   : > { %2703 = vst.msk [vmem:[#allocation3 + $0xf0] sm:$0xff] %vm2687_vm13, %v2670_v14 }
 0x464   : > { %v3536_v45 = vld [vmem:[#allocation3 + $0xf8] sm:$0xff] }
 0x465   : > { %v3552_v58 = vpack.c.bf16 %v3536_v45, %v3534_v37 }
 0x467   : > { %4313 = vmatprep.mubr.msk.bf16.mxu1 %vm3660_vm7, %v3552_v58  ;;  %vm4051_vm7 = vcmask 1041409  }
 0x468   : > { %v3535_v52 = vld [vmem:[#allocation3 + $0xf0] sm:$0xff] }
 0x469   : > { %v3551_v41 = vpack.c.bf16 %v3535_v52, %v3533_v34 }
 0x46b   : > { %3778 = vmatmul.mubr.bf16.gmra.mxu1 %v3551_v41 }
 0x46c   : > { %4480 = vmatprep.mubr.bf16.mxu1 %v6208_v51 }
 0x473   : > { %4481 = vmatmul.mubr.bf16.vlgmr.msra.gmra.mxu1 %v6349_v17  ;;  %v4628_v17 = vld [vmem:[%s6773_s7 + $0x38] sm:$0xff]  }
 0x474   : > { %4484 = vmatprep.mubr.bf16.mxu1 %v6440_v33  ;;  %4497 = vmatpush3.bf16.msra.mxu0 %v4628_v17  ;;  %v4629_v33 = vld [vmem:[%s6773_s7 + $0x30] sm:$0xff]  }
 0x475   : > { %4498 = vmatprep.subr.bf16.mxu0 %v4700_v18 }
 0x478   : > { %4499 = vmatpush3.bf16.msra.mxu0 %v4629_v33 }
 0x479   : > { %4500 = vmatprep.subr.bf16.mxu0 %v4700_v18 }
 0x47b   : > { %4485 = vmatmul.mubr.bf16.gmra.mxu1 %v6592_v23 }
 0x47c   : > { %4488 = vmatprep.mubr.bf16.mxu1 %v3806_v13  ;;  %4501 = vmatpush3.bf16.msra.mxu0 %v4630_v15 }
 0x47d   : > { %4502 = vmatprep.subr.bf16.mxu0 %v4700_v18 }
 0x480   : > { %4503 = vmatpush3.bf16.msra.mxu0 %v4631_v29 }
 0x481   : > { %4504 = vmatprep.subr.bf16.mxu0 %v4700_v18 }
 0x484   : > { %4505 = vmatpush3.bf16.msra.mxu0 %v4632_v1 }
 0x485   : > { %4506 = vmatprep.subr.bf16.mxu0 %v4700_v18 }
 0x488   : > { %4507 = vmatpush3.bf16.msra.mxu0 %v4633_v2 }
 0x489   : > { %4508 = vmatprep.subr.bf16.mxu0 %v4700_v18 }
 0x48c   : > { %4509 = vmatpush3.bf16.msra.mxu0 %v4634_v54 }
 0x48d   : > { %4510 = vmatprep.subr.bf16.mxu0 %v4700_v18 }
 0x48f   : > { %v3763_v10 = vpop.f32.mrf.mxu1 }
 0x490   : > { %v3764_v46 = vadd.f32 %v4637_v55, %v3763_v10  ;;  %4511 = vmatpush3.bf16.msra.mxu0 %v4635_v31 }
 0x491   : > { %v3765_v22 = vpop.f32.mrf.mxu1 }
 0x492   : > { %v3796_v4 = vmax.f32 %v3764_v46, 0.0 }
 0x493   : > { %v3766_v51 = vpop.f32.mrf.mxu1 }
 0x494   : > { %v3767_v38 = vadd.f32 %v4637_v55, %v3766_v51 }
 0x495   : > { %v3768_v56 = vpop.f32.mrf.mxu1 }
 0x496   : > { %v3797_v60 = vmax.f32 %v3767_v38, 0.0 }
 0x498   : > { %v3807_v9 = vpack.c.bf16 %v3797_v60, %v3796_v4 }
 0x49a   : > { %4489 = vmatmul.mubr.bf16.gmra.mxu1 %v3807_v9 }
 0x4eb   : > { %v3771_v23 = vpop.f32.mrf.mxu1 }
 0x4ec   : > { %v3772_v26 = vadd.f32 %v4637_v55, %v3771_v23 }
 0x4ed   : > { %v3773_v53 = vpop.f32.mrf.mxu1 }
 0x4ee   : > { %v3798_v61 = vmax.f32 %v3772_v26, 0.0 }
 0x4ef   : > { %v3774_v30 = vpop.f32.mrf.mxu1 }
 0x4f0   : > { %v3775_v19 = vadd.f32 %v4637_v55, %v3774_v30 }
 0x4f1   : > { %v3776_v44 = vpop.f32.mrf.mxu1 }
 0x4f2   : > { %v3799_v8 = vmax.f32 %v3775_v19, 0.0 }
 0x4f4   : > { %v3808_v7 = vpack.c.bf16 %v3799_v8, %v3798_v61 }
 0x4f6   : > { %4492 = vmatprep.mubr.bf16.mxu1 %v3808_v7 }
 0x52b   : > { %v3779_v40 = vpop.f32.mrf.mxu1 }
 0x52c   : > { %v3780_v47 = vadd.f32 %v4637_v55, %v3779_v40 }
 0x52d   : > { %v3781_v36 = vpop.f32.mrf.mxu1 }
 0x52e   : > { %v3800_v16 = vmax.f32 %v3780_v47, 0.0 }
 0x52f   : > { %v3782_v27 = vpop.f32.mrf.mxu1 }
 0x530   : > { %v3783_v0 = vadd.f32 %v4637_v55, %v3782_v27 }
 0x531   : > { %v3784_v43 = vpop.f32.mrf.mxu1 }
 0x532   : > { %v3801_v49 = vmax.f32 %v3783_v0, 0.0 }
 0x533   : > { %v4482_v62 = vpop.f32.mrf.mxu1 }
 0x534   : > { %v3809_v21 = vpack.c.bf16 %v3801_v49, %v3800_v16  ;;  %v3924_v59 = vadd.f32 %v4482_v62, %v4314_v24 }
 0x535   : > { %v3915_v12 = vpop.f32.mrf.mxu1 }
 0x536   : > { %4493 = vmatmul.mubr.bf16.gmra.mxu1 %v3809_v21  ;;  %v3916_v5 = vadd.f32 %v4314_v24, %v3915_v12  ;;  %v3980_v18 = vmax.f32 %v3924_v59, 0.0 }
 0x537   : > { %v4483_v39 = vpop.f32.mrf.mxu1 }
 0x538   : > { %v3978_v35 = vmax.f32 %v3916_v5, 0.0  ;;  %v3927_v14 = vadd.f32 %v4483_v39, %v4314_v24 }
 0x539   : > { %v3918_v63 = vpop.f32.mrf.mxu1 }
 0x53a   : > { %v3919_v25 = vadd.f32 %v4314_v24, %v3918_v63  ;;  %v3981_v58 = vmax.f32 %v3927_v14, 0.0 }
 0x53b   : > { %v4486_v57 = vpop.f32.mrf.mxu1 }
 0x53c   : > { %v3979_v48 = vmax.f32 %v3919_v25, 0.0  ;;  %v3940_v13 = vadd.f32 %v4486_v57, %v4314_v24 }
 0x53d   : > { %v3931_v32 = vpop.f32.mrf.mxu1 }
 0x53e   : > { %v3994_v20 = vadd.f32 %v3979_v48, %v3978_v35  ;;  %v3932_v34 = vadd.f32 %v4314_v24, %v3931_v32  ;;  %v3984_v46 = vmax.f32 %v3940_v13, 0.0 }
 0x53f   : > { %v4487_v28 = vpop.f32.mrf.mxu1 }
 0x540   : > { %v3995_v45 = vadd.f32 %v3994_v20, %v3980_v18  ;;  %v3982_v3 = vmax.f32 %v3932_v34, 0.0  ;;  %v3943_v51 = vadd.f32 %v4487_v28, %v4314_v24 }
 0x541   : > { %v3934_v6 = vpop.f32.mrf.mxu1 }
 0x542   : > { %v3996_v41 = vadd.f32 %v3995_v45, %v3981_v58  ;;  %v3935_v55 = vadd.f32 %v4314_v24, %v3934_v6  ;;  %v3985_v60 = vmax.f32 %v3943_v51, 0.0  ;;  %v4323_v58 = vld [vmem:[%s6774_s8] ss:$0 sm:$0xff] }
 0x544   : > { %v3997_v11 = vadd.f32 %v3996_v41, %v3982_v3  ;;  %v3983_v42 = vmax.f32 %v3935_v55, 0.0 }
 0x546   : > { %v3998_v22 = vadd.f32 %v3997_v11, %v3983_v42 }
 0x548   : > { %v3999_v56 = vadd.f32 %v3998_v22, %v3984_v46 }
 0x54a   : > { %v4000_v17 = vadd.f32 %v3999_v56, %v3985_v60 }
 0x54c   : > { %v4001_v26 = vrot.slane %v4000_v17, 4 }
 0x54e   : > { %v4002_v7 = vadd.f32 %v4001_v26, %v4000_v17 }
 0x550   : > { %v4003_v0 = vrot.slane %v4002_v7, 2 }
 0x552   : > { %v4004_v31 = vadd.f32 %v4003_v0, %v4002_v7 }
 0x554   : > { %v4005_v63 = vrot.slane %v4004_v31, 1 }
 0x556   : > { %v4006_v32 = vadd.f32 %v4005_v63, %v4004_v31 }
 0x558   : > { %v4020_v28 = vmul.f32 0.015625, %v4006_v32 }
 0x55a   : > { %v4490_v37 = vpop.f32.mrf.mxu1  ;;  %v4022_v20 = vpack.c.bf16 %v4020_v28, %v4020_v28 }
 0x55b   : > { %v3956_v33 = vadd.f32 %v4490_v37, %v4314_v24 }
 0x55c   : > { %v3947_v52 = vpop.f32.mrf.mxu1  ;;  %v4049_v18 = vunpack.c.l.b16 %v4022_v20 }
 0x55d   : > { %v3948_v4 = vadd.f32 %v4314_v24, %v3947_v52  ;;  %v3988_v30 = vmax.f32 %v3956_v33, 0.0 }
 0x55e   : > { %v4491_v50 = vpop.f32.mrf.mxu1 }
 0x55f   : > { %v3986_v23 = vmax.f32 %v3948_v4, 0.0  ;;  %v3959_v19 = vadd.f32 %v4491_v50, %v4314_v24 }
 0x560   : > { %v3950_v10 = vpop.f32.mrf.mxu1 }
 0x561   : > { %v3951_v38 = vadd.f32 %v4314_v24, %v3950_v10  ;;  %v3989_v1 = vmax.f32 %v3959_v19, 0.0 }
 0x563   : > { %v3987_v9 = vmax.f32 %v3951_v38, 0.0 }
 0x565   : > { %v4007_v53 = vadd.f32 %v3987_v9, %v3986_v23 }
 0x567   : > { %v4008_v29 = vadd.f32 %v4007_v53, %v3988_v30 }
 0x569   : > { %v4009_v47 = vadd.f32 %v4008_v29, %v3989_v1 }
 0x5f6   : > { %v4494_v15 = vpop.f32.mrf.mxu1 }
 0x5f7   : > { %v3972_v36 = vadd.f32 %v4494_v15, %v4314_v24 }
 0x5f8   : > { %v3963_v44 = vpop.f32.mrf.mxu1 }
 0x5f9   : > { %v3964_v61 = vadd.f32 %v4314_v24, %v3963_v44  ;;  %v3992_v21 = vmax.f32 %v3972_v36, 0.0 }
 0x5fa   : > { %v4495_v8 = vpop.f32.mrf.mxu1 }
 0x5fb   : > { %v3990_v2 = vmax.f32 %v3964_v61, 0.0  ;;  %v3975_v16 = vadd.f32 %v4495_v8, %v4314_v24 }
 0x5fc   : > { %v3966_v40 = vpop.f32.mrf.mxu1 }
 0x5fd   : > { %v3967_v27 = vadd.f32 %v4314_v24, %v3966_v40  ;;  %v4010_v43 = vadd.f32 %v4009_v47, %v3990_v2  ;;  %v3993_v62 = vmax.f32 %v3975_v16, 0.0 }
 0x5ff   : > { %v3991_v49 = vmax.f32 %v3967_v27, 0.0 }
 0x601   : > { %v4011_v54 = vadd.f32 %v4010_v43, %v3991_v49 }
 0x603   : > { %v4012_v12 = vadd.f32 %v4011_v54, %v3992_v21 }
 0x605   : > { %v4013_v39 = vadd.f32 %v4012_v12, %v3993_v62 }
 0x607   : > { %v4014_v57 = vrot.slane %v4013_v39, 4 }
 0x609   : > { %v4015_v25 = vadd.f32 %v4014_v57, %v4013_v39 }
 0x60b   : > { %v4016_v5 = vrot.slane %v4015_v25, 2 }
 0x60d   : > { %v4017_v48 = vadd.f32 %v4016_v5, %v4015_v25 }
 0x60f   : > { %v4018_v59 = vrot.slane %v4017_v48, 1 }
 0x611   : > { %v4019_v35 = vadd.f32 %v4018_v59, %v4017_v48 }
 0x613   : > { %v4021_v24 = vmul.f32 0.015625, %v4019_v35 }
 0x615   : > { %v4023_v6 = vpack.c.bf16 %v4021_v24, %v4021_v24 }
 0x617   : > { %v4050_v14 = vunpack.c.l.b16 %v4023_v6 }
 0x619   : > { %v4052_v37 = vsel %vm4051_vm7, %v4050_v14, %v4049_v18 }
 0x61a   : > { %v4053_v45 = vpack.c.b16 %v4052_v37, %v4052_v37 }
 0x61c   : > { %4513 = vmatmul.mubr.bf16.vlgmr.msra.gmra.mxu0 %v4053_v45 }
 0x6dc   : > { %v4137_v34 = vpop.f32.mrf.mxu0 }
 0x6dd   : > { %v4138_v52 = vadd.f32 %v4323_v58, %v4137_v34 }
 0x6de   : > { %v4514_v41 = vpop.f32.mrf.mxu0 }
 0x6df   : > { %4143 = vst [vmem:[%s328_s28] sm:$0x3] %v4138_v52 }
 0x6e0   : > { %v4140_v55 = vpop.f32.mrf.mxu0 }
 0x6e1   : > { %4651 = shalt.err (!%p4648_p3)
}
 0x6e2   : > { %s4652_s23 = scalar_lea.hbm %s6725_s3, 32  ;;  %s4656_s21 = scalar_lea.hbm %s6775_s9, 64 }
 0x6e3   : > { %p4653_p4 = scmp.ne.s32.totalorder %s6725_s3, %s4652_s23  ;;  %p4657_p9 = scmp.lt.s32.totalorder %s6725_s3, %s6775_s9 }
 0x6e4   : > { %p4658_p10 = scmp.lt.s32.totalorder %s4656_s21, %s4652_s23 }
 0x6e5   : > { %p4654_p7 = pnand %p4653_p4, %p4807_p5 }
 0x6e6   : > { %p4659_p11 = por %p4658_p10, %p4657_p9 }
 0x6e7   : > { %p4655_p8 = pneg %p4654_p7 }
 0x6e9   : > { %p4660_p12 = pnand %p4659_p11, %p4655_p8 }
 0x6eb   : > { %4663 = shalt.err (!%p4660_p12)
}
 0x6ec   : > { %4516 = dma.vmem_to_hbm [thread:$0]  (%p4807_p5), %s6727_s22, 32, %s6725_s3, %s4145_s29   ;;  %v4515_v3 = vpop.f32.mrf.mxu0 }
 0x6ed PF: > { %p4522_p13 = scmp.ge.s32.totalorder %s4698_s12, 2  ;;  %s4170_s16 = sand.u32 1, %s4686_s30  }
 0x6ee   : > { %s4171_s14 = scalar_lea.sflag [#allocation5], %s4170_s16 }
 0x6ef   : > { %p4519_p0 = pnand %p4522_p13, %p4811_p6 }
 0x6f1   : > { %p4520_p1 = pneg %p4519_p0 }
 0x6f3   : > { %4681 = dma.done.wait (%p4520_p1), %s4171_s14, 32  }
 0x6f4   : > { %4683 = vsyncadd (%p4520_p1), %s4171_s14, 4294967264  ;;  %s6852_s28 = sld [smem:[#allocation7_spill]]  ;;  %p19_p2 = scmp.ge.s32.totalorder %s4794_s15, 4  }
 0x6f5   : > { %s6853_s11 = sld [smem:[#allocation8_spill]]  ;;  %s6854_s30 = smov %s4690_s10 }
 0x6f6   : > { %s6856_s12 = smov %s4794_s15  ;;  %21 = sbr.rel (!%p19_p2) target bundleno = 7 (0x7), region = 96 }
 0x6fa   : > { %s6855_s10 = smov %s6852_s28 }
 0x6fb   :  { %4176 = vsyncpa [#allocation5], 1 }
 0x6fc   :  { %4178 = vsyncpa [#allocation5 + $0x1], 1 }

</bundles_post_ra>
